<compile_context>
chip_gen: v7x
topology: tpu7x:2x2x1
jax: 0.10.0
libtpu: 0.0.40
codegen_flags: <defaults>
</compile_context>

<pallas_src>
import functools

import jax
import jax.numpy as jnp
from jax.experimental import pallas as pl
from jax.experimental.pallas import tpu as pltpu


def _vmem_spec():
    return pl.BlockSpec(memory_space=pltpu.MemorySpace.VMEM)


# ----------------------------------------------------------------------------
# Fused forward kernel.
# ----------------------------------------------------------------------------
def fused_forward_kernel(
        x_ref, we_ref, be_ref,                        # embed (x pre-padded to 128 lanes)
        agg_ref, hasedge_ref,                         # graph: (2, 2R*N, N), (2, R, N, 1)
        w1_ref, b1_ref, w2_ref, b2_ref, w3_ref, b3_ref,  # IGConv weights (2, R, ...)
        wp_ref, bp_ref, q_ref,                        # semantic attention
        wpred_ref, bpred_ref,                         # predict head (lane-padded)
        *refs,                                        # outputs + scratch
        compute_predict):
    if compute_predict:
        henc_ref, logit_ref, slab3_ref, zstack_ref = refs
    else:
        henc_ref, slab3_ref, zstack_ref = refs
        logit_ref = None

    N = x_ref.shape[0]
    H = we_ref.shape[1]
    R = hasedge_ref.shape[1]
    NEG = jnp.float32(-3.0e38)                        # finite f32 sentinel

    def igconv(l, r, h_f32, h_bf16, a_blk, sum_agg, mean_agg):
        # --- masked max over src nodes: per-src 2D select + max (pure VPU) ---
        # TODO(synk): at real N, chunk this with lax.fori_loop over ref slices.
        run_max = jnp.full((N, H), NEG, jnp.float32)
        for s in range(N):
            msk = a_blk[:, s:s + 1] > 0               # (N, 1) bf16 compare, no cast
            run_max = jnp.maximum(
                run_max, jnp.where(msk, h_f32[s:s + 1, :], NEG))
        max_agg = jnp.where(hasedge_ref[l, r] > 0.0, run_max, 0.0)

        # fc2(cat([max, mean, sum], 1)) as ONE K=3H matmul via a lane slab.
        # Row order of W2 matches the torch cat order [max | mean | sum].
        slab3_ref[:, 0:H] = max_agg.astype(jnp.bfloat16)
        slab3_ref[:, H:2 * H] = mean_agg.astype(jnp.bfloat16)
        slab3_ref[:, 2 * H:3 * H] = sum_agg.astype(jnp.bfloat16)
        u = jnp.dot(slab3_ref[...], w2_ref[l, r],
                    preferred_element_type=jnp.float32) + b2_ref[l, r]
        # fc1(h_dst)
        v = jnp.dot(h_bf16, w1_ref[l, r],
                    preferred_element_type=jnp.float32) + b1_ref[l, r]
        # fc3(relu(cat([fc2_out, fc1_out], 1))), fc3 = Linear + ReLU.
        # slab3 is dead after the fc2 matmul -> reuse its first 2H lanes.
        slab3_ref[:, 0:H] = jnp.maximum(u, 0.0).astype(jnp.bfloat16)
        slab3_ref[:, H:2 * H] = jnp.maximum(v, 0.0).astype(jnp.bfloat16)
        pre = jnp.dot(slab3_ref[:, 0:2 * H], w3_ref[l, r],
                      preferred_element_type=jnp.float32) + b3_ref[l, r]
        return jnp.maximum(pre, 0.0)                  # (N, H) f32

    def attention():
        # zstack holds the R per-relation outputs stacked along sublanes (bf16).
        z_all = zstack_ref[...]                                       # (R*N, H)
        p = jnp.tanh(jnp.dot(z_all, wp_ref[...],
                             preferred_element_type=jnp.float32) + bp_ref[...])
        s = jnp.dot(p.astype(jnp.bfloat16), q_ref[...],
                    preferred_element_type=jnp.float32)               # (R*N, 1)
        inv_n = jnp.float32(1.0 / N)
        ws = [jnp.sum(s[r * N:(r + 1) * N, :], axis=0, keepdims=True) * inv_n
              for r in range(R)]                                      # (1, 1) each
        m = ws[0]
        for w in ws[1:]:
            m = jnp.maximum(m, w)
        exps = [jnp.exp(w - m) for w in ws]
        denom = exps[0]
        for e in exps[1:]:
            denom = denom + e
        # approx reciprocal (EUP slot): relation weights sum to ~1 (documented).
        inv = pl.reciprocal(denom, approx=True)
        out = (exps[0] * inv) * zstack_ref[0:N, :].astype(jnp.float32)
        for r in range(1, R):
            out = out + (exps[r] * inv) * zstack_ref[r * N:(r + 1) * N, :].astype(jnp.float32)
        return out                                                    # (N, H) f32

    def layer(l, h_f32, apply_relu):
        h_bf = h_f32.astype(jnp.bfloat16)
        a_l = agg_ref[l]                              # (2R*N, N) bf16 [sum_r; mean_r]*R
        # sum + mean aggregation for ALL relations of this layer: ONE matmul.
        agg_all = jnp.dot(a_l, h_bf, preferred_element_type=jnp.float32)
        for r in range(R):
            base = 2 * r * N
            z = igconv(l, r, h_f32, h_bf,
                       a_l[base:base + N, :],                 # raw adjacency (= sum rows)
                       agg_all[base:base + N, :],             # sum aggregation
                       agg_all[base + N:base + 2 * N, :])     # mean aggregation
            zstack_ref[r * N:(r + 1) * N, :] = z.astype(jnp.bfloat16)
        out = attention()
        return jnp.maximum(out, 0.0) if apply_relu else out

    # x['user'] = embed(x['user'])
    h0 = jnp.dot(x_ref[...], we_ref[...],
                 preferred_element_type=jnp.float32) + be_ref[...]

    h1 = layer(0, h0, True)        # conv1 + relu(attn(.))
    h2 = layer(1, h1, False)       # conv2 + attn(.)

    henc_ref[...] = h2             # encode output

    if compute_predict:
        # predict = Linear(H, 1) + Sigmoid; weight lane-padded to (H, 128) so
        # the output is a full-lane (N, 128) slab (unmasked store, no broadcast).
        logit = jnp.dot(h2.astype(jnp.bfloat16), wpred_ref[...],
                        preferred_element_type=jnp.float32) + bpred_ref[...]
        logit_ref[...] = jax.nn.sigmoid(logit)


# ----------------------------------------------------------------------------
# Wrapper: pack graph structure + weights, single pallas_call.
# ----------------------------------------------------------------------------
def _pack_forward_inputs(params, blocks, x_user):
    num_rel = len(blocks[0])

    def build_agg_and_mask(l):
        rows, masks = [], []
        for r in range(num_rel):
            a_r = blocks[l][r].astype(jnp.float32)               # (N, N) in {0,1}
            deg = jnp.sum(a_r, axis=-1, keepdims=True)           # (N, 1)
            inv = 1.0 / jnp.maximum(deg, 1.0)
            rows.append(a_r)                                     # sum rows = raw A
            rows.append(a_r * inv)                               # mean rows (pre-normalized)
            masks.append((deg > 0.0).astype(jnp.float32))
        return jnp.concatenate(rows, axis=0), jnp.stack(masks)

    agg0, m0 = build_agg_and_mask(0)
    agg1, m1 = build_agg_and_mask(1)
    agg = jnp.stack([agg0, agg1]).astype(jnp.bfloat16)           # (2, 2R*N, N)
    has_edge = jnp.stack([m0, m1])                               # (2, R, N, 1)

    def stack_conv(idx, dtype):
        return jnp.stack([jnp.stack([params[key][r][idx] for r in range(num_rel)])
                          for key in ("conv1", "conv2")]).astype(dtype)

    w1 = stack_conv(0, jnp.bfloat16)
    b1 = stack_conv(1, jnp.float32)
    w2 = stack_conv(2, jnp.bfloat16)
    b2 = stack_conv(3, jnp.float32)
    w3 = stack_conv(4, jnp.bfloat16)
    b3 = stack_conv(5, jnp.float32)

    we, be = params["embed"]
    in_feats = we.shape[0]
    in_pad = ((in_feats + 127) // 128) * 128
    # Zero-pad the contraction dim of the embed matmul to a lane multiple.
    x_p = jnp.pad(x_user, ((0, 0), (0, in_pad - in_feats)))
    we_p = jnp.pad(we, ((0, in_pad - in_feats), (0, 0)))

    wpred, bpred = params["predict"]
    wpred_p = jnp.pad(wpred, ((0, 0), (0, 128 - wpred.shape[1])))
    bpred_p = jnp.pad(bpred, ((0, 0), (0, 128 - bpred.shape[1])))

    return (x_p.astype(jnp.bfloat16), we_p.astype(jnp.bfloat16), be,
            agg, has_edge,
            w1, b1, w2, b2, w3, b3,
            params["attn_wp"].astype(jnp.bfloat16), params["attn_bp"],
            params["attn_q"].astype(jnp.bfloat16),
            wpred_p.astype(jnp.bfloat16), bpred_p.astype(jnp.float32))


@functools.partial(jax.jit, static_argnames=("encode",))
def ig_rgcn_forward(params, blocks, x_user, encode=False):
    num_rel = len(blocks[0])
    n = x_user.shape[0]
    h = params["embed"][0].shape[1]
    args = _pack_forward_inputs(params, blocks, x_user)

    compute_predict = not encode
    out_shape = [jax.ShapeDtypeStruct((n, h), jnp.float32)]
    if compute_predict:
        out_shape.append(jax.ShapeDtypeStruct((n, 128), jnp.float32))

    outs = pl.pallas_call(
        functools.partial(fused_forward_kernel, compute_predict=compute_predict),
        out_shape=tuple(out_shape),
        in_specs=[_vmem_spec()] * len(args),
        out_specs=tuple(_vmem_spec() for _ in out_shape),
        scratch_shapes=[
            pltpu.VMEM((n, 3 * h), jnp.bfloat16),          # [max|mean|sum] / [fc2|fc1] slab
            pltpu.VMEM((num_rel * n, h), jnp.bfloat16),    # stacked per-relation z (bf16)
        ],
        compiler_params=pltpu.CompilerParams(
            vmem_limit_bytes=32 * 1024 * 1024),
    )(*args)

    if encode:
        return outs[0]
    return outs[1][:, :1]


# ----------------------------------------------------------------------------
# Parameter construction (deterministic, synthetic).
# ----------------------------------------------------------------------------
def init_params(key, in_feats, hid_feats, num_rel):
    def nxt():
        nonlocal key
        key, sub = jax.random.split(key)
        return sub

    def lin(fin, fout, scale=0.1):
        w = scale * jax.random.normal(nxt(), (fin, fout), jnp.float32)
        b = scale * jax.random.normal(nxt(), (1, fout), jnp.float32)
        return w, b

    def igconv_params(hh):
        w1, b1 = lin(hh, hh)
        w2, b2 = lin(3 * hh, hh)   # row order [max | mean | sum]
        w3, b3 = lin(2 * hh, hh)   # row order [fc2_out | fc1_out]
        return (w1, b1, w2, b2, w3, b3)

    return {
        "embed": lin(in_feats, hid_feats),
        "conv1": [igconv_params(hid_feats) for _ in range(num_rel)],
        "conv2": [igconv_params(hid_feats) for _ in range(num_rel)],
        # SemanticAttention(hid_feats, hidden_size=hid_feats), shared by both layers
        "attn_wp": 0.1 * jax.random.normal(nxt(), (hid_feats, hid_feats), jnp.float32),
        "attn_bp": 0.1 * jax.random.normal(nxt(), (1, hid_feats), jnp.float32),
        "attn_q": 0.1 * jax.random.normal(nxt(), (hid_feats, 1), jnp.float32),
        "predict": lin(hid_feats, 1),
    }


# ----------------------------------------------------------------------------
# Demo / smoke test.
# ----------------------------------------------------------------------------
if __name__ == "__main__":
    IN_FEATS = 16
    HID_FEATS = 128   # multiple of 128 -> lane-dense features
    NUM_NODES = 16    # single 'user' node type
    NUM_REL = 2       # two relation types -> stack dim of size 2

    key = jax.random.PRNGKey(0)
    kx, kg, kp = jax.random.split(key, 3)

    # node features for 'user'
    x_user = jax.random.normal(kx, (NUM_NODES, IN_FEATS), jnp.float32)

    # two blocks, each with one dense {0,1} adjacency per relation
    # (self-loops added so every dst node has at least one in-edge)
    gkeys = jax.random.split(kg, 2 * NUM_REL)
    eye = jnp.eye(NUM_NODES, dtype=jnp.float32)
    blocks = []
    idx = 0
    for _ in range(2):
        rels = []
        for _ in range(NUM_REL):
            a = (jax.random.uniform(gkeys[idx], (NUM_NODES, NUM_NODES)) < 0.3)
            a = jnp.maximum(a.astype(jnp.float32), eye)
            rels.append(a)
            idx += 1
        blocks.append(rels)

    params = init_params(kp, IN_FEATS, HID_FEATS, NUM_REL)

    logits = ig_rgcn_forward(params, blocks, x_user)
    logits = jax.block_until_ready(logits)
    assert logits.shape == (NUM_NODES, 1), logits.shape
    assert bool(jnp.all(jnp.isfinite(logits)))
    assert bool(jnp.all((logits >= 0.0) & (logits <= 1.0)))

    h_enc = ig_rgcn_forward(params, blocks, x_user, encode=True)
    h_enc = jax.block_until_ready(h_enc)
    assert h_enc.shape == (NUM_NODES, HID_FEATS), h_enc.shape
    assert bool(jnp.all(jnp.isfinite(h_enc)))

    print("KERNEL_OK")
</pallas_src>

<mosaic_0001>
module attributes {stable_mosaic.version = 11 : i64} {
  func.func @fused_forward_kernel(%arg0: memref<16x128xbf16, #tpu.memory_space<vmem>>, %arg1: memref<128x128xbf16, #tpu.memory_space<vmem>>, %arg2: memref<1x128xf32, #tpu.memory_space<vmem>>, %arg3: memref<2x64x16xbf16, #tpu.memory_space<vmem>>, %arg4: memref<2x2x16x1xf32, #tpu.memory_space<vmem>>, %arg5: memref<2x2x128x128xbf16, #tpu.memory_space<vmem>>, %arg6: memref<2x2x1x128xf32, #tpu.memory_space<vmem>>, %arg7: memref<2x2x384x128xbf16, #tpu.memory_space<vmem>>, %arg8: memref<2x2x1x128xf32, #tpu.memory_space<vmem>>, %arg9: memref<2x2x256x128xbf16, #tpu.memory_space<vmem>>, %arg10: memref<2x2x1x128xf32, #tpu.memory_space<vmem>>, %arg11: memref<128x128xbf16, #tpu.memory_space<vmem>>, %arg12: memref<1x128xf32, #tpu.memory_space<vmem>>, %arg13: memref<128x1xbf16, #tpu.memory_space<vmem>>, %arg14: memref<128x128xbf16, #tpu.memory_space<vmem>>, %arg15: memref<1x128xf32, #tpu.memory_space<vmem>>, %arg16: memref<16x128xf32, #tpu.memory_space<vmem>>, %arg17: memref<16x128xf32, #tpu.memory_space<vmem>>, %arg18: memref<16x384xbf16, #tpu.memory_space<vmem>>, %arg19: memref<32x128xbf16, #tpu.memory_space<vmem>>) attributes {dimension_semantics = [], scalar_prefetch = 0 : i64, scratch_operands = 2 : i64, tpu.core_type = #tpu.core_type<tc>} {
    %c0 = arith.constant 0 : index
    %c0_0 = arith.constant 0 : index
    %0 = vector.load %arg0[%c0, %c0_0] : memref<16x128xbf16, #tpu.memory_space<vmem>>, vector<16x128xbf16>
    %c0_1 = arith.constant 0 : index
    %c0_2 = arith.constant 0 : index
    %1 = vector.load %arg1[%c0_1, %c0_2] : memref<128x128xbf16, #tpu.memory_space<vmem>>, vector<128x128xbf16>
    %cst = arith.constant dense<0.000000e+00> : vector<16x128xf32>
    %2 = tpu.matmul %0, %1, %cst {dimension_numbers = #tpu.dot_dimension_numbers<[1], [0], [0], [1], [0, 0, 1, 1], [], []>} : vector<16x128xbf16>, vector<128x128xbf16>, vector<16x128xf32> -> vector<16x128xf32>
    %c0_3 = arith.constant 0 : index
    %c0_4 = arith.constant 0 : index
    %3 = vector.load %arg2[%c0_3, %c0_4] : memref<1x128xf32, #tpu.memory_space<vmem>>, vector<1x128xf32>
    %4 = vector.broadcast %3 : vector<1x128xf32> to vector<16x128xf32>
    %5 = arith.addf %2, %4 : vector<16x128xf32>
    %6 = arith.truncf %5 : vector<16x128xf32> to vector<16x128xbf16>
    %c0_5 = arith.constant 0 : index
    %c0_6 = arith.constant 0 : index
    %c0_7 = arith.constant 0 : index
    %7 = vector.load %arg3[%c0_5, %c0_6, %c0_7] : memref<2x64x16xbf16, #tpu.memory_space<vmem>>, vector<1x64x16xbf16>
    %8 = vector.shape_cast %7 : vector<1x64x16xbf16> to vector<64x16xbf16>
    %cst_8 = arith.constant dense<0.000000e+00> : vector<64x128xf32>
    %9 = tpu.matmul %8, %6, %cst_8 {dimension_numbers = #tpu.dot_dimension_numbers<[1], [0], [0], [1], [0, 0, 1, 1], [], []>} : vector<64x16xbf16>, vector<16x128xbf16>, vector<64x128xf32> -> vector<64x128xf32>
    %10 = vector.extract_strided_slice %8 {offsets = [0, 0], sizes = [16, 16], strides = [1, 1]} : vector<64x16xbf16> to vector<16x16xbf16>
    %11 = vector.extract_strided_slice %9 {offsets = [0, 0], sizes = [16, 128], strides = [1, 1]} : vector<64x128xf32> to vector<16x128xf32>
    %12 = vector.extract_strided_slice %9 {offsets = [16, 0], sizes = [16, 128], strides = [1, 1]} : vector<64x128xf32> to vector<16x128xf32>
    %cst_9 = arith.constant -3.000000e+38 : f32
    %13 = vector.broadcast %cst_9 : f32 to vector<16x128xf32>
    %14 = vector.extract_strided_slice %10 {offsets = [0, 0], sizes = [16, 1], strides = [1, 1]} : vector<16x16xbf16> to vector<16x1xbf16>
    %cst_10 = arith.constant 0.000000e+00 : bf16
    %15 = vector.broadcast %cst_10 : bf16 to vector<16x1xbf16>
    %16 = arith.cmpf ogt, %14, %15 : vector<16x1xbf16>
    %17 = vector.extract_strided_slice %5 {offsets = [0, 0], sizes = [1, 128], strides = [1, 1]} : vector<16x128xf32> to vector<1x128xf32>
    %cst_11 = arith.constant -3.000000e+38 : f32
    %18 = vector.shape_cast %16 : vector<16x1xi1> to vector<16x1xi1>
    %19 = vector.broadcast %18 : vector<16x1xi1> to vector<16x128xi1>
    %20 = vector.shape_cast %17 : vector<1x128xf32> to vector<1x128xf32>
    %21 = vector.broadcast %20 : vector<1x128xf32> to vector<16x128xf32>
    %22 = vector.broadcast %cst_11 : f32 to vector<16x128xf32>
    %23 = arith.select %19, %21, %22 : vector<16x128xi1>, vector<16x128xf32>
    %24 = arith.maximumf %13, %23 : vector<16x128xf32>
    %25 = vector.extract_strided_slice %10 {offsets = [0, 1], sizes = [16, 1], strides = [1, 1]} : vector<16x16xbf16> to vector<16x1xbf16>
    %cst_12 = arith.constant 0.000000e+00 : bf16
    %26 = vector.broadcast %cst_12 : bf16 to vector<16x1xbf16>
    %27 = arith.cmpf ogt, %25, %26 : vector<16x1xbf16>
    %28 = vector.extract_strided_slice %5 {offsets = [1, 0], sizes = [1, 128], strides = [1, 1]} : vector<16x128xf32> to vector<1x128xf32>
    %cst_13 = arith.constant -3.000000e+38 : f32
    %29 = vector.shape_cast %27 : vector<16x1xi1> to vector<16x1xi1>
    %30 = vector.broadcast %29 : vector<16x1xi1> to vector<16x128xi1>
    %31 = vector.shape_cast %28 : vector<1x128xf32> to vector<1x128xf32>
    %32 = vector.broadcast %31 : vector<1x128xf32> to vector<16x128xf32>
    %33 = vector.broadcast %cst_13 : f32 to vector<16x128xf32>
    %34 = arith.select %30, %32, %33 : vector<16x128xi1>, vector<16x128xf32>
    %35 = arith.maximumf %24, %34 : vector<16x128xf32>
    %36 = vector.extract_strided_slice %10 {offsets = [0, 2], sizes = [16, 1], strides = [1, 1]} : vector<16x16xbf16> to vector<16x1xbf16>
    %cst_14 = arith.constant 0.000000e+00 : bf16
    %37 = vector.broadcast %cst_14 : bf16 to vector<16x1xbf16>
    %38 = arith.cmpf ogt, %36, %37 : vector<16x1xbf16>
    %39 = vector.extract_strided_slice %5 {offsets = [2, 0], sizes = [1, 128], strides = [1, 1]} : vector<16x128xf32> to vector<1x128xf32>
    %cst_15 = arith.constant -3.000000e+38 : f32
    %40 = vector.shape_cast %38 : vector<16x1xi1> to vector<16x1xi1>
    %41 = vector.broadcast %40 : vector<16x1xi1> to vector<16x128xi1>
    %42 = vector.shape_cast %39 : vector<1x128xf32> to vector<1x128xf32>
    %43 = vector.broadcast %42 : vector<1x128xf32> to vector<16x128xf32>
    %44 = vector.broadcast %cst_15 : f32 to vector<16x128xf32>
    %45 = arith.select %41, %43, %44 : vector<16x128xi1>, vector<16x128xf32>
    %46 = arith.maximumf %35, %45 : vector<16x128xf32>
    %47 = vector.extract_strided_slice %10 {offsets = [0, 3], sizes = [16, 1], strides = [1, 1]} : vector<16x16xbf16> to vector<16x1xbf16>
    %cst_16 = arith.constant 0.000000e+00 : bf16
    %48 = vector.broadcast %cst_16 : bf16 to vector<16x1xbf16>
    %49 = arith.cmpf ogt, %47, %48 : vector<16x1xbf16>
    %50 = vector.extract_strided_slice %5 {offsets = [3, 0], sizes = [1, 128], strides = [1, 1]} : vector<16x128xf32> to vector<1x128xf32>
    %cst_17 = arith.constant -3.000000e+38 : f32
    %51 = vector.shape_cast %49 : vector<16x1xi1> to vector<16x1xi1>
    %52 = vector.broadcast %51 : vector<16x1xi1> to vector<16x128xi1>
    %53 = vector.shape_cast %50 : vector<1x128xf32> to vector<1x128xf32>
    %54 = vector.broadcast %53 : vector<1x128xf32> to vector<16x128xf32>
    %55 = vector.broadcast %cst_17 : f32 to vector<16x128xf32>
    %56 = arith.select %52, %54, %55 : vector<16x128xi1>, vector<16x128xf32>
    %57 = arith.maximumf %46, %56 : vector<16x128xf32>
    %58 = vector.extract_strided_slice %10 {offsets = [0, 4], sizes = [16, 1], strides = [1, 1]} : vector<16x16xbf16> to vector<16x1xbf16>
    %cst_18 = arith.constant 0.000000e+00 : bf16
    %59 = vector.broadcast %cst_18 : bf16 to vector<16x1xbf16>
    %60 = arith.cmpf ogt, %58, %59 : vector<16x1xbf16>
    %61 = vector.extract_strided_slice %5 {offsets = [4, 0], sizes = [1, 128], strides = [1, 1]} : vector<16x128xf32> to vector<1x128xf32>
    %cst_19 = arith.constant -3.000000e+38 : f32
    %62 = vector.shape_cast %60 : vector<16x1xi1> to vector<16x1xi1>
    %63 = vector.broadcast %62 : vector<16x1xi1> to vector<16x128xi1>
    %64 = vector.shape_cast %61 : vector<1x128xf32> to vector<1x128xf32>
    %65 = vector.broadcast %64 : vector<1x128xf32> to vector<16x128xf32>
    %66 = vector.broadcast %cst_19 : f32 to vector<16x128xf32>
    %67 = arith.select %63, %65, %66 : vector<16x128xi1>, vector<16x128xf32>
    %68 = arith.maximumf %57, %67 : vector<16x128xf32>
    %69 = vector.extract_strided_slice %10 {offsets = [0, 5], sizes = [16, 1], strides = [1, 1]} : vector<16x16xbf16> to vector<16x1xbf16>
    %cst_20 = arith.constant 0.000000e+00 : bf16
    %70 = vector.broadcast %cst_20 : bf16 to vector<16x1xbf16>
    %71 = arith.cmpf ogt, %69, %70 : vector<16x1xbf16>
    %72 = vector.extract_strided_slice %5 {offsets = [5, 0], sizes = [1, 128], strides = [1, 1]} : vector<16x128xf32> to vector<1x128xf32>
    %cst_21 = arith.constant -3.000000e+38 : f32
    %73 = vector.shape_cast %71 : vector<16x1xi1> to vector<16x1xi1>
    %74 = vector.broadcast %73 : vector<16x1xi1> to vector<16x128xi1>
    %75 = vector.shape_cast %72 : vector<1x128xf32> to vector<1x128xf32>
    %76 = vector.broadcast %75 : vector<1x128xf32> to vector<16x128xf32>
    %77 = vector.broadcast %cst_21 : f32 to vector<16x128xf32>
    %78 = arith.select %74, %76, %77 : vector<16x128xi1>, vector<16x128xf32>
    %79 = arith.maximumf %68, %78 : vector<16x128xf32>
    %80 = vector.extract_strided_slice %10 {offsets = [0, 6], sizes = [16, 1], strides = [1, 1]} : vector<16x16xbf16> to vector<16x1xbf16>
    %cst_22 = arith.constant 0.000000e+00 : bf16
    %81 = vector.broadcast %cst_22 : bf16 to vector<16x1xbf16>
    %82 = arith.cmpf ogt, %80, %81 : vector<16x1xbf16>
    %83 = vector.extract_strided_slice %5 {offsets = [6, 0], sizes = [1, 128], strides = [1, 1]} : vector<16x128xf32> to vector<1x128xf32>
    %cst_23 = arith.constant -3.000000e+38 : f32
    %84 = vector.shape_cast %82 : vector<16x1xi1> to vector<16x1xi1>
    %85 = vector.broadcast %84 : vector<16x1xi1> to vector<16x128xi1>
    %86 = vector.shape_cast %83 : vector<1x128xf32> to vector<1x128xf32>
    %87 = vector.broadcast %86 : vector<1x128xf32> to vector<16x128xf32>
    %88 = vector.broadcast %cst_23 : f32 to vector<16x128xf32>
    %89 = arith.select %85, %87, %88 : vector<16x128xi1>, vector<16x128xf32>
    %90 = arith.maximumf %79, %89 : vector<16x128xf32>
    %91 = vector.extract_strided_slice %10 {offsets = [0, 7], sizes = [16, 1], strides = [1, 1]} : vector<16x16xbf16> to vector<16x1xbf16>
    %cst_24 = arith.constant 0.000000e+00 : bf16
    %92 = vector.broadcast %cst_24 : bf16 to vector<16x1xbf16>
    %93 = arith.cmpf ogt, %91, %92 : vector<16x1xbf16>
    %94 = vector.extract_strided_slice %5 {offsets = [7, 0], sizes = [1, 128], strides = [1, 1]} : vector<16x128xf32> to vector<1x128xf32>
    %cst_25 = arith.constant -3.000000e+38 : f32
    %95 = vector.shape_cast %93 : vector<16x1xi1> to vector<16x1xi1>
    %96 = vector.broadcast %95 : vector<16x1xi1> to vector<16x128xi1>
    %97 = vector.shape_cast %94 : vector<1x128xf32> to vector<1x128xf32>
    %98 = vector.broadcast %97 : vector<1x128xf32> to vector<16x128xf32>
    %99 = vector.broadcast %cst_25 : f32 to vector<16x128xf32>
    %100 = arith.select %96, %98, %99 : vector<16x128xi1>, vector<16x128xf32>
    %101 = arith.maximumf %90, %100 : vector<16x128xf32>
    %102 = vector.extract_strided_slice %10 {offsets = [0, 8], sizes = [16, 1], strides = [1, 1]} : vector<16x16xbf16> to vector<16x1xbf16>
    %cst_26 = arith.constant 0.000000e+00 : bf16
    %103 = vector.broadcast %cst_26 : bf16 to vector<16x1xbf16>
    %104 = arith.cmpf ogt, %102, %103 : vector<16x1xbf16>
    %105 = vector.extract_strided_slice %5 {offsets = [8, 0], sizes = [1, 128], strides = [1, 1]} : vector<16x128xf32> to vector<1x128xf32>
    %cst_27 = arith.constant -3.000000e+38 : f32
    %106 = vector.shape_cast %104 : vector<16x1xi1> to vector<16x1xi1>
    %107 = vector.broadcast %106 : vector<16x1xi1> to vector<16x128xi1>
    %108 = vector.shape_cast %105 : vector<1x128xf32> to vector<1x128xf32>
    %109 = vector.broadcast %108 : vector<1x128xf32> to vector<16x128xf32>
    %110 = vector.broadcast %cst_27 : f32 to vector<16x128xf32>
    %111 = arith.select %107, %109, %110 : vector<16x128xi1>, vector<16x128xf32>
    %112 = arith.maximumf %101, %111 : vector<16x128xf32>
    %113 = vector.extract_strided_slice %10 {offsets = [0, 9], sizes = [16, 1], strides = [1, 1]} : vector<16x16xbf16> to vector<16x1xbf16>
    %cst_28 = arith.constant 0.000000e+00 : bf16
    %114 = vector.broadcast %cst_28 : bf16 to vector<16x1xbf16>
    %115 = arith.cmpf ogt, %113, %114 : vector<16x1xbf16>
    %116 = vector.extract_strided_slice %5 {offsets = [9, 0], sizes = [1, 128], strides = [1, 1]} : vector<16x128xf32> to vector<1x128xf32>
    %cst_29 = arith.constant -3.000000e+38 : f32
    %117 = vector.shape_cast %115 : vector<16x1xi1> to vector<16x1xi1>
    %118 = vector.broadcast %117 : vector<16x1xi1> to vector<16x128xi1>
    %119 = vector.shape_cast %116 : vector<1x128xf32> to vector<1x128xf32>
    %120 = vector.broadcast %119 : vector<1x128xf32> to vector<16x128xf32>
    %121 = vector.broadcast %cst_29 : f32 to vector<16x128xf32>
    %122 = arith.select %118, %120, %121 : vector<16x128xi1>, vector<16x128xf32>
    %123 = arith.maximumf %112, %122 : vector<16x128xf32>
    %124 = vector.extract_strided_slice %10 {offsets = [0, 10], sizes = [16, 1], strides = [1, 1]} : vector<16x16xbf16> to vector<16x1xbf16>
    %cst_30 = arith.constant 0.000000e+00 : bf16
    %125 = vector.broadcast %cst_30 : bf16 to vector<16x1xbf16>
    %126 = arith.cmpf ogt, %124, %125 : vector<16x1xbf16>
    %127 = vector.extract_strided_slice %5 {offsets = [10, 0], sizes = [1, 128], strides = [1, 1]} : vector<16x128xf32> to vector<1x128xf32>
    %cst_31 = arith.constant -3.000000e+38 : f32
    %128 = vector.shape_cast %126 : vector<16x1xi1> to vector<16x1xi1>
    %129 = vector.broadcast %128 : vector<16x1xi1> to vector<16x128xi1>
    %130 = vector.shape_cast %127 : vector<1x128xf32> to vector<1x128xf32>
    %131 = vector.broadcast %130 : vector<1x128xf32> to vector<16x128xf32>
    %132 = vector.broadcast %cst_31 : f32 to vector<16x128xf32>
    %133 = arith.select %129, %131, %132 : vector<16x128xi1>, vector<16x128xf32>
    %134 = arith.maximumf %123, %133 : vector<16x128xf32>
    %135 = vector.extract_strided_slice %10 {offsets = [0, 11], sizes = [16, 1], strides = [1, 1]} : vector<16x16xbf16> to vector<16x1xbf16>
    %cst_32 = arith.constant 0.000000e+00 : bf16
    %136 = vector.broadcast %cst_32 : bf16 to vector<16x1xbf16>
    %137 = arith.cmpf ogt, %135, %136 : vector<16x1xbf16>
    %138 = vector.extract_strided_slice %5 {offsets = [11, 0], sizes = [1, 128], strides = [1, 1]} : vector<16x128xf32> to vector<1x128xf32>
    %cst_33 = arith.constant -3.000000e+38 : f32
    %139 = vector.shape_cast %137 : vector<16x1xi1> to vector<16x1xi1>
    %140 = vector.broadcast %139 : vector<16x1xi1> to vector<16x128xi1>
    %141 = vector.shape_cast %138 : vector<1x128xf32> to vector<1x128xf32>
    %142 = vector.broadcast %141 : vector<1x128xf32> to vector<16x128xf32>
    %143 = vector.broadcast %cst_33 : f32 to vector<16x128xf32>
    %144 = arith.select %140, %142, %143 : vector<16x128xi1>, vector<16x128xf32>
    %145 = arith.maximumf %134, %144 : vector<16x128xf32>
    %146 = vector.extract_strided_slice %10 {offsets = [0, 12], sizes = [16, 1], strides = [1, 1]} : vector<16x16xbf16> to vector<16x1xbf16>
    %cst_34 = arith.constant 0.000000e+00 : bf16
    %147 = vector.broadcast %cst_34 : bf16 to vector<16x1xbf16>
    %148 = arith.cmpf ogt, %146, %147 : vector<16x1xbf16>
    %149 = vector.extract_strided_slice %5 {offsets = [12, 0], sizes = [1, 128], strides = [1, 1]} : vector<16x128xf32> to vector<1x128xf32>
    %cst_35 = arith.constant -3.000000e+38 : f32
    %150 = vector.shape_cast %148 : vector<16x1xi1> to vector<16x1xi1>
    %151 = vector.broadcast %150 : vector<16x1xi1> to vector<16x128xi1>
    %152 = vector.shape_cast %149 : vector<1x128xf32> to vector<1x128xf32>
    %153 = vector.broadcast %152 : vector<1x128xf32> to vector<16x128xf32>
    %154 = vector.broadcast %cst_35 : f32 to vector<16x128xf32>
    %155 = arith.select %151, %153, %154 : vector<16x128xi1>, vector<16x128xf32>
    %156 = arith.maximumf %145, %155 : vector<16x128xf32>
    %157 = vector.extract_strided_slice %10 {offsets = [0, 13], sizes = [16, 1], strides = [1, 1]} : vector<16x16xbf16> to vector<16x1xbf16>
    %cst_36 = arith.constant 0.000000e+00 : bf16
    %158 = vector.broadcast %cst_36 : bf16 to vector<16x1xbf16>
    %159 = arith.cmpf ogt, %157, %158 : vector<16x1xbf16>
    %160 = vector.extract_strided_slice %5 {offsets = [13, 0], sizes = [1, 128], strides = [1, 1]} : vector<16x128xf32> to vector<1x128xf32>
    %cst_37 = arith.constant -3.000000e+38 : f32
    %161 = vector.shape_cast %159 : vector<16x1xi1> to vector<16x1xi1>
    %162 = vector.broadcast %161 : vector<16x1xi1> to vector<16x128xi1>
    %163 = vector.shape_cast %160 : vector<1x128xf32> to vector<1x128xf32>
    %164 = vector.broadcast %163 : vector<1x128xf32> to vector<16x128xf32>
    %165 = vector.broadcast %cst_37 : f32 to vector<16x128xf32>
    %166 = arith.select %162, %164, %165 : vector<16x128xi1>, vector<16x128xf32>
    %167 = arith.maximumf %156, %166 : vector<16x128xf32>
    %168 = vector.extract_strided_slice %10 {offsets = [0, 14], sizes = [16, 1], strides = [1, 1]} : vector<16x16xbf16> to vector<16x1xbf16>
    %cst_38 = arith.constant 0.000000e+00 : bf16
    %169 = vector.broadcast %cst_38 : bf16 to vector<16x1xbf16>
    %170 = arith.cmpf ogt, %168, %169 : vector<16x1xbf16>
    %171 = vector.extract_strided_slice %5 {offsets = [14, 0], sizes = [1, 128], strides = [1, 1]} : vector<16x128xf32> to vector<1x128xf32>
    %cst_39 = arith.constant -3.000000e+38 : f32
    %172 = vector.shape_cast %170 : vector<16x1xi1> to vector<16x1xi1>
    %173 = vector.broadcast %172 : vector<16x1xi1> to vector<16x128xi1>
    %174 = vector.shape_cast %171 : vector<1x128xf32> to vector<1x128xf32>
    %175 = vector.broadcast %174 : vector<1x128xf32> to vector<16x128xf32>
    %176 = vector.broadcast %cst_39 : f32 to vector<16x128xf32>
    %177 = arith.select %173, %175, %176 : vector<16x128xi1>, vector<16x128xf32>
    %178 = arith.maximumf %167, %177 : vector<16x128xf32>
    %179 = vector.extract_strided_slice %10 {offsets = [0, 15], sizes = [16, 1], strides = [1, 1]} : vector<16x16xbf16> to vector<16x1xbf16>
    %cst_40 = arith.constant 0.000000e+00 : bf16
    %180 = vector.broadcast %cst_40 : bf16 to vector<16x1xbf16>
    %181 = arith.cmpf ogt, %179, %180 : vector<16x1xbf16>
    %182 = vector.extract_strided_slice %5 {offsets = [15, 0], sizes = [1, 128], strides = [1, 1]} : vector<16x128xf32> to vector<1x128xf32>
    %cst_41 = arith.constant -3.000000e+38 : f32
    %183 = vector.shape_cast %181 : vector<16x1xi1> to vector<16x1xi1>
    %184 = vector.broadcast %183 : vector<16x1xi1> to vector<16x128xi1>
    %185 = vector.shape_cast %182 : vector<1x128xf32> to vector<1x128xf32>
    %186 = vector.broadcast %185 : vector<1x128xf32> to vector<16x128xf32>
    %187 = vector.broadcast %cst_41 : f32 to vector<16x128xf32>
    %188 = arith.select %184, %186, %187 : vector<16x128xi1>, vector<16x128xf32>
    %189 = arith.maximumf %178, %188 : vector<16x128xf32>
    %c0_42 = arith.constant 0 : index
    %c0_43 = arith.constant 0 : index
    %c0_44 = arith.constant 0 : index
    %c0_45 = arith.constant 0 : index
    %190 = vector.load %arg4[%c0_42, %c0_43, %c0_44, %c0_45] : memref<2x2x16x1xf32, #tpu.memory_space<vmem>>, vector<1x1x16x1xf32>
    %191 = vector.shape_cast %190 : vector<1x1x16x1xf32> to vector<16x1xf32>
    %cst_46 = arith.constant 0.000000e+00 : f32
    %192 = vector.broadcast %cst_46 : f32 to vector<16x1xf32>
    %193 = arith.cmpf ogt, %191, %192 : vector<16x1xf32>
    %cst_47 = arith.constant 0.000000e+00 : f32
    %194 = vector.shape_cast %193 : vector<16x1xi1> to vector<16x1xi1>
    %195 = vector.broadcast %194 : vector<16x1xi1> to vector<16x128xi1>
    %196 = vector.broadcast %cst_47 : f32 to vector<16x128xf32>
    %197 = arith.select %195, %189, %196 : vector<16x128xi1>, vector<16x128xf32>
    %198 = arith.truncf %197 : vector<16x128xf32> to vector<16x128xbf16>
    %c0_48 = arith.constant 0 : index
    %c0_49 = arith.constant 0 : index
    %199 = vector.load %arg18[%c0_48, %c0_49] : memref<16x384xbf16, #tpu.memory_space<vmem>>, vector<16x128xbf16>
    tpu.vector_store %arg18[%c0_48, %c0_49], %198 {strides = array<i32>} : memref<16x384xbf16, #tpu.memory_space<vmem>>, vector<16x128xbf16>,
    %200 = arith.truncf %12 : vector<16x128xf32> to vector<16x128xbf16>
    %c0_50 = arith.constant 0 : index
    %c128 = arith.constant 128 : index
    %201 = vector.load %arg18[%c0_50, %c128] : memref<16x384xbf16, #tpu.memory_space<vmem>>, vector<16x128xbf16>
    tpu.vector_store %arg18[%c0_50, %c128], %200 {strides = array<i32>} : memref<16x384xbf16, #tpu.memory_space<vmem>>, vector<16x128xbf16>,
    %202 = arith.truncf %11 : vector<16x128xf32> to vector<16x128xbf16>
    %c0_51 = arith.constant 0 : index
    %c256 = arith.constant 256 : index
    %203 = vector.load %arg18[%c0_51, %c256] : memref<16x384xbf16, #tpu.memory_space<vmem>>, vector<16x128xbf16>
    tpu.vector_store %arg18[%c0_51, %c256], %202 {strides = array<i32>} : memref<16x384xbf16, #tpu.memory_space<vmem>>, vector<16x128xbf16>,
    %c0_52 = arith.constant 0 : index
    %c0_53 = arith.constant 0 : index
    %204 = vector.load %arg18[%c0_52, %c0_53] : memref<16x384xbf16, #tpu.memory_space<vmem>>, vector<16x384xbf16>
    %c0_54 = arith.constant 0 : index
    %c0_55 = arith.constant 0 : index
    %c0_56 = arith.constant 0 : index
    %c0_57 = arith.constant 0 : index
    %205 = vector.load %arg7[%c0_54, %c0_55, %c0_56, %c0_57] : memref<2x2x384x128xbf16, #tpu.memory_space<vmem>>, vector<1x1x384x128xbf16>
    %206 = vector.shape_cast %205 : vector<1x1x384x128xbf16> to vector<384x128xbf16>
    %cst_58 = arith.constant dense<0.000000e+00> : vector<16x128xf32>
    %207 = tpu.matmul %204, %206, %cst_58 {dimension_numbers = #tpu.dot_dimension_numbers<[1], [0], [0], [1], [0, 0, 1, 1], [], []>} : vector<16x384xbf16>, vector<384x128xbf16>, vector<16x128xf32> -> vector<16x128xf32>
    %c0_59 = arith.constant 0 : index
    %c0_60 = arith.constant 0 : index
    %c0_61 = arith.constant 0 : index
    %c0_62 = arith.constant 0 : index
    %208 = vector.load %arg8[%c0_59, %c0_60, %c0_61, %c0_62] : memref<2x2x1x128xf32, #tpu.memory_space<vmem>>, vector<1x1x1x128xf32>
    %209 = vector.shape_cast %208 : vector<1x1x1x128xf32> to vector<1x128xf32>
    %210 = vector.broadcast %209 : vector<1x128xf32> to vector<16x128xf32>
    %211 = arith.addf %207, %210 : vector<16x128xf32>
    %c0_63 = arith.constant 0 : index
    %c0_64 = arith.constant 0 : index
    %c0_65 = arith.constant 0 : index
    %c0_66 = arith.constant 0 : index
    %212 = vector.load %arg5[%c0_63, %c0_64, %c0_65, %c0_66] : memref<2x2x128x128xbf16, #tpu.memory_space<vmem>>, vector<1x1x128x128xbf16>
    %213 = vector.shape_cast %212 : vector<1x1x128x128xbf16> to vector<128x128xbf16>
    %cst_67 = arith.constant dense<0.000000e+00> : vector<16x128xf32>
    %214 = tpu.matmul %6, %213, %cst_67 {dimension_numbers = #tpu.dot_dimension_numbers<[1], [0], [0], [1], [0, 0, 1, 1], [], []>} : vector<16x128xbf16>, vector<128x128xbf16>, vector<16x128xf32> -> vector<16x128xf32>
    %c0_68 = arith.constant 0 : index
    %c0_69 = arith.constant 0 : index
    %c0_70 = arith.constant 0 : index
    %c0_71 = arith.constant 0 : index
    %215 = vector.load %arg6[%c0_68, %c0_69, %c0_70, %c0_71] : memref<2x2x1x128xf32, #tpu.memory_space<vmem>>, vector<1x1x1x128xf32>
    %216 = vector.shape_cast %215 : vector<1x1x1x128xf32> to vector<1x128xf32>
    %217 = vector.broadcast %216 : vector<1x128xf32> to vector<16x128xf32>
    %218 = arith.addf %214, %217 : vector<16x128xf32>
    %cst_72 = arith.constant 0.000000e+00 : f32
    %219 = vector.broadcast %cst_72 : f32 to vector<16x128xf32>
    %220 = arith.maximumf %211, %219 : vector<16x128xf32>
    %221 = arith.truncf %220 : vector<16x128xf32> to vector<16x128xbf16>
    %c0_73 = arith.constant 0 : index
    %c0_74 = arith.constant 0 : index
    %222 = vector.load %arg18[%c0_73, %c0_74] : memref<16x384xbf16, #tpu.memory_space<vmem>>, vector<16x128xbf16>
    tpu.vector_store %arg18[%c0_73, %c0_74], %221 {strides = array<i32>} : memref<16x384xbf16, #tpu.memory_space<vmem>>, vector<16x128xbf16>,
    %cst_75 = arith.constant 0.000000e+00 : f32
    %223 = vector.broadcast %cst_75 : f32 to vector<16x128xf32>
    %224 = arith.maximumf %218, %223 : vector<16x128xf32>
    %225 = arith.truncf %224 : vector<16x128xf32> to vector<16x128xbf16>
    %c0_76 = arith.constant 0 : index
    %c128_77 = arith.constant 128 : index
    %226 = vector.load %arg18[%c0_76, %c128_77] : memref<16x384xbf16, #tpu.memory_space<vmem>>, vector<16x128xbf16>
    tpu.vector_store %arg18[%c0_76, %c128_77], %225 {strides = array<i32>} : memref<16x384xbf16, #tpu.memory_space<vmem>>, vector<16x128xbf16>,
    %c0_78 = arith.constant 0 : index
    %c0_79 = arith.constant 0 : index
    %227 = vector.load %arg18[%c0_78, %c0_79] : memref<16x384xbf16, #tpu.memory_space<vmem>>, vector<16x256xbf16>
    %c0_80 = arith.constant 0 : index
    %c0_81 = arith.constant 0 : index
    %c0_82 = arith.constant 0 : index
    %c0_83 = arith.constant 0 : index
    %228 = vector.load %arg9[%c0_80, %c0_81, %c0_82, %c0_83] : memref<2x2x256x128xbf16, #tpu.memory_space<vmem>>, vector<1x1x256x128xbf16>
    %229 = vector.shape_cast %228 : vector<1x1x256x128xbf16> to vector<256x128xbf16>
    %cst_84 = arith.constant dense<0.000000e+00> : vector<16x128xf32>
    %230 = tpu.matmul %227, %229, %cst_84 {dimension_numbers = #tpu.dot_dimension_numbers<[1], [0], [0], [1], [0, 0, 1, 1], [], []>} : vector<16x256xbf16>, vector<256x128xbf16>, vector<16x128xf32> -> vector<16x128xf32>
    %c0_85 = arith.constant 0 : index
    %c0_86 = arith.constant 0 : index
    %c0_87 = arith.constant 0 : index
    %c0_88 = arith.constant 0 : index
    %231 = vector.load %arg10[%c0_85, %c0_86, %c0_87, %c0_88] : memref<2x2x1x128xf32, #tpu.memory_space<vmem>>, vector<1x1x1x128xf32>
    %232 = vector.shape_cast %231 : vector<1x1x1x128xf32> to vector<1x128xf32>
    %233 = vector.broadcast %232 : vector<1x128xf32> to vector<16x128xf32>
    %234 = arith.addf %230, %233 : vector<16x128xf32>
    %cst_89 = arith.constant 0.000000e+00 : f32
    %235 = vector.broadcast %cst_89 : f32 to vector<16x128xf32>
    %236 = arith.maximumf %234, %235 : vector<16x128xf32>
    %237 = arith.truncf %236 : vector<16x128xf32> to vector<16x128xbf16>
    %c0_90 = arith.constant 0 : index
    %c0_91 = arith.constant 0 : index
    %238 = vector.load %arg19[%c0_90, %c0_91] : memref<32x128xbf16, #tpu.memory_space<vmem>>, vector<16x128xbf16>
    tpu.vector_store %arg19[%c0_90, %c0_91], %237 {strides = array<i32>} : memref<32x128xbf16, #tpu.memory_space<vmem>>, vector<16x128xbf16>,
    %239 = vector.extract_strided_slice %8 {offsets = [32, 0], sizes = [16, 16], strides = [1, 1]} : vector<64x16xbf16> to vector<16x16xbf16>
    %240 = vector.extract_strided_slice %9 {offsets = [32, 0], sizes = [16, 128], strides = [1, 1]} : vector<64x128xf32> to vector<16x128xf32>
    %241 = vector.extract_strided_slice %9 {offsets = [48, 0], sizes = [16, 128], strides = [1, 1]} : vector<64x128xf32> to vector<16x128xf32>
    %cst_92 = arith.constant -3.000000e+38 : f32
    %242 = vector.broadcast %cst_92 : f32 to vector<16x128xf32>
    %243 = vector.extract_strided_slice %239 {offsets = [0, 0], sizes = [16, 1], strides = [1, 1]} : vector<16x16xbf16> to vector<16x1xbf16>
    %cst_93 = arith.constant 0.000000e+00 : bf16
    %244 = vector.broadcast %cst_93 : bf16 to vector<16x1xbf16>
    %245 = arith.cmpf ogt, %243, %244 : vector<16x1xbf16>
    %246 = vector.extract_strided_slice %5 {offsets = [0, 0], sizes = [1, 128], strides = [1, 1]} : vector<16x128xf32> to vector<1x128xf32>
    %cst_94 = arith.constant -3.000000e+38 : f32
    %247 = vector.shape_cast %245 : vector<16x1xi1> to vector<16x1xi1>
    %248 = vector.broadcast %247 : vector<16x1xi1> to vector<16x128xi1>
    %249 = vector.shape_cast %246 : vector<1x128xf32> to vector<1x128xf32>
    %250 = vector.broadcast %249 : vector<1x128xf32> to vector<16x128xf32>
    %251 = vector.broadcast %cst_94 : f32 to vector<16x128xf32>
    %252 = arith.select %248, %250, %251 : vector<16x128xi1>, vector<16x128xf32>
    %253 = arith.maximumf %242, %252 : vector<16x128xf32>
    %254 = vector.extract_strided_slice %239 {offsets = [0, 1], sizes = [16, 1], strides = [1, 1]} : vector<16x16xbf16> to vector<16x1xbf16>
    %cst_95 = arith.constant 0.000000e+00 : bf16
    %255 = vector.broadcast %cst_95 : bf16 to vector<16x1xbf16>
    %256 = arith.cmpf ogt, %254, %255 : vector<16x1xbf16>
    %257 = vector.extract_strided_slice %5 {offsets = [1, 0], sizes = [1, 128], strides = [1, 1]} : vector<16x128xf32> to vector<1x128xf32>
    %cst_96 = arith.constant -3.000000e+38 : f32
    %258 = vector.shape_cast %256 : vector<16x1xi1> to vector<16x1xi1>
    %259 = vector.broadcast %258 : vector<16x1xi1> to vector<16x128xi1>
    %260 = vector.shape_cast %257 : vector<1x128xf32> to vector<1x128xf32>
    %261 = vector.broadcast %260 : vector<1x128xf32> to vector<16x128xf32>
    %262 = vector.broadcast %cst_96 : f32 to vector<16x128xf32>
    %263 = arith.select %259, %261, %262 : vector<16x128xi1>, vector<16x128xf32>
    %264 = arith.maximumf %253, %263 : vector<16x128xf32>
    %265 = vector.extract_strided_slice %239 {offsets = [0, 2], sizes = [16, 1], strides = [1, 1]} : vector<16x16xbf16> to vector<16x1xbf16>
    %cst_97 = arith.constant 0.000000e+00 : bf16
    %266 = vector.broadcast %cst_97 : bf16 to vector<16x1xbf16>
    %267 = arith.cmpf ogt, %265, %266 : vector<16x1xbf16>
    %268 = vector.extract_strided_slice %5 {offsets = [2, 0], sizes = [1, 128], strides = [1, 1]} : vector<16x128xf32> to vector<1x128xf32>
    %cst_98 = arith.constant -3.000000e+38 : f32
    %269 = vector.shape_cast %267 : vector<16x1xi1> to vector<16x1xi1>
    %270 = vector.broadcast %269 : vector<16x1xi1> to vector<16x128xi1>
    %271 = vector.shape_cast %268 : vector<1x128xf32> to vector<1x128xf32>
    %272 = vector.broadcast %271 : vector<1x128xf32> to vector<16x128xf32>
    %273 = vector.broadcast %cst_98 : f32 to vector<16x128xf32>
    %274 = arith.select %270, %272, %273 : vector<16x128xi1>, vector<16x128xf32>
    %275 = arith.maximumf %264, %274 : vector<16x128xf32>
    %276 = vector.extract_strided_slice %239 {offsets = [0, 3], sizes = [16, 1], strides = [1, 1]} : vector<16x16xbf16> to vector<16x1xbf16>
    %cst_99 = arith.constant 0.000000e+00 : bf16
    %277 = vector.broadcast %cst_99 : bf16 to vector<16x1xbf16>
    %278 = arith.cmpf ogt, %276, %277 : vector<16x1xbf16>
    %279 = vector.extract_strided_slice %5 {offsets = [3, 0], sizes = [1, 128], strides = [1, 1]} : vector<16x128xf32> to vector<1x128xf32>
    %cst_100 = arith.constant -3.000000e+38 : f32
    %280 = vector.shape_cast %278 : vector<16x1xi1> to vector<16x1xi1>
    %281 = vector.broadcast %280 : vector<16x1xi1> to vector<16x128xi1>
    %282 = vector.shape_cast %279 : vector<1x128xf32> to vector<1x128xf32>
    %283 = vector.broadcast %282 : vector<1x128xf32> to vector<16x128xf32>
    %284 = vector.broadcast %cst_100 : f32 to vector<16x128xf32>
    %285 = arith.select %281, %283, %284 : vector<16x128xi1>, vector<16x128xf32>
    %286 = arith.maximumf %275, %285 : vector<16x128xf32>
    %287 = vector.extract_strided_slice %239 {offsets = [0, 4], sizes = [16, 1], strides = [1, 1]} : vector<16x16xbf16> to vector<16x1xbf16>
    %cst_101 = arith.constant 0.000000e+00 : bf16
    %288 = vector.broadcast %cst_101 : bf16 to vector<16x1xbf16>
    %289 = arith.cmpf ogt, %287, %288 : vector<16x1xbf16>
    %290 = vector.extract_strided_slice %5 {offsets = [4, 0], sizes = [1, 128], strides = [1, 1]} : vector<16x128xf32> to vector<1x128xf32>
    %cst_102 = arith.constant -3.000000e+38 : f32
    %291 = vector.shape_cast %289 : vector<16x1xi1> to vector<16x1xi1>
    %292 = vector.broadcast %291 : vector<16x1xi1> to vector<16x128xi1>
    %293 = vector.shape_cast %290 : vector<1x128xf32> to vector<1x128xf32>
    %294 = vector.broadcast %293 : vector<1x128xf32> to vector<16x128xf32>
    %295 = vector.broadcast %cst_102 : f32 to vector<16x128xf32>
    %296 = arith.select %292, %294, %295 : vector<16x128xi1>, vector<16x128xf32>
    %297 = arith.maximumf %286, %296 : vector<16x128xf32>
    %298 = vector.extract_strided_slice %239 {offsets = [0, 5], sizes = [16, 1], strides = [1, 1]} : vector<16x16xbf16> to vector<16x1xbf16>
    %cst_103 = arith.constant 0.000000e+00 : bf16
    %299 = vector.broadcast %cst_103 : bf16 to vector<16x1xbf16>
    %300 = arith.cmpf ogt, %298, %299 : vector<16x1xbf16>
    %301 = vector.extract_strided_slice %5 {offsets = [5, 0], sizes = [1, 128], strides = [1, 1]} : vector<16x128xf32> to vector<1x128xf32>
    %cst_104 = arith.constant -3.000000e+38 : f32
    %302 = vector.shape_cast %300 : vector<16x1xi1> to vector<16x1xi1>
    %303 = vector.broadcast %302 : vector<16x1xi1> to vector<16x128xi1>
    %304 = vector.shape_cast %301 : vector<1x128xf32> to vector<1x128xf32>
    %305 = vector.broadcast %304 : vector<1x128xf32> to vector<16x128xf32>
    %306 = vector.broadcast %cst_104 : f32 to vector<16x128xf32>
    %307 = arith.select %303, %305, %306 : vector<16x128xi1>, vector<16x128xf32>
    %308 = arith.maximumf %297, %307 : vector<16x128xf32>
    %309 = vector.extract_strided_slice %239 {offsets = [0, 6], sizes = [16, 1], strides = [1, 1]} : vector<16x16xbf16> to vector<16x1xbf16>
    %cst_105 = arith.constant 0.000000e+00 : bf16
    %310 = vector.broadcast %cst_105 : bf16 to vector<16x1xbf16>
    %311 = arith.cmpf ogt, %309, %310 : vector<16x1xbf16>
    %312 = vector.extract_strided_slice %5 {offsets = [6, 0], sizes = [1, 128], strides = [1, 1]} : vector<16x128xf32> to vector<1x128xf32>
    %cst_106 = arith.constant -3.000000e+38 : f32
    %313 = vector.shape_cast %311 : vector<16x1xi1> to vector<16x1xi1>
    %314 = vector.broadcast %313 : vector<16x1xi1> to vector<16x128xi1>
    %315 = vector.shape_cast %312 : vector<1x128xf32> to vector<1x128xf32>
    %316 = vector.broadcast %315 : vector<1x128xf32> to vector<16x128xf32>
    %317 = vector.broadcast %cst_106 : f32 to vector<16x128xf32>
    %318 = arith.select %314, %316, %317 : vector<16x128xi1>, vector<16x128xf32>
    %319 = arith.maximumf %308, %318 : vector<16x128xf32>
    %320 = vector.extract_strided_slice %239 {offsets = [0, 7], sizes = [16, 1], strides = [1, 1]} : vector<16x16xbf16> to vector<16x1xbf16>
    %cst_107 = arith.constant 0.000000e+00 : bf16
    %321 = vector.broadcast %cst_107 : bf16 to vector<16x1xbf16>
    %322 = arith.cmpf ogt, %320, %321 : vector<16x1xbf16>
    %323 = vector.extract_strided_slice %5 {offsets = [7, 0], sizes = [1, 128], strides = [1, 1]} : vector<16x128xf32> to vector<1x128xf32>
    %cst_108 = arith.constant -3.000000e+38 : f32
    %324 = vector.shape_cast %322 : vector<16x1xi1> to vector<16x1xi1>
    %325 = vector.broadcast %324 : vector<16x1xi1> to vector<16x128xi1>
    %326 = vector.shape_cast %323 : vector<1x128xf32> to vector<1x128xf32>
    %327 = vector.broadcast %326 : vector<1x128xf32> to vector<16x128xf32>
    %328 = vector.broadcast %cst_108 : f32 to vector<16x128xf32>
    %329 = arith.select %325, %327, %328 : vector<16x128xi1>, vector<16x128xf32>
    %330 = arith.maximumf %319, %329 : vector<16x128xf32>
    %331 = vector.extract_strided_slice %239 {offsets = [0, 8], sizes = [16, 1], strides = [1, 1]} : vector<16x16xbf16> to vector<16x1xbf16>
    %cst_109 = arith.constant 0.000000e+00 : bf16
    %332 = vector.broadcast %cst_109 : bf16 to vector<16x1xbf16>
    %333 = arith.cmpf ogt, %331, %332 : vector<16x1xbf16>
    %334 = vector.extract_strided_slice %5 {offsets = [8, 0], sizes = [1, 128], strides = [1, 1]} : vector<16x128xf32> to vector<1x128xf32>
    %cst_110 = arith.constant -3.000000e+38 : f32
    %335 = vector.shape_cast %333 : vector<16x1xi1> to vector<16x1xi1>
    %336 = vector.broadcast %335 : vector<16x1xi1> to vector<16x128xi1>
    %337 = vector.shape_cast %334 : vector<1x128xf32> to vector<1x128xf32>
    %338 = vector.broadcast %337 : vector<1x128xf32> to vector<16x128xf32>
    %339 = vector.broadcast %cst_110 : f32 to vector<16x128xf32>
    %340 = arith.select %336, %338, %339 : vector<16x128xi1>, vector<16x128xf32>
    %341 = arith.maximumf %330, %340 : vector<16x128xf32>
    %342 = vector.extract_strided_slice %239 {offsets = [0, 9], sizes = [16, 1], strides = [1, 1]} : vector<16x16xbf16> to vector<16x1xbf16>
    %cst_111 = arith.constant 0.000000e+00 : bf16
    %343 = vector.broadcast %cst_111 : bf16 to vector<16x1xbf16>
    %344 = arith.cmpf ogt, %342, %343 : vector<16x1xbf16>
    %345 = vector.extract_strided_slice %5 {offsets = [9, 0], sizes = [1, 128], strides = [1, 1]} : vector<16x128xf32> to vector<1x128xf32>
    %cst_112 = arith.constant -3.000000e+38 : f32
    %346 = vector.shape_cast %344 : vector<16x1xi1> to vector<16x1xi1>
    %347 = vector.broadcast %346 : vector<16x1xi1> to vector<16x128xi1>
    %348 = vector.shape_cast %345 : vector<1x128xf32> to vector<1x128xf32>
    %349 = vector.broadcast %348 : vector<1x128xf32> to vector<16x128xf32>
    %350 = vector.broadcast %cst_112 : f32 to vector<16x128xf32>
    %351 = arith.select %347, %349, %350 : vector<16x128xi1>, vector<16x128xf32>
    %352 = arith.maximumf %341, %351 : vector<16x128xf32>
    %353 = vector.extract_strided_slice %239 {offsets = [0, 10], sizes = [16, 1], strides = [1, 1]} : vector<16x16xbf16> to vector<16x1xbf16>
    %cst_113 = arith.constant 0.000000e+00 : bf16
    %354 = vector.broadcast %cst_113 : bf16 to vector<16x1xbf16>
    %355 = arith.cmpf ogt, %353, %354 : vector<16x1xbf16>
    %356 = vector.extract_strided_slice %5 {offsets = [10, 0], sizes = [1, 128], strides = [1, 1]} : vector<16x128xf32> to vector<1x128xf32>
    %cst_114 = arith.constant -3.000000e+38 : f32
    %357 = vector.shape_cast %355 : vector<16x1xi1> to vector<16x1xi1>
    %358 = vector.broadcast %357 : vector<16x1xi1> to vector<16x128xi1>
    %359 = vector.shape_cast %356 : vector<1x128xf32> to vector<1x128xf32>
    %360 = vector.broadcast %359 : vector<1x128xf32> to vector<16x128xf32>
    %361 = vector.broadcast %cst_114 : f32 to vector<16x128xf32>
    %362 = arith.select %358, %360, %361 : vector<16x128xi1>, vector<16x128xf32>
    %363 = arith.maximumf %352, %362 : vector<16x128xf32>
    %364 = vector.extract_strided_slice %239 {offsets = [0, 11], sizes = [16, 1], strides = [1, 1]} : vector<16x16xbf16> to vector<16x1xbf16>
    %cst_115 = arith.constant 0.000000e+00 : bf16
    %365 = vector.broadcast %cst_115 : bf16 to vector<16x1xbf16>
    %366 = arith.cmpf ogt, %364, %365 : vector<16x1xbf16>
    %367 = vector.extract_strided_slice %5 {offsets = [11, 0], sizes = [1, 128], strides = [1, 1]} : vector<16x128xf32> to vector<1x128xf32>
    %cst_116 = arith.constant -3.000000e+38 : f32
    %368 = vector.shape_cast %366 : vector<16x1xi1> to vector<16x1xi1>
    %369 = vector.broadcast %368 : vector<16x1xi1> to vector<16x128xi1>
    %370 = vector.shape_cast %367 : vector<1x128xf32> to vector<1x128xf32>
    %371 = vector.broadcast %370 : vector<1x128xf32> to vector<16x128xf32>
    %372 = vector.broadcast %cst_116 : f32 to vector<16x128xf32>
    %373 = arith.select %369, %371, %372 : vector<16x128xi1>, vector<16x128xf32>
    %374 = arith.maximumf %363, %373 : vector<16x128xf32>
    %375 = vector.extract_strided_slice %239 {offsets = [0, 12], sizes = [16, 1], strides = [1, 1]} : vector<16x16xbf16> to vector<16x1xbf16>
    %cst_117 = arith.constant 0.000000e+00 : bf16
    %376 = vector.broadcast %cst_117 : bf16 to vector<16x1xbf16>
    %377 = arith.cmpf ogt, %375, %376 : vector<16x1xbf16>
    %378 = vector.extract_strided_slice %5 {offsets = [12, 0], sizes = [1, 128], strides = [1, 1]} : vector<16x128xf32> to vector<1x128xf32>
    %cst_118 = arith.constant -3.000000e+38 : f32
    %379 = vector.shape_cast %377 : vector<16x1xi1> to vector<16x1xi1>
    %380 = vector.broadcast %379 : vector<16x1xi1> to vector<16x128xi1>
    %381 = vector.shape_cast %378 : vector<1x128xf32> to vector<1x128xf32>
    %382 = vector.broadcast %381 : vector<1x128xf32> to vector<16x128xf32>
    %383 = vector.broadcast %cst_118 : f32 to vector<16x128xf32>
    %384 = arith.select %380, %382, %383 : vector<16x128xi1>, vector<16x128xf32>
    %385 = arith.maximumf %374, %384 : vector<16x128xf32>
    %386 = vector.extract_strided_slice %239 {offsets = [0, 13], sizes = [16, 1], strides = [1, 1]} : vector<16x16xbf16> to vector<16x1xbf16>
    %cst_119 = arith.constant 0.000000e+00 : bf16
    %387 = vector.broadcast %cst_119 : bf16 to vector<16x1xbf16>
    %388 = arith.cmpf ogt, %386, %387 : vector<16x1xbf16>
    %389 = vector.extract_strided_slice %5 {offsets = [13, 0], sizes = [1, 128], strides = [1, 1]} : vector<16x128xf32> to vector<1x128xf32>
    %cst_120 = arith.constant -3.000000e+38 : f32
    %390 = vector.shape_cast %388 : vector<16x1xi1> to vector<16x1xi1>
    %391 = vector.broadcast %390 : vector<16x1xi1> to vector<16x128xi1>
    %392 = vector.shape_cast %389 : vector<1x128xf32> to vector<1x128xf32>
    %393 = vector.broadcast %392 : vector<1x128xf32> to vector<16x128xf32>
    %394 = vector.broadcast %cst_120 : f32 to vector<16x128xf32>
    %395 = arith.select %391, %393, %394 : vector<16x128xi1>, vector<16x128xf32>
    %396 = arith.maximumf %385, %395 : vector<16x128xf32>
    %397 = vector.extract_strided_slice %239 {offsets = [0, 14], sizes = [16, 1], strides = [1, 1]} : vector<16x16xbf16> to vector<16x1xbf16>
    %cst_121 = arith.constant 0.000000e+00 : bf16
    %398 = vector.broadcast %cst_121 : bf16 to vector<16x1xbf16>
    %399 = arith.cmpf ogt, %397, %398 : vector<16x1xbf16>
    %400 = vector.extract_strided_slice %5 {offsets = [14, 0], sizes = [1, 128], strides = [1, 1]} : vector<16x128xf32> to vector<1x128xf32>
    %cst_122 = arith.constant -3.000000e+38 : f32
    %401 = vector.shape_cast %399 : vector<16x1xi1> to vector<16x1xi1>
    %402 = vector.broadcast %401 : vector<16x1xi1> to vector<16x128xi1>
    %403 = vector.shape_cast %400 : vector<1x128xf32> to vector<1x128xf32>
    %404 = vector.broadcast %403 : vector<1x128xf32> to vector<16x128xf32>
    %405 = vector.broadcast %cst_122 : f32 to vector<16x128xf32>
    %406 = arith.select %402, %404, %405 : vector<16x128xi1>, vector<16x128xf32>
    %407 = arith.maximumf %396, %406 : vector<16x128xf32>
    %408 = vector.extract_strided_slice %239 {offsets = [0, 15], sizes = [16, 1], strides = [1, 1]} : vector<16x16xbf16> to vector<16x1xbf16>
    %cst_123 = arith.constant 0.000000e+00 : bf16
    %409 = vector.broadcast %cst_123 : bf16 to vector<16x1xbf16>
    %410 = arith.cmpf ogt, %408, %409 : vector<16x1xbf16>
    %411 = vector.extract_strided_slice %5 {offsets = [15, 0], sizes = [1, 128], strides = [1, 1]} : vector<16x128xf32> to vector<1x128xf32>
    %cst_124 = arith.constant -3.000000e+38 : f32
    %412 = vector.shape_cast %410 : vector<16x1xi1> to vector<16x1xi1>
    %413 = vector.broadcast %412 : vector<16x1xi1> to vector<16x128xi1>
    %414 = vector.shape_cast %411 : vector<1x128xf32> to vector<1x128xf32>
    %415 = vector.broadcast %414 : vector<1x128xf32> to vector<16x128xf32>
    %416 = vector.broadcast %cst_124 : f32 to vector<16x128xf32>
    %417 = arith.select %413, %415, %416 : vector<16x128xi1>, vector<16x128xf32>
    %418 = arith.maximumf %407, %417 : vector<16x128xf32>
    %c0_125 = arith.constant 0 : index
    %c1 = arith.constant 1 : index
    %c0_126 = arith.constant 0 : index
    %c0_127 = arith.constant 0 : index
    %419 = vector.load %arg4[%c0_125, %c1, %c0_126, %c0_127] : memref<2x2x16x1xf32, #tpu.memory_space<vmem>>, vector<1x1x16x1xf32>
    %420 = vector.shape_cast %419 : vector<1x1x16x1xf32> to vector<16x1xf32>
    %cst_128 = arith.constant 0.000000e+00 : f32
    %421 = vector.broadcast %cst_128 : f32 to vector<16x1xf32>
    %422 = arith.cmpf ogt, %420, %421 : vector<16x1xf32>
    %cst_129 = arith.constant 0.000000e+00 : f32
    %423 = vector.shape_cast %422 : vector<16x1xi1> to vector<16x1xi1>
    %424 = vector.broadcast %423 : vector<16x1xi1> to vector<16x128xi1>
    %425 = vector.broadcast %cst_129 : f32 to vector<16x128xf32>
    %426 = arith.select %424, %418, %425 : vector<16x128xi1>, vector<16x128xf32>
    %427 = arith.truncf %426 : vector<16x128xf32> to vector<16x128xbf16>
    %c0_130 = arith.constant 0 : index
    %c0_131 = arith.constant 0 : index
    %428 = vector.load %arg18[%c0_130, %c0_131] : memref<16x384xbf16, #tpu.memory_space<vmem>>, vector<16x128xbf16>
    tpu.vector_store %arg18[%c0_130, %c0_131], %427 {strides = array<i32>} : memref<16x384xbf16, #tpu.memory_space<vmem>>, vector<16x128xbf16>,
    %429 = arith.truncf %241 : vector<16x128xf32> to vector<16x128xbf16>
    %c0_132 = arith.constant 0 : index
    %c128_133 = arith.constant 128 : index
    %430 = vector.load %arg18[%c0_132, %c128_133] : memref<16x384xbf16, #tpu.memory_space<vmem>>, vector<16x128xbf16>
    tpu.vector_store %arg18[%c0_132, %c128_133], %429 {strides = array<i32>} : memref<16x384xbf16, #tpu.memory_space<vmem>>, vector<16x128xbf16>,
    %431 = arith.truncf %240 : vector<16x128xf32> to vector<16x128xbf16>
    %c0_134 = arith.constant 0 : index
    %c256_135 = arith.constant 256 : index
    %432 = vector.load %arg18[%c0_134, %c256_135] : memref<16x384xbf16, #tpu.memory_space<vmem>>, vector<16x128xbf16>
    tpu.vector_store %arg18[%c0_134, %c256_135], %431 {strides = array<i32>} : memref<16x384xbf16, #tpu.memory_space<vmem>>, vector<16x128xbf16>,
    %c0_136 = arith.constant 0 : index
    %c0_137 = arith.constant 0 : index
    %433 = vector.load %arg18[%c0_136, %c0_137] : memref<16x384xbf16, #tpu.memory_space<vmem>>, vector<16x384xbf16>
    %c0_138 = arith.constant 0 : index
    %c1_139 = arith.constant 1 : index
    %c0_140 = arith.constant 0 : index
    %c0_141 = arith.constant 0 : index
    %434 = vector.load %arg7[%c0_138, %c1_139, %c0_140, %c0_141] : memref<2x2x384x128xbf16, #tpu.memory_space<vmem>>, vector<1x1x384x128xbf16>
    %435 = vector.shape_cast %434 : vector<1x1x384x128xbf16> to vector<384x128xbf16>
    %cst_142 = arith.constant dense<0.000000e+00> : vector<16x128xf32>
    %436 = tpu.matmul %433, %435, %cst_142 {dimension_numbers = #tpu.dot_dimension_numbers<[1], [0], [0], [1], [0, 0, 1, 1], [], []>} : vector<16x384xbf16>, vector<384x128xbf16>, vector<16x128xf32> -> vector<16x128xf32>
    %c0_143 = arith.constant 0 : index
    %c1_144 = arith.constant 1 : index
    %c0_145 = arith.constant 0 : index
    %c0_146 = arith.constant 0 : index
    %437 = vector.load %arg8[%c0_143, %c1_144, %c0_145, %c0_146] : memref<2x2x1x128xf32, #tpu.memory_space<vmem>>, vector<1x1x1x128xf32>
    %438 = vector.shape_cast %437 : vector<1x1x1x128xf32> to vector<1x128xf32>
    %439 = vector.broadcast %438 : vector<1x128xf32> to vector<16x128xf32>
    %440 = arith.addf %436, %439 : vector<16x128xf32>
    %c0_147 = arith.constant 0 : index
    %c1_148 = arith.constant 1 : index
    %c0_149 = arith.constant 0 : index
    %c0_150 = arith.constant 0 : index
    %441 = vector.load %arg5[%c0_147, %c1_148, %c0_149, %c0_150] : memref<2x2x128x128xbf16, #tpu.memory_space<vmem>>, vector<1x1x128x128xbf16>
    %442 = vector.shape_cast %441 : vector<1x1x128x128xbf16> to vector<128x128xbf16>
    %cst_151 = arith.constant dense<0.000000e+00> : vector<16x128xf32>
    %443 = tpu.matmul %6, %442, %cst_151 {dimension_numbers = #tpu.dot_dimension_numbers<[1], [0], [0], [1], [0, 0, 1, 1], [], []>} : vector<16x128xbf16>, vector<128x128xbf16>, vector<16x128xf32> -> vector<16x128xf32>
    %c0_152 = arith.constant 0 : index
    %c1_153 = arith.constant 1 : index
    %c0_154 = arith.constant 0 : index
    %c0_155 = arith.constant 0 : index
    %444 = vector.load %arg6[%c0_152, %c1_153, %c0_154, %c0_155] : memref<2x2x1x128xf32, #tpu.memory_space<vmem>>, vector<1x1x1x128xf32>
    %445 = vector.shape_cast %444 : vector<1x1x1x128xf32> to vector<1x128xf32>
    %446 = vector.broadcast %445 : vector<1x128xf32> to vector<16x128xf32>
    %447 = arith.addf %443, %446 : vector<16x128xf32>
    %cst_156 = arith.constant 0.000000e+00 : f32
    %448 = vector.broadcast %cst_156 : f32 to vector<16x128xf32>
    %449 = arith.maximumf %440, %448 : vector<16x128xf32>
    %450 = arith.truncf %449 : vector<16x128xf32> to vector<16x128xbf16>
    %c0_157 = arith.constant 0 : index
    %c0_158 = arith.constant 0 : index
    %451 = vector.load %arg18[%c0_157, %c0_158] : memref<16x384xbf16, #tpu.memory_space<vmem>>, vector<16x128xbf16>
    tpu.vector_store %arg18[%c0_157, %c0_158], %450 {strides = array<i32>} : memref<16x384xbf16, #tpu.memory_space<vmem>>, vector<16x128xbf16>,
    %cst_159 = arith.constant 0.000000e+00 : f32
    %452 = vector.broadcast %cst_159 : f32 to vector<16x128xf32>
    %453 = arith.maximumf %447, %452 : vector<16x128xf32>
    %454 = arith.truncf %453 : vector<16x128xf32> to vector<16x128xbf16>
    %c0_160 = arith.constant 0 : index
    %c128_161 = arith.constant 128 : index
    %455 = vector.load %arg18[%c0_160, %c128_161] : memref<16x384xbf16, #tpu.memory_space<vmem>>, vector<16x128xbf16>
    tpu.vector_store %arg18[%c0_160, %c128_161], %454 {strides = array<i32>} : memref<16x384xbf16, #tpu.memory_space<vmem>>, vector<16x128xbf16>,
    %c0_162 = arith.constant 0 : index
    %c0_163 = arith.constant 0 : index
    %456 = vector.load %arg18[%c0_162, %c0_163] : memref<16x384xbf16, #tpu.memory_space<vmem>>, vector<16x256xbf16>
    %c0_164 = arith.constant 0 : index
    %c1_165 = arith.constant 1 : index
    %c0_166 = arith.constant 0 : index
    %c0_167 = arith.constant 0 : index
    %457 = vector.load %arg9[%c0_164, %c1_165, %c0_166, %c0_167] : memref<2x2x256x128xbf16, #tpu.memory_space<vmem>>, vector<1x1x256x128xbf16>
    %458 = vector.shape_cast %457 : vector<1x1x256x128xbf16> to vector<256x128xbf16>
    %cst_168 = arith.constant dense<0.000000e+00> : vector<16x128xf32>
    %459 = tpu.matmul %456, %458, %cst_168 {dimension_numbers = #tpu.dot_dimension_numbers<[1], [0], [0], [1], [0, 0, 1, 1], [], []>} : vector<16x256xbf16>, vector<256x128xbf16>, vector<16x128xf32> -> vector<16x128xf32>
    %c0_169 = arith.constant 0 : index
    %c1_170 = arith.constant 1 : index
    %c0_171 = arith.constant 0 : index
    %c0_172 = arith.constant 0 : index
    %460 = vector.load %arg10[%c0_169, %c1_170, %c0_171, %c0_172] : memref<2x2x1x128xf32, #tpu.memory_space<vmem>>, vector<1x1x1x128xf32>
    %461 = vector.shape_cast %460 : vector<1x1x1x128xf32> to vector<1x128xf32>
    %462 = vector.broadcast %461 : vector<1x128xf32> to vector<16x128xf32>
    %463 = arith.addf %459, %462 : vector<16x128xf32>
    %cst_173 = arith.constant 0.000000e+00 : f32
    %464 = vector.broadcast %cst_173 : f32 to vector<16x128xf32>
    %465 = arith.maximumf %463, %464 : vector<16x128xf32>
    %466 = arith.truncf %465 : vector<16x128xf32> to vector<16x128xbf16>
    %c16 = arith.constant 16 : index
    %c0_174 = arith.constant 0 : index
    %467 = vector.load %arg19[%c16, %c0_174] : memref<32x128xbf16, #tpu.memory_space<vmem>>, vector<16x128xbf16>
    tpu.vector_store %arg19[%c16, %c0_174], %466 {strides = array<i32>} : memref<32x128xbf16, #tpu.memory_space<vmem>>, vector<16x128xbf16>,
    %c0_175 = arith.constant 0 : index
    %c0_176 = arith.constant 0 : index
    %468 = vector.load %arg19[%c0_175, %c0_176] : memref<32x128xbf16, #tpu.memory_space<vmem>>, vector<32x128xbf16>
    %c0_177 = arith.constant 0 : index
    %c0_178 = arith.constant 0 : index
    %469 = vector.load %arg11[%c0_177, %c0_178] : memref<128x128xbf16, #tpu.memory_space<vmem>>, vector<128x128xbf16>
    %cst_179 = arith.constant dense<0.000000e+00> : vector<32x128xf32>
    %470 = tpu.matmul %468, %469, %cst_179 {dimension_numbers = #tpu.dot_dimension_numbers<[1], [0], [0], [1], [0, 0, 1, 1], [], []>} : vector<32x128xbf16>, vector<128x128xbf16>, vector<32x128xf32> -> vector<32x128xf32>
    %c0_180 = arith.constant 0 : index
    %c0_181 = arith.constant 0 : index
    %471 = vector.load %arg12[%c0_180, %c0_181] : memref<1x128xf32, #tpu.memory_space<vmem>>, vector<1x128xf32>
    %472 = vector.broadcast %471 : vector<1x128xf32> to vector<32x128xf32>
    %473 = arith.addf %470, %472 : vector<32x128xf32>
    %474 = math.tanh %473 : vector<32x128xf32>
    %475 = arith.truncf %474 : vector<32x128xf32> to vector<32x128xbf16>
    %c0_182 = arith.constant 0 : index
    %c0_183 = arith.constant 0 : index
    %476 = vector.load %arg13[%c0_182, %c0_183] : memref<128x1xbf16, #tpu.memory_space<vmem>>, vector<128x1xbf16>
    %cst_184 = arith.constant dense<0.000000e+00> : vector<32x1xf32>
    %477 = tpu.matmul %475, %476, %cst_184 {dimension_numbers = #tpu.dot_dimension_numbers<[1], [0], [0], [1], [0, 0, 1, 1], [], []>} : vector<32x128xbf16>, vector<128x1xbf16>, vector<32x1xf32> -> vector<32x1xf32>
    %478 = vector.extract_strided_slice %477 {offsets = [0, 0], sizes = [16, 1], strides = [1, 1]} : vector<32x1xf32> to vector<16x1xf32>
    %cst_185 = arith.constant dense<0.000000e+00> : vector<1xf32>
    %479 = vector.multi_reduction <add>, %478, %cst_185 [0] : vector<16x1xf32> to vector<1xf32>
    %480 = vector.shape_cast %479 : vector<1xf32> to vector<1x1xf32>
    %cst_186 = arith.constant 6.250000e-02 : f32
    %481 = vector.broadcast %cst_186 : f32 to vector<1x1xf32>
    %482 = arith.mulf %480, %481 : vector<1x1xf32>
    %483 = vector.extract_strided_slice %477 {offsets = [16, 0], sizes = [16, 1], strides = [1, 1]} : vector<32x1xf32> to vector<16x1xf32>
    %cst_187 = arith.constant dense<0.000000e+00> : vector<1xf32>
    %484 = vector.multi_reduction <add>, %483, %cst_187 [0] : vector<16x1xf32> to vector<1xf32>
    %485 = vector.shape_cast %484 : vector<1xf32> to vector<1x1xf32>
    %cst_188 = arith.constant 6.250000e-02 : f32
    %486 = vector.broadcast %cst_188 : f32 to vector<1x1xf32>
    %487 = arith.mulf %485, %486 : vector<1x1xf32>
    %488 = arith.maximumf %482, %487 : vector<1x1xf32>
    %489 = arith.subf %482, %488 : vector<1x1xf32>
    %490 = math.exp %489 : vector<1x1xf32>
    %491 = arith.subf %487, %488 : vector<1x1xf32>
    %492 = math.exp %491 : vector<1x1xf32>
    %493 = arith.addf %490, %492 : vector<1x1xf32>
    %494 = tpu.reciprocal %493 {approx = true} : vector<1x1xf32> -> vector<1x1xf32>
    %495 = arith.mulf %490, %494 : vector<1x1xf32>
    %c0_189 = arith.constant 0 : index
    %c0_190 = arith.constant 0 : index
    %496 = vector.load %arg19[%c0_189, %c0_190] : memref<32x128xbf16, #tpu.memory_space<vmem>>, vector<16x128xbf16>
    %497 = arith.extf %496 : vector<16x128xbf16> to vector<16x128xf32>
    %498 = vector.broadcast %495 : vector<1x1xf32> to vector<16x128xf32>
    %499 = arith.mulf %498, %497 : vector<16x128xf32>
    %500 = arith.mulf %492, %494 : vector<1x1xf32>
    %c16_191 = arith.constant 16 : index
    %c0_192 = arith.constant 0 : index
    %501 = vector.load %arg19[%c16_191, %c0_192] : memref<32x128xbf16, #tpu.memory_space<vmem>>, vector<16x128xbf16>
    %502 = arith.extf %501 : vector<16x128xbf16> to vector<16x128xf32>
    %503 = vector.broadcast %500 : vector<1x1xf32> to vector<16x128xf32>
    %504 = arith.mulf %503, %502 : vector<16x128xf32>
    %505 = arith.addf %499, %504 : vector<16x128xf32>
    %cst_193 = arith.constant 0.000000e+00 : f32
    %506 = vector.broadcast %cst_193 : f32 to vector<16x128xf32>
    %507 = arith.maximumf %505, %506 : vector<16x128xf32>
    %508 = arith.truncf %507 : vector<16x128xf32> to vector<16x128xbf16>
    %c1_194 = arith.constant 1 : index
    %c0_195 = arith.constant 0 : index
    %c0_196 = arith.constant 0 : index
    %509 = vector.load %arg3[%c1_194, %c0_195, %c0_196] : memref<2x64x16xbf16, #tpu.memory_space<vmem>>, vector<1x64x16xbf16>
    %510 = vector.shape_cast %509 : vector<1x64x16xbf16> to vector<64x16xbf16>
    %cst_197 = arith.constant dense<0.000000e+00> : vector<64x128xf32>
    %511 = tpu.matmul %510, %508, %cst_197 {dimension_numbers = #tpu.dot_dimension_numbers<[1], [0], [0], [1], [0, 0, 1, 1], [], []>} : vector<64x16xbf16>, vector<16x128xbf16>, vector<64x128xf32> -> vector<64x128xf32>
    %512 = vector.extract_strided_slice %510 {offsets = [0, 0], sizes = [16, 16], strides = [1, 1]} : vector<64x16xbf16> to vector<16x16xbf16>
    %513 = vector.extract_strided_slice %511 {offsets = [0, 0], sizes = [16, 128], strides = [1, 1]} : vector<64x128xf32> to vector<16x128xf32>
    %514 = vector.extract_strided_slice %511 {offsets = [16, 0], sizes = [16, 128], strides = [1, 1]} : vector<64x128xf32> to vector<16x128xf32>
    %cst_198 = arith.constant -3.000000e+38 : f32
    %515 = vector.broadcast %cst_198 : f32 to vector<16x128xf32>
    %516 = vector.extract_strided_slice %512 {offsets = [0, 0], sizes = [16, 1], strides = [1, 1]} : vector<16x16xbf16> to vector<16x1xbf16>
    %cst_199 = arith.constant 0.000000e+00 : bf16
    %517 = vector.broadcast %cst_199 : bf16 to vector<16x1xbf16>
    %518 = arith.cmpf ogt, %516, %517 : vector<16x1xbf16>
    %519 = vector.extract_strided_slice %507 {offsets = [0, 0], sizes = [1, 128], strides = [1, 1]} : vector<16x128xf32> to vector<1x128xf32>
    %cst_200 = arith.constant -3.000000e+38 : f32
    %520 = vector.shape_cast %518 : vector<16x1xi1> to vector<16x1xi1>
    %521 = vector.broadcast %520 : vector<16x1xi1> to vector<16x128xi1>
    %522 = vector.shape_cast %519 : vector<1x128xf32> to vector<1x128xf32>
    %523 = vector.broadcast %522 : vector<1x128xf32> to vector<16x128xf32>
    %524 = vector.broadcast %cst_200 : f32 to vector<16x128xf32>
    %525 = arith.select %521, %523, %524 : vector<16x128xi1>, vector<16x128xf32>
    %526 = arith.maximumf %515, %525 : vector<16x128xf32>
    %527 = vector.extract_strided_slice %512 {offsets = [0, 1], sizes = [16, 1], strides = [1, 1]} : vector<16x16xbf16> to vector<16x1xbf16>
    %cst_201 = arith.constant 0.000000e+00 : bf16
    %528 = vector.broadcast %cst_201 : bf16 to vector<16x1xbf16>
    %529 = arith.cmpf ogt, %527, %528 : vector<16x1xbf16>
    %530 = vector.extract_strided_slice %507 {offsets = [1, 0], sizes = [1, 128], strides = [1, 1]} : vector<16x128xf32> to vector<1x128xf32>
    %cst_202 = arith.constant -3.000000e+38 : f32
    %531 = vector.shape_cast %529 : vector<16x1xi1> to vector<16x1xi1>
    %532 = vector.broadcast %531 : vector<16x1xi1> to vector<16x128xi1>
    %533 = vector.shape_cast %530 : vector<1x128xf32> to vector<1x128xf32>
    %534 = vector.broadcast %533 : vector<1x128xf32> to vector<16x128xf32>
    %535 = vector.broadcast %cst_202 : f32 to vector<16x128xf32>
    %536 = arith.select %532, %534, %535 : vector<16x128xi1>, vector<16x128xf32>
    %537 = arith.maximumf %526, %536 : vector<16x128xf32>
    %538 = vector.extract_strided_slice %512 {offsets = [0, 2], sizes = [16, 1], strides = [1, 1]} : vector<16x16xbf16> to vector<16x1xbf16>
    %cst_203 = arith.constant 0.000000e+00 : bf16
    %539 = vector.broadcast %cst_203 : bf16 to vector<16x1xbf16>
    %540 = arith.cmpf ogt, %538, %539 : vector<16x1xbf16>
    %541 = vector.extract_strided_slice %507 {offsets = [2, 0], sizes = [1, 128], strides = [1, 1]} : vector<16x128xf32> to vector<1x128xf32>
    %cst_204 = arith.constant -3.000000e+38 : f32
    %542 = vector.shape_cast %540 : vector<16x1xi1> to vector<16x1xi1>
    %543 = vector.broadcast %542 : vector<16x1xi1> to vector<16x128xi1>
    %544 = vector.shape_cast %541 : vector<1x128xf32> to vector<1x128xf32>
    %545 = vector.broadcast %544 : vector<1x128xf32> to vector<16x128xf32>
    %546 = vector.broadcast %cst_204 : f32 to vector<16x128xf32>
    %547 = arith.select %543, %545, %546 : vector<16x128xi1>, vector<16x128xf32>
    %548 = arith.maximumf %537, %547 : vector<16x128xf32>
    %549 = vector.extract_strided_slice %512 {offsets = [0, 3], sizes = [16, 1], strides = [1, 1]} : vector<16x16xbf16> to vector<16x1xbf16>
    %cst_205 = arith.constant 0.000000e+00 : bf16
    %550 = vector.broadcast %cst_205 : bf16 to vector<16x1xbf16>
    %551 = arith.cmpf ogt, %549, %550 : vector<16x1xbf16>
    %552 = vector.extract_strided_slice %507 {offsets = [3, 0], sizes = [1, 128], strides = [1, 1]} : vector<16x128xf32> to vector<1x128xf32>
    %cst_206 = arith.constant -3.000000e+38 : f32
    %553 = vector.shape_cast %551 : vector<16x1xi1> to vector<16x1xi1>
    %554 = vector.broadcast %553 : vector<16x1xi1> to vector<16x128xi1>
    %555 = vector.shape_cast %552 : vector<1x128xf32> to vector<1x128xf32>
    %556 = vector.broadcast %555 : vector<1x128xf32> to vector<16x128xf32>
    %557 = vector.broadcast %cst_206 : f32 to vector<16x128xf32>
    %558 = arith.select %554, %556, %557 : vector<16x128xi1>, vector<16x128xf32>
    %559 = arith.maximumf %548, %558 : vector<16x128xf32>
    %560 = vector.extract_strided_slice %512 {offsets = [0, 4], sizes = [16, 1], strides = [1, 1]} : vector<16x16xbf16> to vector<16x1xbf16>
    %cst_207 = arith.constant 0.000000e+00 : bf16
    %561 = vector.broadcast %cst_207 : bf16 to vector<16x1xbf16>
    %562 = arith.cmpf ogt, %560, %561 : vector<16x1xbf16>
    %563 = vector.extract_strided_slice %507 {offsets = [4, 0], sizes = [1, 128], strides = [1, 1]} : vector<16x128xf32> to vector<1x128xf32>
    %cst_208 = arith.constant -3.000000e+38 : f32
    %564 = vector.shape_cast %562 : vector<16x1xi1> to vector<16x1xi1>
    %565 = vector.broadcast %564 : vector<16x1xi1> to vector<16x128xi1>
    %566 = vector.shape_cast %563 : vector<1x128xf32> to vector<1x128xf32>
    %567 = vector.broadcast %566 : vector<1x128xf32> to vector<16x128xf32>
    %568 = vector.broadcast %cst_208 : f32 to vector<16x128xf32>
    %569 = arith.select %565, %567, %568 : vector<16x128xi1>, vector<16x128xf32>
    %570 = arith.maximumf %559, %569 : vector<16x128xf32>
    %571 = vector.extract_strided_slice %512 {offsets = [0, 5], sizes = [16, 1], strides = [1, 1]} : vector<16x16xbf16> to vector<16x1xbf16>
    %cst_209 = arith.constant 0.000000e+00 : bf16
    %572 = vector.broadcast %cst_209 : bf16 to vector<16x1xbf16>
    %573 = arith.cmpf ogt, %571, %572 : vector<16x1xbf16>
    %574 = vector.extract_strided_slice %507 {offsets = [5, 0], sizes = [1, 128], strides = [1, 1]} : vector<16x128xf32> to vector<1x128xf32>
    %cst_210 = arith.constant -3.000000e+38 : f32
    %575 = vector.shape_cast %573 : vector<16x1xi1> to vector<16x1xi1>
    %576 = vector.broadcast %575 : vector<16x1xi1> to vector<16x128xi1>
    %577 = vector.shape_cast %574 : vector<1x128xf32> to vector<1x128xf32>
    %578 = vector.broadcast %577 : vector<1x128xf32> to vector<16x128xf32>
    %579 = vector.broadcast %cst_210 : f32 to vector<16x128xf32>
    %580 = arith.select %576, %578, %579 : vector<16x128xi1>, vector<16x128xf32>
    %581 = arith.maximumf %570, %580 : vector<16x128xf32>
    %582 = vector.extract_strided_slice %512 {offsets = [0, 6], sizes = [16, 1], strides = [1, 1]} : vector<16x16xbf16> to vector<16x1xbf16>
    %cst_211 = arith.constant 0.000000e+00 : bf16
    %583 = vector.broadcast %cst_211 : bf16 to vector<16x1xbf16>
    %584 = arith.cmpf ogt, %582, %583 : vector<16x1xbf16>
    %585 = vector.extract_strided_slice %507 {offsets = [6, 0], sizes = [1, 128], strides = [1, 1]} : vector<16x128xf32> to vector<1x128xf32>
    %cst_212 = arith.constant -3.000000e+38 : f32
    %586 = vector.shape_cast %584 : vector<16x1xi1> to vector<16x1xi1>
    %587 = vector.broadcast %586 : vector<16x1xi1> to vector<16x128xi1>
    %588 = vector.shape_cast %585 : vector<1x128xf32> to vector<1x128xf32>
    %589 = vector.broadcast %588 : vector<1x128xf32> to vector<16x128xf32>
    %590 = vector.broadcast %cst_212 : f32 to vector<16x128xf32>
    %591 = arith.select %587, %589, %590 : vector<16x128xi1>, vector<16x128xf32>
    %592 = arith.maximumf %581, %591 : vector<16x128xf32>
    %593 = vector.extract_strided_slice %512 {offsets = [0, 7], sizes = [16, 1], strides = [1, 1]} : vector<16x16xbf16> to vector<16x1xbf16>
    %cst_213 = arith.constant 0.000000e+00 : bf16
    %594 = vector.broadcast %cst_213 : bf16 to vector<16x1xbf16>
    %595 = arith.cmpf ogt, %593, %594 : vector<16x1xbf16>
    %596 = vector.extract_strided_slice %507 {offsets = [7, 0], sizes = [1, 128], strides = [1, 1]} : vector<16x128xf32> to vector<1x128xf32>
    %cst_214 = arith.constant -3.000000e+38 : f32
    %597 = vector.shape_cast %595 : vector<16x1xi1> to vector<16x1xi1>
    %598 = vector.broadcast %597 : vector<16x1xi1> to vector<16x128xi1>
    %599 = vector.shape_cast %596 : vector<1x128xf32> to vector<1x128xf32>
    %600 = vector.broadcast %599 : vector<1x128xf32> to vector<16x128xf32>
    %601 = vector.broadcast %cst_214 : f32 to vector<16x128xf32>
    %602 = arith.select %598, %600, %601 : vector<16x128xi1>, vector<16x128xf32>
    %603 = arith.maximumf %592, %602 : vector<16x128xf32>
    %604 = vector.extract_strided_slice %512 {offsets = [0, 8], sizes = [16, 1], strides = [1, 1]} : vector<16x16xbf16> to vector<16x1xbf16>
    %cst_215 = arith.constant 0.000000e+00 : bf16
    %605 = vector.broadcast %cst_215 : bf16 to vector<16x1xbf16>
    %606 = arith.cmpf ogt, %604, %605 : vector<16x1xbf16>
    %607 = vector.extract_strided_slice %507 {offsets = [8, 0], sizes = [1, 128], strides = [1, 1]} : vector<16x128xf32> to vector<1x128xf32>
    %cst_216 = arith.constant -3.000000e+38 : f32
    %608 = vector.shape_cast %606 : vector<16x1xi1> to vector<16x1xi1>
    %609 = vector.broadcast %608 : vector<16x1xi1> to vector<16x128xi1>
    %610 = vector.shape_cast %607 : vector<1x128xf32> to vector<1x128xf32>
    %611 = vector.broadcast %610 : vector<1x128xf32> to vector<16x128xf32>
    %612 = vector.broadcast %cst_216 : f32 to vector<16x128xf32>
    %613 = arith.select %609, %611, %612 : vector<16x128xi1>, vector<16x128xf32>
    %614 = arith.maximumf %603, %613 : vector<16x128xf32>
    %615 = vector.extract_strided_slice %512 {offsets = [0, 9], sizes = [16, 1], strides = [1, 1]} : vector<16x16xbf16> to vector<16x1xbf16>
    %cst_217 = arith.constant 0.000000e+00 : bf16
    %616 = vector.broadcast %cst_217 : bf16 to vector<16x1xbf16>
    %617 = arith.cmpf ogt, %615, %616 : vector<16x1xbf16>
    %618 = vector.extract_strided_slice %507 {offsets = [9, 0], sizes = [1, 128], strides = [1, 1]} : vector<16x128xf32> to vector<1x128xf32>
    %cst_218 = arith.constant -3.000000e+38 : f32
    %619 = vector.shape_cast %617 : vector<16x1xi1> to vector<16x1xi1>
    %620 = vector.broadcast %619 : vector<16x1xi1> to vector<16x128xi1>
    %621 = vector.shape_cast %618 : vector<1x128xf32> to vector<1x128xf32>
    %622 = vector.broadcast %621 : vector<1x128xf32> to vector<16x128xf32>
    %623 = vector.broadcast %cst_218 : f32 to vector<16x128xf32>
    %624 = arith.select %620, %622, %623 : vector<16x128xi1>, vector<16x128xf32>
    %625 = arith.maximumf %614, %624 : vector<16x128xf32>
    %626 = vector.extract_strided_slice %512 {offsets = [0, 10], sizes = [16, 1], strides = [1, 1]} : vector<16x16xbf16> to vector<16x1xbf16>
    %cst_219 = arith.constant 0.000000e+00 : bf16
    %627 = vector.broadcast %cst_219 : bf16 to vector<16x1xbf16>
    %628 = arith.cmpf ogt, %626, %627 : vector<16x1xbf16>
    %629 = vector.extract_strided_slice %507 {offsets = [10, 0], sizes = [1, 128], strides = [1, 1]} : vector<16x128xf32> to vector<1x128xf32>
    %cst_220 = arith.constant -3.000000e+38 : f32
    %630 = vector.shape_cast %628 : vector<16x1xi1> to vector<16x1xi1>
    %631 = vector.broadcast %630 : vector<16x1xi1> to vector<16x128xi1>
    %632 = vector.shape_cast %629 : vector<1x128xf32> to vector<1x128xf32>
    %633 = vector.broadcast %632 : vector<1x128xf32> to vector<16x128xf32>
    %634 = vector.broadcast %cst_220 : f32 to vector<16x128xf32>
    %635 = arith.select %631, %633, %634 : vector<16x128xi1>, vector<16x128xf32>
    %636 = arith.maximumf %625, %635 : vector<16x128xf32>
    %637 = vector.extract_strided_slice %512 {offsets = [0, 11], sizes = [16, 1], strides = [1, 1]} : vector<16x16xbf16> to vector<16x1xbf16>
    %cst_221 = arith.constant 0.000000e+00 : bf16
    %638 = vector.broadcast %cst_221 : bf16 to vector<16x1xbf16>
    %639 = arith.cmpf ogt, %637, %638 : vector<16x1xbf16>
    %640 = vector.extract_strided_slice %507 {offsets = [11, 0], sizes = [1, 128], strides = [1, 1]} : vector<16x128xf32> to vector<1x128xf32>
    %cst_222 = arith.constant -3.000000e+38 : f32
    %641 = vector.shape_cast %639 : vector<16x1xi1> to vector<16x1xi1>
    %642 = vector.broadcast %641 : vector<16x1xi1> to vector<16x128xi1>
    %643 = vector.shape_cast %640 : vector<1x128xf32> to vector<1x128xf32>
    %644 = vector.broadcast %643 : vector<1x128xf32> to vector<16x128xf32>
    %645 = vector.broadcast %cst_222 : f32 to vector<16x128xf32>
    %646 = arith.select %642, %644, %645 : vector<16x128xi1>, vector<16x128xf32>
    %647 = arith.maximumf %636, %646 : vector<16x128xf32>
    %648 = vector.extract_strided_slice %512 {offsets = [0, 12], sizes = [16, 1], strides = [1, 1]} : vector<16x16xbf16> to vector<16x1xbf16>
    %cst_223 = arith.constant 0.000000e+00 : bf16
    %649 = vector.broadcast %cst_223 : bf16 to vector<16x1xbf16>
    %650 = arith.cmpf ogt, %648, %649 : vector<16x1xbf16>
    %651 = vector.extract_strided_slice %507 {offsets = [12, 0], sizes = [1, 128], strides = [1, 1]} : vector<16x128xf32> to vector<1x128xf32>
    %cst_224 = arith.constant -3.000000e+38 : f32
    %652 = vector.shape_cast %650 : vector<16x1xi1> to vector<16x1xi1>
    %653 = vector.broadcast %652 : vector<16x1xi1> to vector<16x128xi1>
    %654 = vector.shape_cast %651 : vector<1x128xf32> to vector<1x128xf32>
    %655 = vector.broadcast %654 : vector<1x128xf32> to vector<16x128xf32>
    %656 = vector.broadcast %cst_224 : f32 to vector<16x128xf32>
    %657 = arith.select %653, %655, %656 : vector<16x128xi1>, vector<16x128xf32>
    %658 = arith.maximumf %647, %657 : vector<16x128xf32>
    %659 = vector.extract_strided_slice %512 {offsets = [0, 13], sizes = [16, 1], strides = [1, 1]} : vector<16x16xbf16> to vector<16x1xbf16>
    %cst_225 = arith.constant 0.000000e+00 : bf16
    %660 = vector.broadcast %cst_225 : bf16 to vector<16x1xbf16>
    %661 = arith.cmpf ogt, %659, %660 : vector<16x1xbf16>
    %662 = vector.extract_strided_slice %507 {offsets = [13, 0], sizes = [1, 128], strides = [1, 1]} : vector<16x128xf32> to vector<1x128xf32>
    %cst_226 = arith.constant -3.000000e+38 : f32
    %663 = vector.shape_cast %661 : vector<16x1xi1> to vector<16x1xi1>
    %664 = vector.broadcast %663 : vector<16x1xi1> to vector<16x128xi1>
    %665 = vector.shape_cast %662 : vector<1x128xf32> to vector<1x128xf32>
    %666 = vector.broadcast %665 : vector<1x128xf32> to vector<16x128xf32>
    %667 = vector.broadcast %cst_226 : f32 to vector<16x128xf32>
    %668 = arith.select %664, %666, %667 : vector<16x128xi1>, vector<16x128xf32>
    %669 = arith.maximumf %658, %668 : vector<16x128xf32>
    %670 = vector.extract_strided_slice %512 {offsets = [0, 14], sizes = [16, 1], strides = [1, 1]} : vector<16x16xbf16> to vector<16x1xbf16>
    %cst_227 = arith.constant 0.000000e+00 : bf16
    %671 = vector.broadcast %cst_227 : bf16 to vector<16x1xbf16>
    %672 = arith.cmpf ogt, %670, %671 : vector<16x1xbf16>
    %673 = vector.extract_strided_slice %507 {offsets = [14, 0], sizes = [1, 128], strides = [1, 1]} : vector<16x128xf32> to vector<1x128xf32>
    %cst_228 = arith.constant -3.000000e+38 : f32
    %674 = vector.shape_cast %672 : vector<16x1xi1> to vector<16x1xi1>
    %675 = vector.broadcast %674 : vector<16x1xi1> to vector<16x128xi1>
    %676 = vector.shape_cast %673 : vector<1x128xf32> to vector<1x128xf32>
    %677 = vector.broadcast %676 : vector<1x128xf32> to vector<16x128xf32>
    %678 = vector.broadcast %cst_228 : f32 to vector<16x128xf32>
    %679 = arith.select %675, %677, %678 : vector<16x128xi1>, vector<16x128xf32>
    %680 = arith.maximumf %669, %679 : vector<16x128xf32>
    %681 = vector.extract_strided_slice %512 {offsets = [0, 15], sizes = [16, 1], strides = [1, 1]} : vector<16x16xbf16> to vector<16x1xbf16>
    %cst_229 = arith.constant 0.000000e+00 : bf16
    %682 = vector.broadcast %cst_229 : bf16 to vector<16x1xbf16>
    %683 = arith.cmpf ogt, %681, %682 : vector<16x1xbf16>
    %684 = vector.extract_strided_slice %507 {offsets = [15, 0], sizes = [1, 128], strides = [1, 1]} : vector<16x128xf32> to vector<1x128xf32>
    %cst_230 = arith.constant -3.000000e+38 : f32
    %685 = vector.shape_cast %683 : vector<16x1xi1> to vector<16x1xi1>
    %686 = vector.broadcast %685 : vector<16x1xi1> to vector<16x128xi1>
    %687 = vector.shape_cast %684 : vector<1x128xf32> to vector<1x128xf32>
    %688 = vector.broadcast %687 : vector<1x128xf32> to vector<16x128xf32>
    %689 = vector.broadcast %cst_230 : f32 to vector<16x128xf32>
    %690 = arith.select %686, %688, %689 : vector<16x128xi1>, vector<16x128xf32>
    %691 = arith.maximumf %680, %690 : vector<16x128xf32>
    %c1_231 = arith.constant 1 : index
    %c0_232 = arith.constant 0 : index
    %c0_233 = arith.constant 0 : index
    %c0_234 = arith.constant 0 : index
    %692 = vector.load %arg4[%c1_231, %c0_232, %c0_233, %c0_234] : memref<2x2x16x1xf32, #tpu.memory_space<vmem>>, vector<1x1x16x1xf32>
    %693 = vector.shape_cast %692 : vector<1x1x16x1xf32> to vector<16x1xf32>
    %cst_235 = arith.constant 0.000000e+00 : f32
    %694 = vector.broadcast %cst_235 : f32 to vector<16x1xf32>
    %695 = arith.cmpf ogt, %693, %694 : vector<16x1xf32>
    %cst_236 = arith.constant 0.000000e+00 : f32
    %696 = vector.shape_cast %695 : vector<16x1xi1> to vector<16x1xi1>
    %697 = vector.broadcast %696 : vector<16x1xi1> to vector<16x128xi1>
    %698 = vector.broadcast %cst_236 : f32 to vector<16x128xf32>
    %699 = arith.select %697, %691, %698 : vector<16x128xi1>, vector<16x128xf32>
    %700 = arith.truncf %699 : vector<16x128xf32> to vector<16x128xbf16>
    %c0_237 = arith.constant 0 : index
    %c0_238 = arith.constant 0 : index
    %701 = vector.load %arg18[%c0_237, %c0_238] : memref<16x384xbf16, #tpu.memory_space<vmem>>, vector<16x128xbf16>
    tpu.vector_store %arg18[%c0_237, %c0_238], %700 {strides = array<i32>} : memref<16x384xbf16, #tpu.memory_space<vmem>>, vector<16x128xbf16>,
    %702 = arith.truncf %514 : vector<16x128xf32> to vector<16x128xbf16>
    %c0_239 = arith.constant 0 : index
    %c128_240 = arith.constant 128 : index
    %703 = vector.load %arg18[%c0_239, %c128_240] : memref<16x384xbf16, #tpu.memory_space<vmem>>, vector<16x128xbf16>
    tpu.vector_store %arg18[%c0_239, %c128_240], %702 {strides = array<i32>} : memref<16x384xbf16, #tpu.memory_space<vmem>>, vector<16x128xbf16>,
    %704 = arith.truncf %513 : vector<16x128xf32> to vector<16x128xbf16>
    %c0_241 = arith.constant 0 : index
    %c256_242 = arith.constant 256 : index
    %705 = vector.load %arg18[%c0_241, %c256_242] : memref<16x384xbf16, #tpu.memory_space<vmem>>, vector<16x128xbf16>
    tpu.vector_store %arg18[%c0_241, %c256_242], %704 {strides = array<i32>} : memref<16x384xbf16, #tpu.memory_space<vmem>>, vector<16x128xbf16>,
    %c0_243 = arith.constant 0 : index
    %c0_244 = arith.constant 0 : index
    %706 = vector.load %arg18[%c0_243, %c0_244] : memref<16x384xbf16, #tpu.memory_space<vmem>>, vector<16x384xbf16>
    %c1_245 = arith.constant 1 : index
    %c0_246 = arith.constant 0 : index
    %c0_247 = arith.constant 0 : index
    %c0_248 = arith.constant 0 : index
    %707 = vector.load %arg7[%c1_245, %c0_246, %c0_247, %c0_248] : memref<2x2x384x128xbf16, #tpu.memory_space<vmem>>, vector<1x1x384x128xbf16>
    %708 = vector.shape_cast %707 : vector<1x1x384x128xbf16> to vector<384x128xbf16>
    %cst_249 = arith.constant dense<0.000000e+00> : vector<16x128xf32>
    %709 = tpu.matmul %706, %708, %cst_249 {dimension_numbers = #tpu.dot_dimension_numbers<[1], [0], [0], [1], [0, 0, 1, 1], [], []>} : vector<16x384xbf16>, vector<384x128xbf16>, vector<16x128xf32> -> vector<16x128xf32>
    %c1_250 = arith.constant 1 : index
    %c0_251 = arith.constant 0 : index
    %c0_252 = arith.constant 0 : index
    %c0_253 = arith.constant 0 : index
    %710 = vector.load %arg8[%c1_250, %c0_251, %c0_252, %c0_253] : memref<2x2x1x128xf32, #tpu.memory_space<vmem>>, vector<1x1x1x128xf32>
    %711 = vector.shape_cast %710 : vector<1x1x1x128xf32> to vector<1x128xf32>
    %712 = vector.broadcast %711 : vector<1x128xf32> to vector<16x128xf32>
    %713 = arith.addf %709, %712 : vector<16x128xf32>
    %c1_254 = arith.constant 1 : index
    %c0_255 = arith.constant 0 : index
    %c0_256 = arith.constant 0 : index
    %c0_257 = arith.constant 0 : index
    %714 = vector.load %arg5[%c1_254, %c0_255, %c0_256, %c0_257] : memref<2x2x128x128xbf16, #tpu.memory_space<vmem>>, vector<1x1x128x128xbf16>
    %715 = vector.shape_cast %714 : vector<1x1x128x128xbf16> to vector<128x128xbf16>
    %cst_258 = arith.constant dense<0.000000e+00> : vector<16x128xf32>
    %716 = tpu.matmul %508, %715, %cst_258 {dimension_numbers = #tpu.dot_dimension_numbers<[1], [0], [0], [1], [0, 0, 1, 1], [], []>} : vector<16x128xbf16>, vector<128x128xbf16>, vector<16x128xf32> -> vector<16x128xf32>
    %c1_259 = arith.constant 1 : index
    %c0_260 = arith.constant 0 : index
    %c0_261 = arith.constant 0 : index
    %c0_262 = arith.constant 0 : index
    %717 = vector.load %arg6[%c1_259, %c0_260, %c0_261, %c0_262] : memref<2x2x1x128xf32, #tpu.memory_space<vmem>>, vector<1x1x1x128xf32>
    %718 = vector.shape_cast %717 : vector<1x1x1x128xf32> to vector<1x128xf32>
    %719 = vector.broadcast %718 : vector<1x128xf32> to vector<16x128xf32>
    %720 = arith.addf %716, %719 : vector<16x128xf32>
    %cst_263 = arith.constant 0.000000e+00 : f32
    %721 = vector.broadcast %cst_263 : f32 to vector<16x128xf32>
    %722 = arith.maximumf %713, %721 : vector<16x128xf32>
    %723 = arith.truncf %722 : vector<16x128xf32> to vector<16x128xbf16>
    %c0_264 = arith.constant 0 : index
    %c0_265 = arith.constant 0 : index
    %724 = vector.load %arg18[%c0_264, %c0_265] : memref<16x384xbf16, #tpu.memory_space<vmem>>, vector<16x128xbf16>
    tpu.vector_store %arg18[%c0_264, %c0_265], %723 {strides = array<i32>} : memref<16x384xbf16, #tpu.memory_space<vmem>>, vector<16x128xbf16>,
    %cst_266 = arith.constant 0.000000e+00 : f32
    %725 = vector.broadcast %cst_266 : f32 to vector<16x128xf32>
    %726 = arith.maximumf %720, %725 : vector<16x128xf32>
    %727 = arith.truncf %726 : vector<16x128xf32> to vector<16x128xbf16>
    %c0_267 = arith.constant 0 : index
    %c128_268 = arith.constant 128 : index
    %728 = vector.load %arg18[%c0_267, %c128_268] : memref<16x384xbf16, #tpu.memory_space<vmem>>, vector<16x128xbf16>
    tpu.vector_store %arg18[%c0_267, %c128_268], %727 {strides = array<i32>} : memref<16x384xbf16, #tpu.memory_space<vmem>>, vector<16x128xbf16>,
    %c0_269 = arith.constant 0 : index
    %c0_270 = arith.constant 0 : index
    %729 = vector.load %arg18[%c0_269, %c0_270] : memref<16x384xbf16, #tpu.memory_space<vmem>>, vector<16x256xbf16>
    %c1_271 = arith.constant 1 : index
    %c0_272 = arith.constant 0 : index
    %c0_273 = arith.constant 0 : index
    %c0_274 = arith.constant 0 : index
    %730 = vector.load %arg9[%c1_271, %c0_272, %c0_273, %c0_274] : memref<2x2x256x128xbf16, #tpu.memory_space<vmem>>, vector<1x1x256x128xbf16>
    %731 = vector.shape_cast %730 : vector<1x1x256x128xbf16> to vector<256x128xbf16>
    %cst_275 = arith.constant dense<0.000000e+00> : vector<16x128xf32>
    %732 = tpu.matmul %729, %731, %cst_275 {dimension_numbers = #tpu.dot_dimension_numbers<[1], [0], [0], [1], [0, 0, 1, 1], [], []>} : vector<16x256xbf16>, vector<256x128xbf16>, vector<16x128xf32> -> vector<16x128xf32>
    %c1_276 = arith.constant 1 : index
    %c0_277 = arith.constant 0 : index
    %c0_278 = arith.constant 0 : index
    %c0_279 = arith.constant 0 : index
    %733 = vector.load %arg10[%c1_276, %c0_277, %c0_278, %c0_279] : memref<2x2x1x128xf32, #tpu.memory_space<vmem>>, vector<1x1x1x128xf32>
    %734 = vector.shape_cast %733 : vector<1x1x1x128xf32> to vector<1x128xf32>
    %735 = vector.broadcast %734 : vector<1x128xf32> to vector<16x128xf32>
    %736 = arith.addf %732, %735 : vector<16x128xf32>
    %cst_280 = arith.constant 0.000000e+00 : f32
    %737 = vector.broadcast %cst_280 : f32 to vector<16x128xf32>
    %738 = arith.maximumf %736, %737 : vector<16x128xf32>
    %739 = arith.truncf %738 : vector<16x128xf32> to vector<16x128xbf16>
    %c0_281 = arith.constant 0 : index
    %c0_282 = arith.constant 0 : index
    %740 = vector.load %arg19[%c0_281, %c0_282] : memref<32x128xbf16, #tpu.memory_space<vmem>>, vector<16x128xbf16>
    tpu.vector_store %arg19[%c0_281, %c0_282], %739 {strides = array<i32>} : memref<32x128xbf16, #tpu.memory_space<vmem>>, vector<16x128xbf16>,
    %741 = vector.extract_strided_slice %510 {offsets = [32, 0], sizes = [16, 16], strides = [1, 1]} : vector<64x16xbf16> to vector<16x16xbf16>
    %742 = vector.extract_strided_slice %511 {offsets = [32, 0], sizes = [16, 128], strides = [1, 1]} : vector<64x128xf32> to vector<16x128xf32>
    %743 = vector.extract_strided_slice %511 {offsets = [48, 0], sizes = [16, 128], strides = [1, 1]} : vector<64x128xf32> to vector<16x128xf32>
    %cst_283 = arith.constant -3.000000e+38 : f32
    %744 = vector.broadcast %cst_283 : f32 to vector<16x128xf32>
    %745 = vector.extract_strided_slice %741 {offsets = [0, 0], sizes = [16, 1], strides = [1, 1]} : vector<16x16xbf16> to vector<16x1xbf16>
    %cst_284 = arith.constant 0.000000e+00 : bf16
    %746 = vector.broadcast %cst_284 : bf16 to vector<16x1xbf16>
    %747 = arith.cmpf ogt, %745, %746 : vector<16x1xbf16>
    %748 = vector.extract_strided_slice %507 {offsets = [0, 0], sizes = [1, 128], strides = [1, 1]} : vector<16x128xf32> to vector<1x128xf32>
    %cst_285 = arith.constant -3.000000e+38 : f32
    %749 = vector.shape_cast %747 : vector<16x1xi1> to vector<16x1xi1>
    %750 = vector.broadcast %749 : vector<16x1xi1> to vector<16x128xi1>
    %751 = vector.shape_cast %748 : vector<1x128xf32> to vector<1x128xf32>
    %752 = vector.broadcast %751 : vector<1x128xf32> to vector<16x128xf32>
    %753 = vector.broadcast %cst_285 : f32 to vector<16x128xf32>
    %754 = arith.select %750, %752, %753 : vector<16x128xi1>, vector<16x128xf32>
    %755 = arith.maximumf %744, %754 : vector<16x128xf32>
    %756 = vector.extract_strided_slice %741 {offsets = [0, 1], sizes = [16, 1], strides = [1, 1]} : vector<16x16xbf16> to vector<16x1xbf16>
    %cst_286 = arith.constant 0.000000e+00 : bf16
    %757 = vector.broadcast %cst_286 : bf16 to vector<16x1xbf16>
    %758 = arith.cmpf ogt, %756, %757 : vector<16x1xbf16>
    %759 = vector.extract_strided_slice %507 {offsets = [1, 0], sizes = [1, 128], strides = [1, 1]} : vector<16x128xf32> to vector<1x128xf32>
    %cst_287 = arith.constant -3.000000e+38 : f32
    %760 = vector.shape_cast %758 : vector<16x1xi1> to vector<16x1xi1>
    %761 = vector.broadcast %760 : vector<16x1xi1> to vector<16x128xi1>
    %762 = vector.shape_cast %759 : vector<1x128xf32> to vector<1x128xf32>
    %763 = vector.broadcast %762 : vector<1x128xf32> to vector<16x128xf32>
    %764 = vector.broadcast %cst_287 : f32 to vector<16x128xf32>
    %765 = arith.select %761, %763, %764 : vector<16x128xi1>, vector<16x128xf32>
    %766 = arith.maximumf %755, %765 : vector<16x128xf32>
    %767 = vector.extract_strided_slice %741 {offsets = [0, 2], sizes = [16, 1], strides = [1, 1]} : vector<16x16xbf16> to vector<16x1xbf16>
    %cst_288 = arith.constant 0.000000e+00 : bf16
    %768 = vector.broadcast %cst_288 : bf16 to vector<16x1xbf16>
    %769 = arith.cmpf ogt, %767, %768 : vector<16x1xbf16>
    %770 = vector.extract_strided_slice %507 {offsets = [2, 0], sizes = [1, 128], strides = [1, 1]} : vector<16x128xf32> to vector<1x128xf32>
    %cst_289 = arith.constant -3.000000e+38 : f32
    %771 = vector.shape_cast %769 : vector<16x1xi1> to vector<16x1xi1>
    %772 = vector.broadcast %771 : vector<16x1xi1> to vector<16x128xi1>
    %773 = vector.shape_cast %770 : vector<1x128xf32> to vector<1x128xf32>
    %774 = vector.broadcast %773 : vector<1x128xf32> to vector<16x128xf32>
    %775 = vector.broadcast %cst_289 : f32 to vector<16x128xf32>
    %776 = arith.select %772, %774, %775 : vector<16x128xi1>, vector<16x128xf32>
    %777 = arith.maximumf %766, %776 : vector<16x128xf32>
    %778 = vector.extract_strided_slice %741 {offsets = [0, 3], sizes = [16, 1], strides = [1, 1]} : vector<16x16xbf16> to vector<16x1xbf16>
    %cst_290 = arith.constant 0.000000e+00 : bf16
    %779 = vector.broadcast %cst_290 : bf16 to vector<16x1xbf16>
    %780 = arith.cmpf ogt, %778, %779 : vector<16x1xbf16>
    %781 = vector.extract_strided_slice %507 {offsets = [3, 0], sizes = [1, 128], strides = [1, 1]} : vector<16x128xf32> to vector<1x128xf32>
    %cst_291 = arith.constant -3.000000e+38 : f32
    %782 = vector.shape_cast %780 : vector<16x1xi1> to vector<16x1xi1>
    %783 = vector.broadcast %782 : vector<16x1xi1> to vector<16x128xi1>
    %784 = vector.shape_cast %781 : vector<1x128xf32> to vector<1x128xf32>
    %785 = vector.broadcast %784 : vector<1x128xf32> to vector<16x128xf32>
    %786 = vector.broadcast %cst_291 : f32 to vector<16x128xf32>
    %787 = arith.select %783, %785, %786 : vector<16x128xi1>, vector<16x128xf32>
    %788 = arith.maximumf %777, %787 : vector<16x128xf32>
    %789 = vector.extract_strided_slice %741 {offsets = [0, 4], sizes = [16, 1], strides = [1, 1]} : vector<16x16xbf16> to vector<16x1xbf16>
    %cst_292 = arith.constant 0.000000e+00 : bf16
    %790 = vector.broadcast %cst_292 : bf16 to vector<16x1xbf16>
    %791 = arith.cmpf ogt, %789, %790 : vector<16x1xbf16>
    %792 = vector.extract_strided_slice %507 {offsets = [4, 0], sizes = [1, 128], strides = [1, 1]} : vector<16x128xf32> to vector<1x128xf32>
    %cst_293 = arith.constant -3.000000e+38 : f32
    %793 = vector.shape_cast %791 : vector<16x1xi1> to vector<16x1xi1>
    %794 = vector.broadcast %793 : vector<16x1xi1> to vector<16x128xi1>
    %795 = vector.shape_cast %792 : vector<1x128xf32> to vector<1x128xf32>
    %796 = vector.broadcast %795 : vector<1x128xf32> to vector<16x128xf32>
    %797 = vector.broadcast %cst_293 : f32 to vector<16x128xf32>
    %798 = arith.select %794, %796, %797 : vector<16x128xi1>, vector<16x128xf32>
    %799 = arith.maximumf %788, %798 : vector<16x128xf32>
    %800 = vector.extract_strided_slice %741 {offsets = [0, 5], sizes = [16, 1], strides = [1, 1]} : vector<16x16xbf16> to vector<16x1xbf16>
    %cst_294 = arith.constant 0.000000e+00 : bf16
    %801 = vector.broadcast %cst_294 : bf16 to vector<16x1xbf16>
    %802 = arith.cmpf ogt, %800, %801 : vector<16x1xbf16>
    %803 = vector.extract_strided_slice %507 {offsets = [5, 0], sizes = [1, 128], strides = [1, 1]} : vector<16x128xf32> to vector<1x128xf32>
    %cst_295 = arith.constant -3.000000e+38 : f32
    %804 = vector.shape_cast %802 : vector<16x1xi1> to vector<16x1xi1>
    %805 = vector.broadcast %804 : vector<16x1xi1> to vector<16x128xi1>
    %806 = vector.shape_cast %803 : vector<1x128xf32> to vector<1x128xf32>
    %807 = vector.broadcast %806 : vector<1x128xf32> to vector<16x128xf32>
    %808 = vector.broadcast %cst_295 : f32 to vector<16x128xf32>
    %809 = arith.select %805, %807, %808 : vector<16x128xi1>, vector<16x128xf32>
    %810 = arith.maximumf %799, %809 : vector<16x128xf32>
    %811 = vector.extract_strided_slice %741 {offsets = [0, 6], sizes = [16, 1], strides = [1, 1]} : vector<16x16xbf16> to vector<16x1xbf16>
    %cst_296 = arith.constant 0.000000e+00 : bf16
    %812 = vector.broadcast %cst_296 : bf16 to vector<16x1xbf16>
    %813 = arith.cmpf ogt, %811, %812 : vector<16x1xbf16>
    %814 = vector.extract_strided_slice %507 {offsets = [6, 0], sizes = [1, 128], strides = [1, 1]} : vector<16x128xf32> to vector<1x128xf32>
    %cst_297 = arith.constant -3.000000e+38 : f32
    %815 = vector.shape_cast %813 : vector<16x1xi1> to vector<16x1xi1>
    %816 = vector.broadcast %815 : vector<16x1xi1> to vector<16x128xi1>
    %817 = vector.shape_cast %814 : vector<1x128xf32> to vector<1x128xf32>
    %818 = vector.broadcast %817 : vector<1x128xf32> to vector<16x128xf32>
    %819 = vector.broadcast %cst_297 : f32 to vector<16x128xf32>
    %820 = arith.select %816, %818, %819 : vector<16x128xi1>, vector<16x128xf32>
    %821 = arith.maximumf %810, %820 : vector<16x128xf32>
    %822 = vector.extract_strided_slice %741 {offsets = [0, 7], sizes = [16, 1], strides = [1, 1]} : vector<16x16xbf16> to vector<16x1xbf16>
    %cst_298 = arith.constant 0.000000e+00 : bf16
    %823 = vector.broadcast %cst_298 : bf16 to vector<16x1xbf16>
    %824 = arith.cmpf ogt, %822, %823 : vector<16x1xbf16>
    %825 = vector.extract_strided_slice %507 {offsets = [7, 0], sizes = [1, 128], strides = [1, 1]} : vector<16x128xf32> to vector<1x128xf32>
    %cst_299 = arith.constant -3.000000e+38 : f32
    %826 = vector.shape_cast %824 : vector<16x1xi1> to vector<16x1xi1>
    %827 = vector.broadcast %826 : vector<16x1xi1> to vector<16x128xi1>
    %828 = vector.shape_cast %825 : vector<1x128xf32> to vector<1x128xf32>
    %829 = vector.broadcast %828 : vector<1x128xf32> to vector<16x128xf32>
    %830 = vector.broadcast %cst_299 : f32 to vector<16x128xf32>
    %831 = arith.select %827, %829, %830 : vector<16x128xi1>, vector<16x128xf32>
    %832 = arith.maximumf %821, %831 : vector<16x128xf32>
    %833 = vector.extract_strided_slice %741 {offsets = [0, 8], sizes = [16, 1], strides = [1, 1]} : vector<16x16xbf16> to vector<16x1xbf16>
    %cst_300 = arith.constant 0.000000e+00 : bf16
    %834 = vector.broadcast %cst_300 : bf16 to vector<16x1xbf16>
    %835 = arith.cmpf ogt, %833, %834 : vector<16x1xbf16>
    %836 = vector.extract_strided_slice %507 {offsets = [8, 0], sizes = [1, 128], strides = [1, 1]} : vector<16x128xf32> to vector<1x128xf32>
    %cst_301 = arith.constant -3.000000e+38 : f32
    %837 = vector.shape_cast %835 : vector<16x1xi1> to vector<16x1xi1>
    %838 = vector.broadcast %837 : vector<16x1xi1> to vector<16x128xi1>
    %839 = vector.shape_cast %836 : vector<1x128xf32> to vector<1x128xf32>
    %840 = vector.broadcast %839 : vector<1x128xf32> to vector<16x128xf32>
    %841 = vector.broadcast %cst_301 : f32 to vector<16x128xf32>
    %842 = arith.select %838, %840, %841 : vector<16x128xi1>, vector<16x128xf32>
    %843 = arith.maximumf %832, %842 : vector<16x128xf32>
    %844 = vector.extract_strided_slice %741 {offsets = [0, 9], sizes = [16, 1], strides = [1, 1]} : vector<16x16xbf16> to vector<16x1xbf16>
    %cst_302 = arith.constant 0.000000e+00 : bf16
    %845 = vector.broadcast %cst_302 : bf16 to vector<16x1xbf16>
    %846 = arith.cmpf ogt, %844, %845 : vector<16x1xbf16>
    %847 = vector.extract_strided_slice %507 {offsets = [9, 0], sizes = [1, 128], strides = [1, 1]} : vector<16x128xf32> to vector<1x128xf32>
    %cst_303 = arith.constant -3.000000e+38 : f32
    %848 = vector.shape_cast %846 : vector<16x1xi1> to vector<16x1xi1>
    %849 = vector.broadcast %848 : vector<16x1xi1> to vector<16x128xi1>
    %850 = vector.shape_cast %847 : vector<1x128xf32> to vector<1x128xf32>
    %851 = vector.broadcast %850 : vector<1x128xf32> to vector<16x128xf32>
    %852 = vector.broadcast %cst_303 : f32 to vector<16x128xf32>
    %853 = arith.select %849, %851, %852 : vector<16x128xi1>, vector<16x128xf32>
    %854 = arith.maximumf %843, %853 : vector<16x128xf32>
    %855 = vector.extract_strided_slice %741 {offsets = [0, 10], sizes = [16, 1], strides = [1, 1]} : vector<16x16xbf16> to vector<16x1xbf16>
    %cst_304 = arith.constant 0.000000e+00 : bf16
    %856 = vector.broadcast %cst_304 : bf16 to vector<16x1xbf16>
    %857 = arith.cmpf ogt, %855, %856 : vector<16x1xbf16>
    %858 = vector.extract_strided_slice %507 {offsets = [10, 0], sizes = [1, 128], strides = [1, 1]} : vector<16x128xf32> to vector<1x128xf32>
    %cst_305 = arith.constant -3.000000e+38 : f32
    %859 = vector.shape_cast %857 : vector<16x1xi1> to vector<16x1xi1>
    %860 = vector.broadcast %859 : vector<16x1xi1> to vector<16x128xi1>
    %861 = vector.shape_cast %858 : vector<1x128xf32> to vector<1x128xf32>
    %862 = vector.broadcast %861 : vector<1x128xf32> to vector<16x128xf32>
    %863 = vector.broadcast %cst_305 : f32 to vector<16x128xf32>
    %864 = arith.select %860, %862, %863 : vector<16x128xi1>, vector<16x128xf32>
    %865 = arith.maximumf %854, %864 : vector<16x128xf32>
    %866 = vector.extract_strided_slice %741 {offsets = [0, 11], sizes = [16, 1], strides = [1, 1]} : vector<16x16xbf16> to vector<16x1xbf16>
    %cst_306 = arith.constant 0.000000e+00 : bf16
    %867 = vector.broadcast %cst_306 : bf16 to vector<16x1xbf16>
    %868 = arith.cmpf ogt, %866, %867 : vector<16x1xbf16>
    %869 = vector.extract_strided_slice %507 {offsets = [11, 0], sizes = [1, 128], strides = [1, 1]} : vector<16x128xf32> to vector<1x128xf32>
    %cst_307 = arith.constant -3.000000e+38 : f32
    %870 = vector.shape_cast %868 : vector<16x1xi1> to vector<16x1xi1>
    %871 = vector.broadcast %870 : vector<16x1xi1> to vector<16x128xi1>
    %872 = vector.shape_cast %869 : vector<1x128xf32> to vector<1x128xf32>
    %873 = vector.broadcast %872 : vector<1x128xf32> to vector<16x128xf32>
    %874 = vector.broadcast %cst_307 : f32 to vector<16x128xf32>
    %875 = arith.select %871, %873, %874 : vector<16x128xi1>, vector<16x128xf32>
    %876 = arith.maximumf %865, %875 : vector<16x128xf32>
    %877 = vector.extract_strided_slice %741 {offsets = [0, 12], sizes = [16, 1], strides = [1, 1]} : vector<16x16xbf16> to vector<16x1xbf16>
    %cst_308 = arith.constant 0.000000e+00 : bf16
    %878 = vector.broadcast %cst_308 : bf16 to vector<16x1xbf16>
    %879 = arith.cmpf ogt, %877, %878 : vector<16x1xbf16>
    %880 = vector.extract_strided_slice %507 {offsets = [12, 0], sizes = [1, 128], strides = [1, 1]} : vector<16x128xf32> to vector<1x128xf32>
    %cst_309 = arith.constant -3.000000e+38 : f32
    %881 = vector.shape_cast %879 : vector<16x1xi1> to vector<16x1xi1>
    %882 = vector.broadcast %881 : vector<16x1xi1> to vector<16x128xi1>
    %883 = vector.shape_cast %880 : vector<1x128xf32> to vector<1x128xf32>
    %884 = vector.broadcast %883 : vector<1x128xf32> to vector<16x128xf32>
    %885 = vector.broadcast %cst_309 : f32 to vector<16x128xf32>
    %886 = arith.select %882, %884, %885 : vector<16x128xi1>, vector<16x128xf32>
    %887 = arith.maximumf %876, %886 : vector<16x128xf32>
    %888 = vector.extract_strided_slice %741 {offsets = [0, 13], sizes = [16, 1], strides = [1, 1]} : vector<16x16xbf16> to vector<16x1xbf16>
    %cst_310 = arith.constant 0.000000e+00 : bf16
    %889 = vector.broadcast %cst_310 : bf16 to vector<16x1xbf16>
    %890 = arith.cmpf ogt, %888, %889 : vector<16x1xbf16>
    %891 = vector.extract_strided_slice %507 {offsets = [13, 0], sizes = [1, 128], strides = [1, 1]} : vector<16x128xf32> to vector<1x128xf32>
    %cst_311 = arith.constant -3.000000e+38 : f32
    %892 = vector.shape_cast %890 : vector<16x1xi1> to vector<16x1xi1>
    %893 = vector.broadcast %892 : vector<16x1xi1> to vector<16x128xi1>
    %894 = vector.shape_cast %891 : vector<1x128xf32> to vector<1x128xf32>
    %895 = vector.broadcast %894 : vector<1x128xf32> to vector<16x128xf32>
    %896 = vector.broadcast %cst_311 : f32 to vector<16x128xf32>
    %897 = arith.select %893, %895, %896 : vector<16x128xi1>, vector<16x128xf32>
    %898 = arith.maximumf %887, %897 : vector<16x128xf32>
    %899 = vector.extract_strided_slice %741 {offsets = [0, 14], sizes = [16, 1], strides = [1, 1]} : vector<16x16xbf16> to vector<16x1xbf16>
    %cst_312 = arith.constant 0.000000e+00 : bf16
    %900 = vector.broadcast %cst_312 : bf16 to vector<16x1xbf16>
    %901 = arith.cmpf ogt, %899, %900 : vector<16x1xbf16>
    %902 = vector.extract_strided_slice %507 {offsets = [14, 0], sizes = [1, 128], strides = [1, 1]} : vector<16x128xf32> to vector<1x128xf32>
    %cst_313 = arith.constant -3.000000e+38 : f32
    %903 = vector.shape_cast %901 : vector<16x1xi1> to vector<16x1xi1>
    %904 = vector.broadcast %903 : vector<16x1xi1> to vector<16x128xi1>
    %905 = vector.shape_cast %902 : vector<1x128xf32> to vector<1x128xf32>
    %906 = vector.broadcast %905 : vector<1x128xf32> to vector<16x128xf32>
    %907 = vector.broadcast %cst_313 : f32 to vector<16x128xf32>
    %908 = arith.select %904, %906, %907 : vector<16x128xi1>, vector<16x128xf32>
    %909 = arith.maximumf %898, %908 : vector<16x128xf32>
    %910 = vector.extract_strided_slice %741 {offsets = [0, 15], sizes = [16, 1], strides = [1, 1]} : vector<16x16xbf16> to vector<16x1xbf16>
    %cst_314 = arith.constant 0.000000e+00 : bf16
    %911 = vector.broadcast %cst_314 : bf16 to vector<16x1xbf16>
    %912 = arith.cmpf ogt, %910, %911 : vector<16x1xbf16>
    %913 = vector.extract_strided_slice %507 {offsets = [15, 0], sizes = [1, 128], strides = [1, 1]} : vector<16x128xf32> to vector<1x128xf32>
    %cst_315 = arith.constant -3.000000e+38 : f32
    %914 = vector.shape_cast %912 : vector<16x1xi1> to vector<16x1xi1>
    %915 = vector.broadcast %914 : vector<16x1xi1> to vector<16x128xi1>
    %916 = vector.shape_cast %913 : vector<1x128xf32> to vector<1x128xf32>
    %917 = vector.broadcast %916 : vector<1x128xf32> to vector<16x128xf32>
    %918 = vector.broadcast %cst_315 : f32 to vector<16x128xf32>
    %919 = arith.select %915, %917, %918 : vector<16x128xi1>, vector<16x128xf32>
    %920 = arith.maximumf %909, %919 : vector<16x128xf32>
    %c1_316 = arith.constant 1 : index
    %c1_317 = arith.constant 1 : index
    %c0_318 = arith.constant 0 : index
    %c0_319 = arith.constant 0 : index
    %921 = vector.load %arg4[%c1_316, %c1_317, %c0_318, %c0_319] : memref<2x2x16x1xf32, #tpu.memory_space<vmem>>, vector<1x1x16x1xf32>
    %922 = vector.shape_cast %921 : vector<1x1x16x1xf32> to vector<16x1xf32>
    %cst_320 = arith.constant 0.000000e+00 : f32
    %923 = vector.broadcast %cst_320 : f32 to vector<16x1xf32>
    %924 = arith.cmpf ogt, %922, %923 : vector<16x1xf32>
    %cst_321 = arith.constant 0.000000e+00 : f32
    %925 = vector.shape_cast %924 : vector<16x1xi1> to vector<16x1xi1>
    %926 = vector.broadcast %925 : vector<16x1xi1> to vector<16x128xi1>
    %927 = vector.broadcast %cst_321 : f32 to vector<16x128xf32>
    %928 = arith.select %926, %920, %927 : vector<16x128xi1>, vector<16x128xf32>
    %929 = arith.truncf %928 : vector<16x128xf32> to vector<16x128xbf16>
    %c0_322 = arith.constant 0 : index
    %c0_323 = arith.constant 0 : index
    %930 = vector.load %arg18[%c0_322, %c0_323] : memref<16x384xbf16, #tpu.memory_space<vmem>>, vector<16x128xbf16>
    tpu.vector_store %arg18[%c0_322, %c0_323], %929 {strides = array<i32>} : memref<16x384xbf16, #tpu.memory_space<vmem>>, vector<16x128xbf16>,
    %931 = arith.truncf %743 : vector<16x128xf32> to vector<16x128xbf16>
    %c0_324 = arith.constant 0 : index
    %c128_325 = arith.constant 128 : index
    %932 = vector.load %arg18[%c0_324, %c128_325] : memref<16x384xbf16, #tpu.memory_space<vmem>>, vector<16x128xbf16>
    tpu.vector_store %arg18[%c0_324, %c128_325], %931 {strides = array<i32>} : memref<16x384xbf16, #tpu.memory_space<vmem>>, vector<16x128xbf16>,
    %933 = arith.truncf %742 : vector<16x128xf32> to vector<16x128xbf16>
    %c0_326 = arith.constant 0 : index
    %c256_327 = arith.constant 256 : index
    %934 = vector.load %arg18[%c0_326, %c256_327] : memref<16x384xbf16, #tpu.memory_space<vmem>>, vector<16x128xbf16>
    tpu.vector_store %arg18[%c0_326, %c256_327], %933 {strides = array<i32>} : memref<16x384xbf16, #tpu.memory_space<vmem>>, vector<16x128xbf16>,
    %c0_328 = arith.constant 0 : index
    %c0_329 = arith.constant 0 : index
    %935 = vector.load %arg18[%c0_328, %c0_329] : memref<16x384xbf16, #tpu.memory_space<vmem>>, vector<16x384xbf16>
    %c1_330 = arith.constant 1 : index
    %c1_331 = arith.constant 1 : index
    %c0_332 = arith.constant 0 : index
    %c0_333 = arith.constant 0 : index
    %936 = vector.load %arg7[%c1_330, %c1_331, %c0_332, %c0_333] : memref<2x2x384x128xbf16, #tpu.memory_space<vmem>>, vector<1x1x384x128xbf16>
    %937 = vector.shape_cast %936 : vector<1x1x384x128xbf16> to vector<384x128xbf16>
    %cst_334 = arith.constant dense<0.000000e+00> : vector<16x128xf32>
    %938 = tpu.matmul %935, %937, %cst_334 {dimension_numbers = #tpu.dot_dimension_numbers<[1], [0], [0], [1], [0, 0, 1, 1], [], []>} : vector<16x384xbf16>, vector<384x128xbf16>, vector<16x128xf32> -> vector<16x128xf32>
    %c1_335 = arith.constant 1 : index
    %c1_336 = arith.constant 1 : index
    %c0_337 = arith.constant 0 : index
    %c0_338 = arith.constant 0 : index
    %939 = vector.load %arg8[%c1_335, %c1_336, %c0_337, %c0_338] : memref<2x2x1x128xf32, #tpu.memory_space<vmem>>, vector<1x1x1x128xf32>
    %940 = vector.shape_cast %939 : vector<1x1x1x128xf32> to vector<1x128xf32>
    %941 = vector.broadcast %940 : vector<1x128xf32> to vector<16x128xf32>
    %942 = arith.addf %938, %941 : vector<16x128xf32>
    %c1_339 = arith.constant 1 : index
    %c1_340 = arith.constant 1 : index
    %c0_341 = arith.constant 0 : index
    %c0_342 = arith.constant 0 : index
    %943 = vector.load %arg5[%c1_339, %c1_340, %c0_341, %c0_342] : memref<2x2x128x128xbf16, #tpu.memory_space<vmem>>, vector<1x1x128x128xbf16>
    %944 = vector.shape_cast %943 : vector<1x1x128x128xbf16> to vector<128x128xbf16>
    %cst_343 = arith.constant dense<0.000000e+00> : vector<16x128xf32>
    %945 = tpu.matmul %508, %944, %cst_343 {dimension_numbers = #tpu.dot_dimension_numbers<[1], [0], [0], [1], [0, 0, 1, 1], [], []>} : vector<16x128xbf16>, vector<128x128xbf16>, vector<16x128xf32> -> vector<16x128xf32>
    %c1_344 = arith.constant 1 : index
    %c1_345 = arith.constant 1 : index
    %c0_346 = arith.constant 0 : index
    %c0_347 = arith.constant 0 : index
    %946 = vector.load %arg6[%c1_344, %c1_345, %c0_346, %c0_347] : memref<2x2x1x128xf32, #tpu.memory_space<vmem>>, vector<1x1x1x128xf32>
    %947 = vector.shape_cast %946 : vector<1x1x1x128xf32> to vector<1x128xf32>
    %948 = vector.broadcast %947 : vector<1x128xf32> to vector<16x128xf32>
    %949 = arith.addf %945, %948 : vector<16x128xf32>
    %cst_348 = arith.constant 0.000000e+00 : f32
    %950 = vector.broadcast %cst_348 : f32 to vector<16x128xf32>
    %951 = arith.maximumf %942, %950 : vector<16x128xf32>
    %952 = arith.truncf %951 : vector<16x128xf32> to vector<16x128xbf16>
    %c0_349 = arith.constant 0 : index
    %c0_350 = arith.constant 0 : index
    %953 = vector.load %arg18[%c0_349, %c0_350] : memref<16x384xbf16, #tpu.memory_space<vmem>>, vector<16x128xbf16>
    tpu.vector_store %arg18[%c0_349, %c0_350], %952 {strides = array<i32>} : memref<16x384xbf16, #tpu.memory_space<vmem>>, vector<16x128xbf16>,
    %cst_351 = arith.constant 0.000000e+00 : f32
    %954 = vector.broadcast %cst_351 : f32 to vector<16x128xf32>
    %955 = arith.maximumf %949, %954 : vector<16x128xf32>
    %956 = arith.truncf %955 : vector<16x128xf32> to vector<16x128xbf16>
    %c0_352 = arith.constant 0 : index
    %c128_353 = arith.constant 128 : index
    %957 = vector.load %arg18[%c0_352, %c128_353] : memref<16x384xbf16, #tpu.memory_space<vmem>>, vector<16x128xbf16>
    tpu.vector_store %arg18[%c0_352, %c128_353], %956 {strides = array<i32>} : memref<16x384xbf16, #tpu.memory_space<vmem>>, vector<16x128xbf16>,
    %c0_354 = arith.constant 0 : index
    %c0_355 = arith.constant 0 : index
    %958 = vector.load %arg18[%c0_354, %c0_355] : memref<16x384xbf16, #tpu.memory_space<vmem>>, vector<16x256xbf16>
    %c1_356 = arith.constant 1 : index
    %c1_357 = arith.constant 1 : index
    %c0_358 = arith.constant 0 : index
    %c0_359 = arith.constant 0 : index
    %959 = vector.load %arg9[%c1_356, %c1_357, %c0_358, %c0_359] : memref<2x2x256x128xbf16, #tpu.memory_space<vmem>>, vector<1x1x256x128xbf16>
    %960 = vector.shape_cast %959 : vector<1x1x256x128xbf16> to vector<256x128xbf16>
    %cst_360 = arith.constant dense<0.000000e+00> : vector<16x128xf32>
    %961 = tpu.matmul %958, %960, %cst_360 {dimension_numbers = #tpu.dot_dimension_numbers<[1], [0], [0], [1], [0, 0, 1, 1], [], []>} : vector<16x256xbf16>, vector<256x128xbf16>, vector<16x128xf32> -> vector<16x128xf32>
    %c1_361 = arith.constant 1 : index
    %c1_362 = arith.constant 1 : index
    %c0_363 = arith.constant 0 : index
    %c0_364 = arith.constant 0 : index
    %962 = vector.load %arg10[%c1_361, %c1_362, %c0_363, %c0_364] : memref<2x2x1x128xf32, #tpu.memory_space<vmem>>, vector<1x1x1x128xf32>
    %963 = vector.shape_cast %962 : vector<1x1x1x128xf32> to vector<1x128xf32>
    %964 = vector.broadcast %963 : vector<1x128xf32> to vector<16x128xf32>
    %965 = arith.addf %961, %964 : vector<16x128xf32>
    %cst_365 = arith.constant 0.000000e+00 : f32
    %966 = vector.broadcast %cst_365 : f32 to vector<16x128xf32>
    %967 = arith.maximumf %965, %966 : vector<16x128xf32>
    %968 = arith.truncf %967 : vector<16x128xf32> to vector<16x128xbf16>
    %c16_366 = arith.constant 16 : index
    %c0_367 = arith.constant 0 : index
    %969 = vector.load %arg19[%c16_366, %c0_367] : memref<32x128xbf16, #tpu.memory_space<vmem>>, vector<16x128xbf16>
    tpu.vector_store %arg19[%c16_366, %c0_367], %968 {strides = array<i32>} : memref<32x128xbf16, #tpu.memory_space<vmem>>, vector<16x128xbf16>,
    %c0_368 = arith.constant 0 : index
    %c0_369 = arith.constant 0 : index
    %970 = vector.load %arg19[%c0_368, %c0_369] : memref<32x128xbf16, #tpu.memory_space<vmem>>, vector<32x128xbf16>
    %c0_370 = arith.constant 0 : index
    %c0_371 = arith.constant 0 : index
    %971 = vector.load %arg11[%c0_370, %c0_371] : memref<128x128xbf16, #tpu.memory_space<vmem>>, vector<128x128xbf16>
    %cst_372 = arith.constant dense<0.000000e+00> : vector<32x128xf32>
    %972 = tpu.matmul %970, %971, %cst_372 {dimension_numbers = #tpu.dot_dimension_numbers<[1], [0], [0], [1], [0, 0, 1, 1], [], []>} : vector<32x128xbf16>, vector<128x128xbf16>, vector<32x128xf32> -> vector<32x128xf32>
    %c0_373 = arith.constant 0 : index
    %c0_374 = arith.constant 0 : index
    %973 = vector.load %arg12[%c0_373, %c0_374] : memref<1x128xf32, #tpu.memory_space<vmem>>, vector<1x128xf32>
    %974 = vector.broadcast %973 : vector<1x128xf32> to vector<32x128xf32>
    %975 = arith.addf %972, %974 : vector<32x128xf32>
    %976 = math.tanh %975 : vector<32x128xf32>
    %977 = arith.truncf %976 : vector<32x128xf32> to vector<32x128xbf16>
    %c0_375 = arith.constant 0 : index
    %c0_376 = arith.constant 0 : index
    %978 = vector.load %arg13[%c0_375, %c0_376] : memref<128x1xbf16, #tpu.memory_space<vmem>>, vector<128x1xbf16>
    %cst_377 = arith.constant dense<0.000000e+00> : vector<32x1xf32>
    %979 = tpu.matmul %977, %978, %cst_377 {dimension_numbers = #tpu.dot_dimension_numbers<[1], [0], [0], [1], [0, 0, 1, 1], [], []>} : vector<32x128xbf16>, vector<128x1xbf16>, vector<32x1xf32> -> vector<32x1xf32>
    %980 = vector.extract_strided_slice %979 {offsets = [0, 0], sizes = [16, 1], strides = [1, 1]} : vector<32x1xf32> to vector<16x1xf32>
    %cst_378 = arith.constant dense<0.000000e+00> : vector<1xf32>
    %981 = vector.multi_reduction <add>, %980, %cst_378 [0] : vector<16x1xf32> to vector<1xf32>
    %982 = vector.shape_cast %981 : vector<1xf32> to vector<1x1xf32>
    %cst_379 = arith.constant 6.250000e-02 : f32
    %983 = vector.broadcast %cst_379 : f32 to vector<1x1xf32>
    %984 = arith.mulf %982, %983 : vector<1x1xf32>
    %985 = vector.extract_strided_slice %979 {offsets = [16, 0], sizes = [16, 1], strides = [1, 1]} : vector<32x1xf32> to vector<16x1xf32>
    %cst_380 = arith.constant dense<0.000000e+00> : vector<1xf32>
    %986 = vector.multi_reduction <add>, %985, %cst_380 [0] : vector<16x1xf32> to vector<1xf32>
    %987 = vector.shape_cast %986 : vector<1xf32> to vector<1x1xf32>
    %cst_381 = arith.constant 6.250000e-02 : f32
    %988 = vector.broadcast %cst_381 : f32 to vector<1x1xf32>
    %989 = arith.mulf %987, %988 : vector<1x1xf32>
    %990 = arith.maximumf %984, %989 : vector<1x1xf32>
    %991 = arith.subf %984, %990 : vector<1x1xf32>
    %992 = math.exp %991 : vector<1x1xf32>
    %993 = arith.subf %989, %990 : vector<1x1xf32>
    %994 = math.exp %993 : vector<1x1xf32>
    %995 = arith.addf %992, %994 : vector<1x1xf32>
    %996 = tpu.reciprocal %995 {approx = true} : vector<1x1xf32> -> vector<1x1xf32>
    %997 = arith.mulf %992, %996 : vector<1x1xf32>
    %c0_382 = arith.constant 0 : index
    %c0_383 = arith.constant 0 : index
    %998 = vector.load %arg19[%c0_382, %c0_383] : memref<32x128xbf16, #tpu.memory_space<vmem>>, vector<16x128xbf16>
    %999 = arith.extf %998 : vector<16x128xbf16> to vector<16x128xf32>
    %1000 = vector.broadcast %997 : vector<1x1xf32> to vector<16x128xf32>
    %1001 = arith.mulf %1000, %999 : vector<16x128xf32>
    %1002 = arith.mulf %994, %996 : vector<1x1xf32>
    %c16_384 = arith.constant 16 : index
    %c0_385 = arith.constant 0 : index
    %1003 = vector.load %arg19[%c16_384, %c0_385] : memref<32x128xbf16, #tpu.memory_space<vmem>>, vector<16x128xbf16>
    %1004 = arith.extf %1003 : vector<16x128xbf16> to vector<16x128xf32>
    %1005 = vector.broadcast %1002 : vector<1x1xf32> to vector<16x128xf32>
    %1006 = arith.mulf %1005, %1004 : vector<16x128xf32>
    %1007 = arith.addf %1001, %1006 : vector<16x128xf32>
    %c0_386 = arith.constant 0 : index
    %c0_387 = arith.constant 0 : index
    %1008 = vector.load %arg16[%c0_386, %c0_387] : memref<16x128xf32, #tpu.memory_space<vmem>>, vector<16x128xf32>
    tpu.vector_store %arg16[%c0_386, %c0_387], %1007 {strides = array<i32>} : memref<16x128xf32, #tpu.memory_space<vmem>>, vector<16x128xf32>,
    %1009 = arith.truncf %1007 : vector<16x128xf32> to vector<16x128xbf16>
    %c0_388 = arith.constant 0 : index
    %c0_389 = arith.constant 0 : index
    %1010 = vector.load %arg14[%c0_388, %c0_389] : memref<128x128xbf16, #tpu.memory_space<vmem>>, vector<128x128xbf16>
    %cst_390 = arith.constant dense<0.000000e+00> : vector<16x128xf32>
    %1011 = tpu.matmul %1009, %1010, %cst_390 {dimension_numbers = #tpu.dot_dimension_numbers<[1], [0], [0], [1], [0, 0, 1, 1], [], []>} : vector<16x128xbf16>, vector<128x128xbf16>, vector<16x128xf32> -> vector<16x128xf32>
    %c0_391 = arith.constant 0 : index
    %c0_392 = arith.constant 0 : index
    %1012 = vector.load %arg15[%c0_391, %c0_392] : memref<1x128xf32, #tpu.memory_space<vmem>>, vector<1x128xf32>
    %1013 = vector.broadcast %1012 : vector<1x128xf32> to vector<16x128xf32>
    %1014 = arith.addf %1011, %1013 : vector<16x128xf32>
    %1015 = arith.negf %1014 : vector<16x128xf32>
    %1016 = math.exp %1015 : vector<16x128xf32>
    %cst_393 = arith.constant 1.000000e+00 : f32
    %1017 = vector.broadcast %cst_393 : f32 to vector<16x128xf32>
    %1018 = arith.addf %1017, %1016 : vector<16x128xf32>
    %1019 = arith.divf %1017, %1018 : vector<16x128xf32>
    %c0_394 = arith.constant 0 : index
    %c0_395 = arith.constant 0 : index
    %1020 = vector.load %arg17[%c0_394, %c0_395] : memref<16x128xf32, #tpu.memory_space<vmem>>, vector<16x128xf32>
    tpu.vector_store %arg17[%c0_394, %c0_395], %1019 {strides = array<i32>} : memref<16x128xf32, #tpu.memory_space<vmem>>, vector<16x128xf32>,
    return
  }
}

</mosaic_0001>

<bundles_post_ra>
// kernel: ig_rgcn_forward.1
= control target key start
LH: loop header
LB: loop body
LE: loop exit
PB: predicated region body
PF: predicated region fallthrough
CT: control target
= control target key end

     0   :  { %s8447_s0 = inlined_call_operand.vmem [shape: bf16[16,128], index: 0, kind: input, shape index: {}]   ;;  %s8448_s1 = inlined_call_operand.vmem [shape: bf16[128,128], index: 1, kind: input, shape index: {}]   ;;  %s8449_s2 = inlined_call_operand.vmem [shape: f32[1,128], index: 2, kind: input, shape index: {}]   ;;  %s8450_s3 = inlined_call_operand.vmem [shape: bf16[2,64,16], index: 3, kind: input, shape index: {}]   ;;  %s8451_s4 = inlined_call_operand.vmem [shape: f32[2,2,16,1], index: 4, kind: input, shape index: {}]   ;;  %s8452_s5 = inlined_call_operand.vmem [shape: bf16[2,2,128,128], index: 5, kind: input, shape index: {}]   ;;  %s8453_s6 = inlined_call_operand.vmem [shape: f32[2,2,1,128], index: 6, kind: input, shape index: {}]   ;;  %s8454_s7 = inlined_call_operand.vmem [shape: bf16[2,2,384,128], index: 7, kind: input, shape index: {}]   ;;  %s8455_s8 = inlined_call_operand.vmem [shape: f32[2,2,1,128], index: 8, kind: input, shape index: {}]   ;;  %s8456_s9 = inlined_call_operand.vmem [shape: bf16[2,2,256,128], index: 9, kind: input, shape index: {}]   ;;  %s8457_s10 = inlined_call_operand.vmem [shape: f32[2,2,1,128], index: 10, kind: input, shape index: {}]   ;;  %s8458_s11 = inlined_call_operand.vmem [shape: bf16[128,128], index: 11, kind: input, shape index: {}]   ;;  %s8459_s12 = inlined_call_operand.vmem [shape: f32[1,128], index: 12, kind: input, shape index: {}]   ;;  %s8460_s13 = inlined_call_operand.vmem [shape: bf16[128,1], index: 13, kind: input, shape index: {}]   ;;  %s8461_s14 = inlined_call_operand.vmem [shape: bf16[128,128], index: 14, kind: input, shape index: {}]   ;;  %s8462_s15 = inlined_call_operand.vmem [shape: f32[1,128], index: 15, kind: input, shape index: {}]   ;;  %s8463_s16 = inlined_call_operand.hbm [shape: f32[16,128], index: 16, kind: output, shape index: {0}]   ;;  %s8464_s17 = inlined_call_operand.vmem [shape: f32[16,128], index: 17, kind: output, shape index: {1}]  }
   0x1   :  { %8502 = sst [smem:[#allocation7_spill]] %s8447_s0 }
   0x2   :  { %8503 = sst [smem:[#allocation8_spill]] %s8448_s1 }
   0x3   :  { %8504 = sst [smem:[#allocation9_spill]] %s8459_s12 }
   0x4   :  { %8505 = sst [smem:[#allocation10_spill]] %s8460_s13 }
   0x5   :  { %8506 = sst [smem:[#allocation11_spill]] %s8461_s14 }
   0x6   :  { %8507 = sst [smem:[#allocation12_spill]] %s8462_s15 }
   0x7   :  { %8508 = sst [smem:[#allocation13_spill]] %s8463_s16 }
   0x8   :  { %8509 = sst [smem:[#allocation14_spill]] %s8464_s17 }
   0x9   :  { %s8510_s26 = sld [smem:[#allocation8_spill]]  ;;  %v6547_v1 = vmov 0.0   ;;  %v6665_v2 = vld [vmem:[%s8450_s3] sm:$0xf]  ;;  %v6548_v4 = vmov 0   ;;  %s8494_s20 = smov 127  }
   0xa   :  { %5914 = vmatprep.subr.bf16.mxu0 %v6547_v1  ;;  %vm286_vm0 = vcmp.gt.bf16.partialorder %v6665_v2, 0  ;;  %6236 = vset.pattern.permute.xlu1 %v6548_v4  ;;  %v6677_v6 = vld [vmem:[%s8450_s3 + $0x4] sm:$0xf]  ;;  %s8492_s21 = smov 126   ;;  %vm6551_vm4 = vmmov 0   ;;  %s8490_s27 = smov 125  }
   0xb   :  { %v288_v5 = vsel %vm286_vm0, 65537, %v6548_v4  ;;  %6235 = vset.pattern.permute.xlu0 %v6548_v4  ;;  %vm287_vm1 = vcmp.gt.bf16.partialorder %v6677_v6, 0  ;;  %5930 = vmatprep.mubr.msk.bf16.mxu0 %vm6551_vm4, %v6547_v1  ;;  %s8488_s0 = smov 124   ;;  %s8486_s19 = smov 123   ;;  %v184_v19 = vld [vmem:[%s8450_s3 + $0x10] sm:$0xf]  ;;  %v5010_v32 = vcombine.low %v6665_v2, %v6677_v6 }
   0xc   :  { %v290_v7 = vunpack.c.l.b16 %v288_v5  ;;  %v289_v8 = vsel %vm287_vm1, 65537, %v6548_v4  ;;  %s8511_s25 = sld [smem:[#allocation7_spill]]  ;;  %s8484_s28 = smov 122   ;;  %vm1280_vm5 = vcmp.gt.bf16.partialorder %v184_v19, 0  ;;  %v672_v21 = vld [vmem:[%s8451_s4] sm:$0xff]  ;;  %v673_v22 = vld [vmem:[%s8451_s4 + $0x8] sm:$0xff] }
   0xd   :  { %v291_v9 = vunpack.c.l.b16 %v289_v8  ;;  %s8480_s29 = smov 121   ;;  %s8476_s30 = smov 119   ;;  %v1282_v20 = vsel %vm1280_vm5, 65537, %v6548_v4  ;;  %vm674_vm6 = vcmp.gt.f32.partialorder %v672_v21, 0.0  ;;  %v6792_v24 = vld [vmem:[%s8450_s3 + $0x14] sm:$0xf] }
   0xe   :  { %vm292_vm2 = vcmp.ne.s32.totalorder %v290_v7, 0  ;;  %s8466_s18 = smov 118   ;;  %s8474_s1 = smov 117   ;;  %v1284_v23 = vunpack.c.l.b16 %v1282_v20  ;;  %vm675_vm7 = vcmp.gt.f32.partialorder %v673_v22, 0.0  ;;  %v6795_v25 = vsel %vm674_vm6, 1, %v6548_v4 }
   0xf   :  { %v6237_v0 = vld [vmem:[%s8510_s26] sm:$0xff]   ;;  %v6238_v3 = vld [vmem:[%s8510_s26 + $0x8] sm:$0xff]   ;;  %v6239_v10 = vld [vmem:[%s8510_s26 + $0x10] sm:$0xff]   ;;  %v6686_v11 = vsel %vm292_vm2, 1, %v6548_v4  ;;  %vm293_vm3 = vcmp.ne.s32.totalorder %v291_v9, 0  ;;  %s8468_s22 = smov 116  }
  0x10   :  { %5915 = vmatpush3.bf16.msra.mxu0 %v6237_v0  ;;  %312 = vrot.lane.b32.xlu0 %v6686_v11, %s8494_s20  ;;  %v6694_v12 = vsel %vm293_vm3, 1, %v6548_v4  ;;  %v6240_v13 = vld [vmem:[%s8510_s26 + $0x18] sm:$0xff]   ;;  %v6241_v14 = vld [vmem:[%s8510_s26 + $0x20] sm:$0xff]   ;;  %v6242_v15 = vld [vmem:[%s8510_s26 + $0x28] sm:$0xff]   ;;  %s8472_s23 = smov 115   ;;  %vm1286_vm8 = vcmp.ne.s32.totalorder %v1284_v23, 0 }
  0x11   :  { %5916 = vmatprep.subr.bf16.mxu0 %v6547_v1  ;;  %336 = vrot.lane.b32.xlu1 %v6686_v11, %s8492_s21  ;;  %v6243_v16 = vld [vmem:[%s8510_s26 + $0x30] sm:$0xff]   ;;  %v6244_v17 = vld [vmem:[%s8510_s26 + $0x38] sm:$0xff]   ;;  %s8478_s26 = smov 120   ;;  %v6798_v26 = vsel %vm675_vm7, 1, %v6548_v4  ;;  %v6801_v27 = vsel %vm1286_vm8, 1, %v6548_v4  ;;  %vm1281_vm9 = vcmp.gt.bf16.partialorder %v6792_v24, 0 }
  0x12   :  { %v6245_v18 = vld [vmem:[%s8511_s25] sm:$0xff]   ;;  %v6806_v31 = vsel %vm1281_vm9, 65537, %v6548_v4  ;;  %vm208_vm12 = vcmask 130048  }
  0x13   :  { %v1285_v22 = vunpack.c.l.b16 %v6806_v31 }
  0x14   :  { %5917 = vmatpush3.bf16.msra.mxu0 %v6238_v3  ;;  %314 = vrot.lane.b32.xlu0 %v6694_v12, %s8494_s20 }
  0x15   :  { %5918 = vmatprep.subr.bf16.mxu0 %v6547_v1  ;;  %338 = vrot.lane.b32.xlu1 %v6694_v12, %s8492_s21 }
  0x18   :  { %5919 = vmatpush3.bf16.msra.mxu0 %v6239_v10  ;;  %360 = vrot.lane.b32.xlu0 %v6686_v11, %s8490_s27 }
  0x19   :  { %5920 = vmatprep.subr.bf16.mxu0 %v6547_v1  ;;  %362 = vrot.lane.b32.xlu1 %v6694_v12, %s8490_s27 }
  0x1c   :  { %5921 = vmatpush3.bf16.msra.mxu0 %v6240_v13  ;;  %384 = vrot.lane.b32.xlu0 %v6686_v11, %s8488_s0 }
  0x1d   :  { %5922 = vmatprep.subr.bf16.mxu0 %v6547_v1  ;;  %386 = vrot.lane.b32.xlu1 %v6694_v12, %s8488_s0 }
  0x20   :  { %5923 = vmatpush3.bf16.msra.mxu0 %v6241_v14  ;;  %408 = vrot.lane.b32.xlu0 %v6686_v11, %s8486_s19 }
  0x21   :  { %5924 = vmatprep.subr.bf16.mxu0 %v6547_v1  ;;  %410 = vrot.lane.b32.xlu1 %v6694_v12, %s8486_s19 }
  0x24   :  { %5925 = vmatpush3.bf16.msra.mxu0 %v6242_v15  ;;  %432 = vrot.lane.b32.xlu0 %v6686_v11, %s8484_s28 }
  0x25   :  { %5926 = vmatprep.subr.bf16.mxu0 %v6547_v1  ;;  %434 = vrot.lane.b32.xlu1 %v6694_v12, %s8484_s28 }
  0x28   :  { %5927 = vmatpush3.bf16.msra.mxu0 %v6243_v16  ;;  %456 = vrot.lane.b32.xlu0 %v6686_v11, %s8480_s29 }
  0x29   :  { %5928 = vmatprep.subr.bf16.mxu0 %v6547_v1  ;;  %458 = vrot.lane.b32.xlu1 %v6694_v12, %s8480_s29 }
  0x2c   :  { %5929 = vmatpush3.bf16.msra.mxu0 %v6244_v17  ;;  %480 = vrot.lane.b32.xlu0 %v6686_v11, %s8478_s26 }
  0x2d   :  { %482 = vrot.lane.b32.xlu1 %v6694_v12, %s8478_s26 }
  0x2f   :  { %5931 = vmatmul.mubr.bf16.vlgmr.msra.gmra.mrb[0].mxu0 %v6245_v18 }
  0x30   :  { %504 = vrot.lane.b32.xlu0 %v6686_v11, %s8476_s30  ;;  %5936 = vmatprep.mubr.msk.bf16.mxu0 %vm208_vm12, %v5010_v32 }
  0x31   :  { %506 = vrot.lane.b32.xlu1 %v6694_v12, %s8476_s30 }
  0x34   :  { %528 = vrot.lane.b32.xlu0 %v6686_v11, %s8466_s18 }
  0x35   :  { %530 = vrot.lane.b32.xlu1 %v6694_v12, %s8466_s18  ;;  %s8470_s18 = smov 114  }
  0x38   :  { %552 = vrot.lane.b32.xlu0 %v6686_v11, %s8474_s1 }
  0x39   :  { %554 = vrot.lane.b32.xlu1 %v6694_v12, %s8474_s1 }
  0x3c   :  { %576 = vrot.lane.b32.xlu0 %v6686_v11, %s8468_s22 }
  0x3d   :  { %578 = vrot.lane.b32.xlu1 %v6694_v12, %s8468_s22  ;;  %s8482_s22 = smov 113  }
  0x40   :  { %600 = vrot.lane.b32.xlu0 %v6686_v11, %s8472_s23 }
  0x41   :  { %602 = vrot.lane.b32.xlu1 %v6694_v12, %s8472_s23 }
  0x44   :  { %624 = vrot.lane.b32.xlu0 %v6686_v11, %s8470_s18 }
  0x45   :  { %626 = vrot.lane.b32.xlu1 %v6694_v12, %s8470_s18 }
  0x48   :  { %648 = vrot.lane.b32.xlu0 %v6686_v11, %s8482_s22 }
  0x49   :  { %650 = vrot.lane.b32.xlu1 %v6694_v12, %s8482_s22 }
  0x4c   :  { %297 = vperm.xlu0 %6235, %v6686_v11  }
  0x4d   :  { %300 = vperm.xlu1 %6236, %v6694_v12  }
  0x82   :  { %v313_v28 = vpop.permute.xlu0 %312 }
  0x83   :  { %v337_v29 = vpop.permute.xlu1 %336  ;;  %vm316_vm10 = vcmp.ne.s32.totalorder %v313_v28, 0 }
  0x84   :  { %vm340_vm11 = vcmp.ne.s32.totalorder %v337_v29, 0  ;;  %v318_v30 = vsel %vm316_vm10, 1, %v6548_v4 }
  0x85   :  { %321 = vperm.xlu1 %6236, %v318_v30   ;;  %v342_v34 = vsel %vm340_vm11, 1, %v6548_v4 }
  0x86   :  { %v315_v33 = vpop.permute.xlu0 %314 }
  0x87   :  { %v339_v35 = vpop.permute.xlu1 %338  ;;  %vm317_vm13 = vcmp.ne.s32.totalorder %v315_v33, 0 }
  0x88   :  { %vm341_vm14 = vcmp.ne.s32.totalorder %v339_v35, 0  ;;  %v319_v36 = vsel %vm317_vm13, 1, %v6548_v4 }
  0x89   :  { %v343_v37 = vsel %vm341_vm14, 1, %v6548_v4  ;;  %345 = vperm.xlu1 %6236, %v342_v34   ;;  %324 = vperm.xlu0 %6235, %v319_v36  }
  0x8a   :  { %v361_v38 = vpop.permute.xlu0 %360 }
  0x8b   :  { %v363_v39 = vpop.permute.xlu1 %362  ;;  %vm364_vm15 = vcmp.ne.s32.totalorder %v361_v38, 0 }
  0x8c   :  { %vm365_vm0 = vcmp.ne.s32.totalorder %v363_v39, 0  ;;  %v366_v40 = vsel %vm364_vm15, 1, %v6548_v4 }
  0x8d   :  { %v367_v41 = vsel %vm365_vm0, 1, %v6548_v4  ;;  %348 = vperm.xlu0 %6235, %v343_v37   ;;  %369 = vperm.xlu1 %6236, %v366_v40  }
  0x8e   :  { %v385_v42 = vpop.permute.xlu0 %384 }
  0x8f   :  { %v387_v43 = vpop.permute.xlu1 %386  ;;  %vm388_vm1 = vcmp.ne.s32.totalorder %v385_v42, 0 }
  0x90   :  { %vm389_vm2 = vcmp.ne.s32.totalorder %v387_v43, 0  ;;  %v390_v44 = vsel %vm388_vm1, 1, %v6548_v4 }
  0x91   :  { %v391_v45 = vsel %vm389_vm2, 1, %v6548_v4  ;;  %372 = vperm.xlu0 %6235, %v367_v41   ;;  %393 = vperm.xlu1 %6236, %v390_v44  }
  0x92   :  { %v409_v46 = vpop.permute.xlu0 %408 }
  0x93   :  { %v411_v47 = vpop.permute.xlu1 %410  ;;  %vm412_vm3 = vcmp.ne.s32.totalorder %v409_v46, 0 }
  0x94   :  { %vm413_vm5 = vcmp.ne.s32.totalorder %v411_v47, 0  ;;  %v414_v48 = vsel %vm412_vm3, 1, %v6548_v4 }
  0x95   :  { %v415_v49 = vsel %vm413_vm5, 1, %v6548_v4  ;;  %396 = vperm.xlu0 %6235, %v391_v45   ;;  %417 = vperm.xlu1 %6236, %v414_v48  }
  0x96   :  { %v433_v50 = vpop.permute.xlu0 %432 }
  0x97   :  { %v435_v51 = vpop.permute.xlu1 %434  ;;  %vm436_vm6 = vcmp.ne.s32.totalorder %v433_v50, 0 }
  0x98   :  { %vm437_vm7 = vcmp.ne.s32.totalorder %v435_v51, 0  ;;  %v438_v52 = vsel %vm436_vm6, 1, %v6548_v4 }
  0x99   :  { %v439_v53 = vsel %vm437_vm7, 1, %v6548_v4  ;;  %420 = vperm.xlu0 %6235, %v415_v49   ;;  %441 = vperm.xlu1 %6236, %v438_v52  }
  0x9a   :  { %v457_v54 = vpop.permute.xlu0 %456 }
  0x9b   :  { %v459_v55 = vpop.permute.xlu1 %458  ;;  %vm460_vm8 = vcmp.ne.s32.totalorder %v457_v54, 0 }
  0x9c   :  { %vm461_vm9 = vcmp.ne.s32.totalorder %v459_v55, 0  ;;  %v462_v56 = vsel %vm460_vm8, 1, %v6548_v4 }
  0x9d   :  { %v463_v57 = vsel %vm461_vm9, 1, %v6548_v4  ;;  %444 = vperm.xlu0 %6235, %v439_v53   ;;  %465 = vperm.xlu1 %6236, %v462_v56  }
  0x9e   :  { %v481_v58 = vpop.permute.xlu0 %480 }
  0x9f   :  { %v483_v59 = vpop.permute.xlu1 %482  ;;  %vm484_vm10 = vcmp.ne.s32.totalorder %v481_v58, 0 }
  0xa0   :  { %vm485_vm11 = vcmp.ne.s32.totalorder %v483_v59, 0  ;;  %v486_v60 = vsel %vm484_vm10, 1, %v6548_v4 }
  0xa1   :  { %v487_v61 = vsel %vm485_vm11, 1, %v6548_v4  ;;  %468 = vperm.xlu0 %6235, %v463_v57   ;;  %489 = vperm.xlu1 %6236, %v486_v60  }
  0xa2   :  { %v505_v62 = vpop.permute.xlu0 %504 }
  0xa3   :  { %v507_v63 = vpop.permute.xlu1 %506  ;;  %vm508_vm13 = vcmp.ne.s32.totalorder %v505_v62, 0 }
  0xa4   :  { %vm509_vm14 = vcmp.ne.s32.totalorder %v507_v63, 0  ;;  %v510_v0 = vsel %vm508_vm13, 1, %v6548_v4  ;;  %vm1287_vm13 = vcmp.ne.s32.totalorder %v1285_v22, 0 }
  0xa5   :  { %v511_v2 = vsel %vm509_vm14, 1, %v6548_v4  ;;  %492 = vperm.xlu0 %6235, %v487_v61   ;;  %513 = vperm.xlu1 %6236, %v510_v0  }
  0xa6   :  { %v529_v3 = vpop.permute.xlu0 %528 }
  0xa7   :  { %v531_v5 = vpop.permute.xlu1 %530  ;;  %vm532_vm15 = vcmp.ne.s32.totalorder %v529_v3, 0 }
  0xa8   :  { %vm533_vm0 = vcmp.ne.s32.totalorder %v531_v5, 0  ;;  %v534_v6 = vsel %vm532_vm15, 1, %v6548_v4 }
  0xa9   :  { %v535_v7 = vsel %vm533_vm0, 1, %v6548_v4  ;;  %516 = vperm.xlu0 %6235, %v511_v2   ;;  %537 = vperm.xlu1 %6236, %v534_v6  }
  0xaa   :  { %v553_v8 = vpop.permute.xlu0 %552 }
  0xab   :  { %v555_v9 = vpop.permute.xlu1 %554  ;;  %vm556_vm1 = vcmp.ne.s32.totalorder %v553_v8, 0 }
  0xac   :  { %vm557_vm2 = vcmp.ne.s32.totalorder %v555_v9, 0  ;;  %v558_v10 = vsel %vm556_vm1, 1, %v6548_v4 }
  0xad   :  { %v559_v11 = vsel %vm557_vm2, 1, %v6548_v4  ;;  %540 = vperm.xlu0 %6235, %v535_v7   ;;  %561 = vperm.xlu1 %6236, %v558_v10  }
  0xae   :  { %v577_v12 = vpop.permute.xlu0 %576 }
  0xaf   :  { %v579_v13 = vpop.permute.xlu1 %578  ;;  %vm580_vm3 = vcmp.ne.s32.totalorder %v577_v12, 0 }
  0xb0   :  { %vm581_vm5 = vcmp.ne.s32.totalorder %v579_v13, 0  ;;  %v582_v14 = vsel %vm580_vm3, 1, %v6548_v4 }
  0xb1   :  { %v583_v15 = vsel %vm581_vm5, 1, %v6548_v4  ;;  %564 = vperm.xlu0 %6235, %v559_v11   ;;  %585 = vperm.xlu1 %6236, %v582_v14  }
  0xb2   :  { %v601_v16 = vpop.permute.xlu0 %600 }
  0xb3   :  { %v603_v17 = vpop.permute.xlu1 %602  ;;  %vm604_vm6 = vcmp.ne.s32.totalorder %v601_v16, 0 }
  0xb4   :  { %vm605_vm7 = vcmp.ne.s32.totalorder %v603_v17, 0  ;;  %v606_v18 = vsel %vm604_vm6, 1, %v6548_v4 }
  0xb5   :  { %v607_v19 = vsel %vm605_vm7, 1, %v6548_v4  ;;  %588 = vperm.xlu0 %6235, %v583_v15   ;;  %609 = vperm.xlu1 %6236, %v606_v18  }
  0xb6   :  { %v625_v20 = vpop.permute.xlu0 %624 }
  0xb7   :  { %v627_v21 = vpop.permute.xlu1 %626  ;;  %vm628_vm8 = vcmp.ne.s32.totalorder %v625_v20, 0 }
  0xb8   :  { %vm629_vm9 = vcmp.ne.s32.totalorder %v627_v21, 0  ;;  %v630_v23 = vsel %vm628_vm8, 1, %v6548_v4 }
  0xb9   :  { %v631_v28 = vsel %vm629_vm9, 1, %v6548_v4  ;;  %612 = vperm.xlu0 %6235, %v607_v19   ;;  %633 = vperm.xlu1 %6236, %v630_v23  }
  0xba   :  { %v649_v29 = vpop.permute.xlu0 %648 }
  0xbb   :  { %v651_v30 = vpop.permute.xlu1 %650  ;;  %vm652_vm10 = vcmp.ne.s32.totalorder %v649_v29, 0 }
  0xbc   :  { %vm653_vm11 = vcmp.ne.s32.totalorder %v651_v30, 0  ;;  %v654_v32 = vsel %vm652_vm10, 1, %v6548_v4 }
  0xbd   :  { %v655_v33 = vsel %vm653_vm11, 1, %v6548_v4  ;;  %636 = vperm.xlu0 %6235, %v631_v28   ;;  %657 = vperm.xlu1 %6236, %v654_v32  }
  0xc1   :  { %660 = vperm.xlu0 %6235, %v655_v33   ;;  %679 = vperm.xlu1 %6236, %v6795_v25  }
  0xc5   :  { %682 = vperm.xlu0 %6235, %v6798_v26   ;;  %1302 = vrot.lane.b32.xlu1 %v6801_v27, %s8494_s20 }
  0xc6   :  { %23 = vsyncpa [#allocation5], 0  ;;  %v1289_v31 = vsel %vm1287_vm13, 1, %v6548_v4  ;;  %s8512_s30 = smov 119   ;;  %s8513_s18 = smov 118   ;;  %v304_v40 = vlaneseq  ;;  %v6247_v42 = vld [vmem:[%s8450_s3 + $0x8] sm:$0xff]  }
  0xc7   :  { %s8514_s1 = smov 117   ;;  %s8515_s23 = smov 116   ;;  %v5000_v25 = vld [vmem:[%s8449_s2] ss:$0 sm:$0xff]  ;;  %v6253_v52 = vld [vmem:[%s8454_s7 + $0x48] sm:$0xff]   ;;  %v6249_v54 = vld [vmem:[%s8450_s3 + $0x18] sm:$0xff]  }
  0xc8   :  { %s8516_s24 = smov 115   ;;  %s8517_s25 = smov 114   ;;  %v6905_v43 = vshrl.u32 %v304_v40, 7  ;;  %v6250_v47 = vld [vmem:[%s8454_s7 + $0x40] sm:$0xff]   ;;  %v6254_v53 = vld [vmem:[%s8454_s7 + $0x8] sm:$0xff]  }
  0xc9   :  { %1304 = vrot.lane.b32.xlu0 %v1289_v31, %s8494_s20  ;;  %1322 = vrot.lane.b32.xlu1 %v6801_v27, %s8492_s21  ;;  %v6251_v48 = vld [vmem:[%s8454_s7] sm:$0xff]   ;;  %s8520_s20 = smov 125   ;;  %s8524_s2 = smov 121  }
  0xca   :  { %v6252_v49 = vld [vmem:[%s8454_s7 + $0x80] sm:$0xff]   ;;  %v6924_v50 = vsub.s32 0, %v6905_v43  ;;  %5612 = vmatprep.subr.bf16.mxu1 %v6250_v47  ;;  %v6942_v56 = vsub.s32 1, %v6905_v43  ;;  %v6945_v59 = vsub.s32 2, %v6905_v43  ;;  %v6954_v62 = vsub.s32 3, %v6905_v43  ;;  %s8529_s14 = sld [smem:[#allocation11_spill]] }
  0xcb   :  { %v298_v44 = vpop.permute.xlu0 %297  ;;  %5613 = vmatpush3.bf16.msra.mxu1 %v6251_v48  ;;  %v6964_v5 = vsub.s32 4, %v6905_v43  ;;  %v6973_v10 = vsub.s32 5, %v6905_v43  ;;  %v6982_v17 = vsub.s32 6, %v6905_v43  ;;  %v6991_v29 = vsub.s32 7, %v6905_v43 }
  0xcc   :  { %v301_v35 = vpop.permute.xlu1 %300  ;;  %5614 = vmatprep.subr.bf16.mxu1 %v6253_v52  ;;  %vm302_vm14 = vcmp.eq.s32.totalorder %v298_v44, 1 }
  0xcd   :  { %1324 = vrot.lane.b32.xlu0 %v1289_v31, %s8492_s21  ;;  %1342 = vrot.lane.b32.xlu1 %v6801_v27, %s8490_s27  ;;  %vm303_vm0 = vcmp.eq.s32.totalorder %v301_v35, 1  ;;  %s8518_s21 = smov 127  }
  0xcf   :  { %5615 = vmatpush3.bf16.msra.mxu1 %v6254_v53 }
  0xd1   :  { %1344 = vrot.lane.b32.xlu0 %v1289_v31, %s8490_s27  ;;  %1362 = vrot.lane.b32.xlu1 %v6801_v27, %s8488_s0  ;;  %s8522_s27 = smov 123  }
  0xd5   :  { %1364 = vrot.lane.b32.xlu0 %v1289_v31, %s8488_s0  ;;  %1382 = vrot.lane.b32.xlu1 %v6801_v27, %s8486_s19  ;;  %s8523_s0 = smov 122  }
  0xd9   :  { %1384 = vrot.lane.b32.xlu0 %v1289_v31, %s8486_s19  ;;  %1402 = vrot.lane.b32.xlu1 %v6801_v27, %s8484_s28  ;;  %s8519_s19 = smov 126  }
  0xdd   :  { %1404 = vrot.lane.b32.xlu0 %v1289_v31, %s8484_s28  ;;  %1422 = vrot.lane.b32.xlu1 %v6801_v27, %s8480_s29  ;;  %s8521_s28 = smov 124  }
  0xe1   :  { %1424 = vrot.lane.b32.xlu0 %v1289_v31, %s8480_s29  ;;  %1442 = vrot.lane.b32.xlu1 %v6801_v27, %s8478_s26  ;;  %s8525_s29 = smov 120  }
  0xe5   :  { %1444 = vrot.lane.b32.xlu0 %v1289_v31, %s8478_s26  ;;  %1462 = vrot.lane.b32.xlu1 %v6801_v27, %s8512_s30 }
  0xe9   :  { %1464 = vrot.lane.b32.xlu0 %v1289_v31, %s8512_s30  ;;  %1482 = vrot.lane.b32.xlu1 %v6801_v27, %s8513_s18 }
  0xed   :  { %1484 = vrot.lane.b32.xlu0 %v1289_v31, %s8513_s18  ;;  %1502 = vrot.lane.b32.xlu1 %v6801_v27, %s8514_s1 }
  0xf1   :  { %1504 = vrot.lane.b32.xlu0 %v1289_v31, %s8514_s1  ;;  %1522 = vrot.lane.b32.xlu1 %v6801_v27, %s8515_s23 }
  0xf5   :  { %1524 = vrot.lane.b32.xlu0 %v1289_v31, %s8515_s23  ;;  %1542 = vrot.lane.b32.xlu1 %v6801_v27, %s8516_s24 }
  0xf9   :  { %1544 = vrot.lane.b32.xlu0 %v1289_v31, %s8516_s24  ;;  %1562 = vrot.lane.b32.xlu1 %v6801_v27, %s8517_s25 }
  0xfd   :  { %1564 = vrot.lane.b32.xlu0 %v1289_v31, %s8517_s25  ;;  %1582 = vrot.lane.b32.xlu1 %v6801_v27, %s8482_s22 }
 0x101   :  { %1584 = vrot.lane.b32.xlu0 %v1289_v31, %s8482_s22  ;;  %1291 = vperm.xlu1 %6236, %v6801_v27   ;;  %v6522_v27 = vld [vmem:[%s8450_s3 + $0x10] sm:$0xf]  ;;  %s8526_s22 = smov 113  }
 0x102   :  { %v172_v26 = vpop.f32.mrb[0].mxu0  ;;  %v5012_v46 = vcombine.low %v6522_v27, %v6792_v24 }
 0x103   :  { %v5932_v34 = vpop.f32.mrb[1].mxu0  ;;  %v6891_v37 = vadd.f32 %v5000_v25, %v172_v26 }
 0x104   :  { %v175_v36 = vpop.f32.mrb[2].mxu0  ;;  %v322_v45 = vpop.permute.xlu1 %321 }
 0x105   :  { %v6893_v38 = vadd.f32 %v5000_v25, %v175_v36  ;;  %v5933_v39 = vpop.f32.mrb[3].mxu0  ;;  %1294 = vperm.xlu0 %6235, %v1289_v31   ;;  %v6939_v55 = vrot.slane %v6891_v37, %v6924_v50  ;;  %vm326_vm15 = vcmp.eq.s32.totalorder %v322_v45, 1  ;;  %v6951_v61 = vrot.slane %v6891_v37, %v6942_v56 }
 0x106   :  { %v6961_v3 = vrot.slane %v6891_v37, %v6945_v59  ;;  %v6970_v9 = vrot.slane %v6891_v37, %v6954_v62  ;;  %v6979_v16 = vrot.slane %v6891_v37, %v6964_v5  ;;  %v6988_v22 = vrot.slane %v6891_v37, %v6973_v10 }
 0x107   :  { %v6899_v41 = vpack.c.bf16 %v6893_v38, %v6891_v37  ;;  %v308_v60 = vsel %vm302_vm14, %v6939_v55, -3e+38  ;;  %v332_v2 = vsel %vm326_vm15, %v6951_v61, -3e+38  ;;  %v309_v7 = vsel %vm303_vm0, %v6939_v55, -3e+38 }
 0x108   :  { %v346_v24 = vpop.permute.xlu1 %345  ;;  %v325_v51 = vpop.permute.xlu0 %324  ;;  %v310_v6 = vmax.f32 %v308_v60, -3e+38  ;;  %v311_v18 = vmax.f32 %v309_v7, -3e+38  ;;  %v6997_v25 = vrot.slane %v6891_v37, %v6982_v17  ;;  %v7003_v40 = vrot.slane %v6891_v37, %v6991_v29 }
 0x109   :  { %5934 = vmatprep.subr.bf16.mxu0 %v6899_v41  ;;  %vm350_vm1 = vcmp.eq.s32.totalorder %v346_v24, 1  ;;  %vm327_vm2 = vcmp.eq.s32.totalorder %v325_v51, 1  ;;  %v7010_v24 = vrot.slane %v6893_v38, %v6924_v50 }
 0x10a   :  { %5935 = vmatpush3.bf16.msra.mxu0 %v6899_v41  ;;  %v356_v8 = vsel %vm350_vm1, %v6961_v3, -3e+38  ;;  %v334_v13 = vmax.f32 %v310_v6, %v332_v2  ;;  %v333_v14 = vsel %vm327_vm2, %v6951_v61, -3e+38 }
 0x10b   :  { %5944 = vmatprep.subr.bf16.mxu0 %v6547_v1  ;;  %v335_v30 = vmax.f32 %v311_v18, %v333_v14 }
 0x10c   :  { %v370_v57 = vpop.permute.xlu1 %369  ;;  %v349_v58 = vpop.permute.xlu0 %348  ;;  %v358_v19 = vmax.f32 %v334_v13, %v356_v8  ;;  %v7022_v13 = vrot.slane %v6893_v38, %v6945_v59 }
 0x10d   :  { %5937 = vmatmul.mubr.msk.bf16.vlgmr.msra.gmra.mrb[4].mxu0 %vm208_vm12, %v6247_v42  ;;  %vm374_vm3 = vcmp.eq.s32.totalorder %v370_v57, 1  ;;  %vm351_vm5 = vcmp.eq.s32.totalorder %v349_v58, 1 }
 0x10e   :  { %5940 = vmatprep.mubr.msk.bf16.mxu0 %vm208_vm12, %v5012_v46  ;;  %5945 = vmatpush3.bf16.msra.mxu0 %v6252_v49  ;;  %v380_v15 = vsel %vm374_vm3, %v6970_v9, -3e+38  ;;  %v357_v20 = vsel %vm351_vm5, %v6961_v3, -3e+38 }
 0x10f   :  { %5946 = vmatprep.subr.bf16.mxu0 %v6547_v1  ;;  %v382_v32 = vmax.f32 %v358_v19, %v380_v15  ;;  %v359_v26 = vmax.f32 %v335_v30, %v357_v20 }
 0x110   :  { %v394_v63 = vpop.permute.xlu1 %393  ;;  %v373_v0 = vpop.permute.xlu0 %372 }
 0x111   :  { %vm398_vm6 = vcmp.eq.s32.totalorder %v394_v63, 1  ;;  %vm375_vm7 = vcmp.eq.s32.totalorder %v373_v0, 1  ;;  %v7016_v63 = vrot.slane %v6893_v38, %v6942_v56 }
 0x112   :  { %v404_v21 = vsel %vm398_vm6, %v6979_v16, -3e+38  ;;  %v381_v33 = vsel %vm375_vm7, %v6970_v9, -3e+38 }
 0x113   :  { %v406_v34 = vmax.f32 %v382_v32, %v404_v21  ;;  %v383_v43 = vmax.f32 %v359_v26, %v381_v33 }
 0x114   :  { %v418_v11 = vpop.permute.xlu1 %417  ;;  %v397_v12 = vpop.permute.xlu0 %396 }
 0x115   :  { %5941 = vmatmul.mubr.msk.bf16.gmra.mrb[8].mxu0 %vm208_vm12, %v6249_v54  ;;  %vm422_vm8 = vcmp.eq.s32.totalorder %v418_v11, 1  ;;  %vm399_vm9 = vcmp.eq.s32.totalorder %v397_v12, 1 }
 0x116   :  { %5960 = vmatprep.mubr.msk.bf16.mxu0 %vm6551_vm4, %v6547_v1  ;;  %v428_v31 = vsel %vm422_vm8, %v6988_v22, -3e+38  ;;  %v405_v35 = vsel %vm399_vm9, %v6979_v16, -3e+38 }
 0x117   :  { %v430_v44 = vmax.f32 %v406_v34, %v428_v31  ;;  %v407_v46 = vmax.f32 %v383_v43, %v405_v35  ;;  %v7034_v34 = vrot.slane %v6893_v38, %v6964_v5 }
 0x118   :  { %v442_v23 = vpop.permute.xlu1 %441  ;;  %v421_v28 = vpop.permute.xlu0 %420 }
 0x119   :  { %vm446_vm10 = vcmp.eq.s32.totalorder %v442_v23, 1  ;;  %vm423_vm11 = vcmp.eq.s32.totalorder %v421_v28, 1  ;;  %v7028_v23 = vrot.slane %v6893_v38, %v6954_v62 }
 0x11a   :  { %v452_v36 = vsel %vm446_vm10, %v6997_v25, -3e+38  ;;  %v429_v45 = vsel %vm423_vm11, %v6988_v22, -3e+38 }
 0x11b   :  { %v454_v47 = vmax.f32 %v430_v44, %v452_v36  ;;  %v431_v51 = vmax.f32 %v407_v46, %v429_v45  ;;  %v7040_v45 = vrot.slane %v6893_v38, %v6973_v10 }
 0x11c   :  { %v466_v39 = vpop.permute.xlu1 %465  ;;  %v445_v42 = vpop.permute.xlu0 %444 }
 0x11d   :  { %vm470_vm13 = vcmp.eq.s32.totalorder %v466_v39, 1  ;;  %vm447_vm14 = vcmp.eq.s32.totalorder %v445_v42, 1 }
 0x11e   :  { %v476_v27 = vsel %vm470_vm13, %v7003_v40, -3e+38  ;;  %v453_v48 = vsel %vm447_vm14, %v6997_v25, -3e+38 }
 0x11f   :  { %v478_v52 = vmax.f32 %v454_v47, %v476_v27  ;;  %v455_v57 = vmax.f32 %v431_v51, %v453_v48  ;;  %v7046_v51 = vrot.slane %v6893_v38, %v6982_v17 }
 0x120   :  { %v490_v49 = vpop.permute.xlu1 %489  ;;  %v469_v37 = vpop.permute.xlu0 %468 }
 0x121   :  { %vm494_vm15 = vcmp.eq.s32.totalorder %v490_v49, 1  ;;  %vm471_vm0 = vcmp.eq.s32.totalorder %v469_v37, 1 }
 0x122   :  { %v500_v53 = vsel %vm494_vm15, %v7010_v24, -3e+38  ;;  %v477_v54 = vsel %vm471_vm0, %v7003_v40, -3e+38 }
 0x123   :  { %v502_v58 = vmax.f32 %v478_v52, %v500_v53  ;;  %v479_v2 = vmax.f32 %v455_v57, %v477_v54 }
 0x124   :  { %v514_v60 = vpop.permute.xlu1 %513  ;;  %v493_v0 = vpop.permute.xlu0 %492 }
 0x125   :  { %vm518_vm1 = vcmp.eq.s32.totalorder %v514_v60, 1  ;;  %vm495_vm2 = vcmp.eq.s32.totalorder %v493_v0, 1  ;;  %v7052_v0 = vrot.slane %v6893_v38, %v6991_v29 }
 0x126   :  { %v524_v6 = vsel %vm518_vm1, %v7016_v63, -3e+38  ;;  %v501_v7 = vsel %vm495_vm2, %v7010_v24, -3e+38 }
 0x127   :  { %v526_v8 = vmax.f32 %v502_v58, %v524_v6  ;;  %v503_v11 = vmax.f32 %v479_v2, %v501_v7 }
 0x128   :  { %v538_v12 = vpop.permute.xlu1 %537  ;;  %v517_v14 = vpop.permute.xlu0 %516 }
 0x129   :  { %vm542_vm3 = vcmp.eq.s32.totalorder %v538_v12, 1  ;;  %vm519_vm5 = vcmp.eq.s32.totalorder %v517_v14, 1 }
 0x12a   :  { %v548_v15 = vsel %vm542_vm3, %v7022_v13, -3e+38  ;;  %v525_v18 = vsel %vm519_vm5, %v7016_v63, -3e+38 }
 0x12b   :  { %v550_v19 = vmax.f32 %v526_v8, %v548_v15  ;;  %v527_v20 = vmax.f32 %v503_v11, %v525_v18 }
 0x12c   :  { %v562_v21 = vpop.permute.xlu1 %561  ;;  %v541_v28 = vpop.permute.xlu0 %540 }
 0x12d   :  { %vm566_vm6 = vcmp.eq.s32.totalorder %v562_v21, 1  ;;  %vm543_vm7 = vcmp.eq.s32.totalorder %v541_v28, 1  ;;  %v6255_v28 = vld [vmem:[%s8454_s7 + $0x88] sm:$0xff]  }
 0x12e   :  { %v572_v30 = vsel %vm566_vm6, %v7028_v23, -3e+38  ;;  %v549_v32 = vsel %vm543_vm7, %v7022_v13, -3e+38  ;;  %5947 = vmatpush3.bf16.msra.mxu0 %v6255_v28  ;;  %v6269_v28 = vld [vmem:[%s8454_s7 + $0x30] sm:$0xff]  }
 0x12f   :  { %v574_v33 = vmax.f32 %v550_v19, %v572_v30  ;;  %v551_v31 = vmax.f32 %v527_v20, %v549_v32  ;;  %5948 = vmatprep.subr.bf16.mxu0 %v6547_v1 }
 0x130   :  { %v586_v26 = vpop.permute.xlu1 %585  ;;  %v565_v35 = vpop.permute.xlu0 %564 }
 0x131   :  { %vm590_vm8 = vcmp.eq.s32.totalorder %v586_v26, 1  ;;  %vm567_vm9 = vcmp.eq.s32.totalorder %v565_v35, 1 }
 0x132   :  { %v596_v36 = vsel %vm590_vm8, %v7034_v34, -3e+38  ;;  %v573_v39 = vsel %vm567_vm9, %v7028_v23, -3e+38 }
 0x133   :  { %v598_v42 = vmax.f32 %v574_v33, %v596_v36  ;;  %v575_v43 = vmax.f32 %v551_v31, %v573_v39  ;;  %v6256_v33 = vld [vmem:[%s8454_s7 + $0x50] sm:$0xff]  }
 0x134   :  { %v610_v44 = vpop.permute.xlu1 %609  ;;  %v589_v27 = vpop.permute.xlu0 %588  ;;  %v6257_v31 = vld [vmem:[%s8454_s7 + $0x10] sm:$0xff]   ;;  %5616 = vmatprep.subr.bf16.mxu1 %v6256_v33 }
 0x135   :  { %vm614_vm10 = vcmp.eq.s32.totalorder %v610_v44, 1  ;;  %vm591_vm11 = vcmp.eq.s32.totalorder %v589_v27, 1  ;;  %v6258_v36 = vld [vmem:[%s8454_s7 + $0x90] sm:$0xff]   ;;  %5617 = vmatpush3.bf16.msra.mxu1 %v6257_v31  ;;  %v6260_v44 = vld [vmem:[%s8454_s7 + $0x18] sm:$0xff]  }
 0x136   :  { %v620_v46 = vsel %vm614_vm10, %v7040_v45, -3e+38  ;;  %v597_v47 = vsel %vm591_vm11, %v7034_v34, -3e+38  ;;  %5949 = vmatpush3.bf16.msra.mxu0 %v6258_v36  ;;  %v6270_v33 = vld [vmem:[%s8454_s7 + $0xb0] sm:$0xff]   ;;  %v6272_v36 = vld [vmem:[%s8454_s7 + $0x38] sm:$0xff]  }
 0x137   :  { %v622_v48 = vmax.f32 %v598_v42, %v620_v46  ;;  %v599_v49 = vmax.f32 %v575_v43, %v597_v47  ;;  %v6259_v43 = vld [vmem:[%s8454_s7 + $0x58] sm:$0xff]   ;;  %5950 = vmatprep.subr.bf16.mxu0 %v6547_v1 }
 0x138   :  { %v634_v37 = vpop.permute.xlu1 %633  ;;  %v613_v52 = vpop.permute.xlu0 %612  ;;  %5618 = vmatprep.subr.bf16.mxu1 %v6259_v43  ;;  %v6261_v47 = vld [vmem:[%s8454_s7 + $0x98] sm:$0xff]  }
 0x139   :  { %vm638_vm13 = vcmp.eq.s32.totalorder %v634_v37, 1  ;;  %vm615_vm14 = vcmp.eq.s32.totalorder %v613_v52, 1  ;;  %5619 = vmatpush3.bf16.msra.mxu1 %v6260_v44  ;;  %v6262_v37 = vld [vmem:[%s8454_s7 + $0x60] sm:$0xff]   ;;  %v6273_v43 = vld [vmem:[%s8454_s7 + $0xb8] sm:$0xff]  }
 0x13a   :  { %v644_v53 = vsel %vm638_vm13, %v7046_v51, -3e+38  ;;  %v621_v54 = vsel %vm615_vm14, %v7040_v45, -3e+38  ;;  %5951 = vmatpush3.bf16.msra.mxu0 %v6261_v47  ;;  %v6263_v52 = vld [vmem:[%s8454_s7 + $0x20] sm:$0xff]   ;;  %5620 = vmatprep.subr.bf16.mxu1 %v6262_v37 }
 0x13b   :  { %v646_v57 = vmax.f32 %v622_v48, %v644_v53  ;;  %v623_v58 = vmax.f32 %v599_v49, %v621_v54  ;;  %5952 = vmatprep.subr.bf16.mxu0 %v6547_v1 }
 0x13c   :  { %v658_v60 = vpop.permute.xlu1 %657  ;;  %v637_v2 = vpop.permute.xlu0 %636 }
 0x13d   :  { %vm662_vm15 = vcmp.eq.s32.totalorder %v658_v60, 1  ;;  %vm639_vm0 = vcmp.eq.s32.totalorder %v637_v2, 1  ;;  %5621 = vmatpush3.bf16.msra.mxu1 %v6263_v52  ;;  %v6265_v2 = vld [vmem:[%s8454_s7 + $0x68] sm:$0xff]  }
 0x13e   :  { %v668_v6 = vsel %vm662_vm15, %v7052_v0, -3e+38  ;;  %v645_v7 = vsel %vm639_vm0, %v7046_v51, -3e+38  ;;  %5622 = vmatprep.subr.bf16.mxu1 %v6265_v2 }
 0x13f   :  { %v7056_v8 = vmax.f32 %v646_v57, %v668_v6  ;;  %v647_v11 = vmax.f32 %v623_v58, %v645_v7  ;;  %v6264_v57 = vld [vmem:[%s8454_s7 + $0xa0] sm:$0xff]   ;;  %v6266_v6 = vld [vmem:[%s8454_s7 + $0x28] sm:$0xff]  }
 0x140   :  { %v7058_v12 = vpop.permute.xlu1 %679  ;;  %v661_v14 = vpop.permute.xlu0 %660  ;;  %5953 = vmatpush3.bf16.msra.mxu0 %v6264_v57 }
 0x141   :  { %vm663_vm1 = vcmp.eq.s32.totalorder %v661_v14, 1  ;;  %5954 = vmatprep.subr.bf16.mxu0 %v6547_v1  ;;  %v6267_v14 = vld [vmem:[%s8454_s7 + $0xa8] sm:$0xff]   ;;  %5623 = vmatpush3.bf16.msra.mxu1 %v6266_v6 }
 0x142   :  { %v669_v15 = vsel %vm663_vm1, %v7052_v0, -3e+38 }
 0x143   :  { %v7061_v18 = vmax.f32 %v647_v11, %v669_v15 }
 0x144   :  { %v1303_v38 = vpop.permute.xlu1 %1302  ;;  %v7063_v19 = vpop.permute.xlu0 %682  ;;  %5955 = vmatpush3.bf16.msra.mxu0 %v6267_v14 }
 0x145   :  { %v5587_v20 = vpack.c.bf16 %v7061_v18, %v7056_v8  ;;  %vm1306_vm2 = vcmp.ne.s32.totalorder %v1303_v38, 0  ;;  %5956 = vmatprep.subr.bf16.mxu0 %v6547_v1 }
 0x146   :  { %v1308_v21 = vsel %vm1306_vm2, 1, %v6548_v4 }
 0x147   :  { %1311 = vperm.xlu1 %6236, %v1308_v21   ;;  %v6268_v21 = vld [vmem:[%s8454_s7 + $0x70] sm:$0xff]  }
 0x148   :  { %v1323_v30 = vpop.permute.xlu1 %1322  ;;  %v1305_v32 = vpop.permute.xlu0 %1304  ;;  %5624 = vmatprep.subr.bf16.mxu1 %v6268_v21  ;;  %5957 = vmatpush3.bf16.msra.mxu0 %v6270_v33 }
 0x149   :  { %vm1326_vm3 = vcmp.ne.s32.totalorder %v1323_v30, 0  ;;  %vm1307_vm5 = vcmp.ne.s32.totalorder %v1305_v32, 0  ;;  %5625 = vmatpush3.bf16.msra.mxu1 %v6269_v28  ;;  %5958 = vmatprep.subr.bf16.mxu0 %v6547_v1 }
 0x14a   :  { %v1328_v26 = vsel %vm1326_vm3, 1, %v6548_v4  ;;  %v1309_v35 = vsel %vm1307_vm5, 1, %v6548_v4 }
 0x14b   :  { %1331 = vperm.xlu1 %6236, %v1328_v26   ;;  %1314 = vperm.xlu0 %6235, %v1309_v35   ;;  %v6271_v35 = vld [vmem:[%s8454_s7 + $0x78] sm:$0xff]  }
 0x14c   :  { %v1343_v39 = vpop.permute.xlu1 %1342  ;;  %v1325_v42 = vpop.permute.xlu0 %1324  ;;  %5626 = vmatprep.subr.bf16.mxu1 %v6271_v35  ;;  %5959 = vmatpush3.bf16.msra.mxu0 %v6273_v43 }
 0x14d   :  { %vm1346_vm6 = vcmp.ne.s32.totalorder %v1343_v39, 0  ;;  %vm1327_vm7 = vcmp.ne.s32.totalorder %v1325_v42, 0  ;;  %5627 = vmatpush3.bf16.msra.mxu1 %v6272_v36  ;;  %v5069_v36 = vld [vmem:[%s8451_s4 + $0x10] sm:$0xff] }
 0x14e   :  { %v1348_v27 = vsel %vm1346_vm6, 1, %v6548_v4  ;;  %v1329_v46 = vsel %vm1327_vm7, 1, %v6548_v4  ;;  %5964 = vmatprep.subr.bf16.mxu1 %v6547_v1 }
 0x14f   :  { %1351 = vperm.xlu1 %6236, %v1348_v27   ;;  %1334 = vperm.xlu0 %6235, %v1329_v46  }
 0x150   :  { %v1363_v48 = vpop.permute.xlu1 %1362  ;;  %v1345_v49 = vpop.permute.xlu0 %1344 }
 0x151   :  { %vm1366_vm8 = vcmp.ne.s32.totalorder %v1363_v48, 0  ;;  %vm1347_vm9 = vcmp.ne.s32.totalorder %v1345_v49, 0 }
 0x152   :  { %v1368_v53 = vsel %vm1366_vm8, 1, %v6548_v4  ;;  %v1349_v54 = vsel %vm1347_vm9, 1, %v6548_v4 }
 0x153   :  { %1371 = vperm.xlu1 %6236, %v1368_v53   ;;  %1354 = vperm.xlu0 %6235, %v1349_v54  }
 0x154   :  { %v1383_v58 = vpop.permute.xlu1 %1382  ;;  %v1365_v60 = vpop.permute.xlu0 %1364 }
 0x155   :  { %vm1386_vm10 = vcmp.ne.s32.totalorder %v1383_v58, 0  ;;  %vm1367_vm11 = vcmp.ne.s32.totalorder %v1365_v60, 0 }
 0x156   :  { %v1388_v7 = vsel %vm1386_vm10, 1, %v6548_v4  ;;  %v1369_v11 = vsel %vm1367_vm11, 1, %v6548_v4 }
 0x157   :  { %1391 = vperm.xlu1 %6236, %v1388_v7   ;;  %1374 = vperm.xlu0 %6235, %v1369_v11  }
 0x158   :  { %v1403_v15 = vpop.permute.xlu1 %1402  ;;  %v1385_v38 = vpop.permute.xlu0 %1384 }
 0x159   :  { %vm1406_vm13 = vcmp.ne.s32.totalorder %v1403_v15, 0  ;;  %vm1387_vm14 = vcmp.ne.s32.totalorder %v1385_v38, 0 }
 0x15a   :  { %v1408_v30 = vsel %vm1406_vm13, 1, %v6548_v4  ;;  %v1389_v32 = vsel %vm1387_vm14, 1, %v6548_v4 }
 0x15b   :  { %1411 = vperm.xlu1 %6236, %v1408_v30   ;;  %1394 = vperm.xlu0 %6235, %v1389_v32  }
 0x15c   :  { %v1423_v31 = vpop.permute.xlu1 %1422  ;;  %v1405_v26 = vpop.permute.xlu0 %1404 }
 0x15d   :  { %vm1426_vm15 = vcmp.ne.s32.totalorder %v1423_v31, 0  ;;  %vm1407_vm0 = vcmp.ne.s32.totalorder %v1405_v26, 0 }
 0x15e   :  { %v1428_v39 = vsel %vm1426_vm15, 1, %v6548_v4  ;;  %v1409_v42 = vsel %vm1407_vm0, 1, %v6548_v4 }
 0x15f   :  { %1431 = vperm.xlu1 %6236, %v1428_v39   ;;  %1414 = vperm.xlu0 %6235, %v1409_v42  }
 0x160   :  { %v1443_v44 = vpop.permute.xlu1 %1442  ;;  %v1425_v27 = vpop.permute.xlu0 %1424 }
 0x161   :  { %vm1446_vm1 = vcmp.ne.s32.totalorder %v1443_v44, 0  ;;  %vm1427_vm2 = vcmp.ne.s32.totalorder %v1425_v27, 0  ;;  %v5070_v27 = vld [vmem:[%s8451_s4 + $0x18] sm:$0xff] }
 0x162   :  { %v1448_v46 = vsel %vm1446_vm1, 1, %v6548_v4  ;;  %v1429_v47 = vsel %vm1427_vm2, 1, %v6548_v4 }
 0x163   :  { %1451 = vperm.xlu1 %6236, %v1448_v46   ;;  %1434 = vperm.xlu0 %6235, %v1429_v47  }
 0x164   :  { %v1463_v48 = vpop.permute.xlu1 %1462  ;;  %v1445_v49 = vpop.permute.xlu0 %1444 }
 0x165   :  { %vm1466_vm3 = vcmp.ne.s32.totalorder %v1463_v48, 0  ;;  %vm1447_vm5 = vcmp.ne.s32.totalorder %v1445_v49, 0 }
 0x166   :  { %v1468_v37 = vsel %vm1466_vm3, 1, %v6548_v4  ;;  %v1449_v52 = vsel %vm1447_vm5, 1, %v6548_v4  ;;  %vm1605_vm3 = vcmp.gt.f32.partialorder %v5069_v36, 0.0 }
 0x167   :  { %1471 = vperm.xlu1 %6236, %v1468_v37   ;;  %1454 = vperm.xlu0 %6235, %v1449_v52   ;;  %v1607_v47 = vsel %vm1605_vm3, 1, %v6548_v4 }
 0x168   :  { %v1483_v53 = vpop.permute.xlu1 %1482  ;;  %v1465_v54 = vpop.permute.xlu0 %1464 }
 0x169   :  { %vm1486_vm6 = vcmp.ne.s32.totalorder %v1483_v53, 0  ;;  %vm1467_vm7 = vcmp.ne.s32.totalorder %v1465_v54, 0 }
 0x16a   :  { %v1488_v57 = vsel %vm1486_vm6, 1, %v6548_v4  ;;  %v1469_v58 = vsel %vm1467_vm7, 1, %v6548_v4  ;;  %vm1606_vm6 = vcmp.gt.f32.partialorder %v5070_v27, 0.0 }
 0x16b   :  { %1491 = vperm.xlu1 %6236, %v1488_v57   ;;  %1474 = vperm.xlu0 %6235, %v1469_v58   ;;  %v1608_v49 = vsel %vm1606_vm6, 1, %v6548_v4  ;;  %vm684_vm6 = vcmp.eq.s32.totalorder %v7058_v12, 1 }
 0x16c   :  { %v1503_v60 = vpop.permute.xlu1 %1502  ;;  %v1485_v2 = vpop.permute.xlu0 %1484 }
 0x16d   :  { %vm1506_vm8 = vcmp.ne.s32.totalorder %v1503_v60, 0  ;;  %vm1487_vm9 = vcmp.ne.s32.totalorder %v1485_v2, 0 }
 0x16e   :  { %v1508_v6 = vsel %vm1506_vm8, 1, %v6548_v4  ;;  %v1489_v7 = vsel %vm1487_vm9, 1, %v6548_v4 }
 0x16f   :  { %1511 = vperm.xlu1 %6236, %v1508_v6   ;;  %1494 = vperm.xlu0 %6235, %v1489_v7  }
 0x170   :  { %v1523_v11 = vpop.permute.xlu1 %1522  ;;  %v1505_v14 = vpop.permute.xlu0 %1504 }
 0x171   :  { %vm1526_vm10 = vcmp.ne.s32.totalorder %v1523_v11, 0  ;;  %vm1507_vm11 = vcmp.ne.s32.totalorder %v1505_v14, 0 }
 0x172   :  { %v1528_v15 = vsel %vm1526_vm10, 1, %v6548_v4  ;;  %v1509_v38 = vsel %vm1507_vm11, 1, %v6548_v4 }
 0x173   :  { %1531 = vperm.xlu1 %6236, %v1528_v15   ;;  %1514 = vperm.xlu0 %6235, %v1509_v38  }
 0x174   :  { %v1543_v21 = vpop.permute.xlu1 %1542  ;;  %v1525_v28 = vpop.permute.xlu0 %1524 }
 0x175   :  { %vm1546_vm13 = vcmp.ne.s32.totalorder %v1543_v21, 0  ;;  %vm1527_vm14 = vcmp.ne.s32.totalorder %v1525_v28, 0 }
 0x176   :  { %v1548_v30 = vsel %vm1546_vm13, 1, %v6548_v4  ;;  %v1529_v32 = vsel %vm1527_vm14, 1, %v6548_v4 }
 0x177   :  { %1551 = vperm.xlu1 %6236, %v1548_v30   ;;  %1534 = vperm.xlu0 %6235, %v1529_v32  }
 0x178   :  { %v1563_v33 = vpop.permute.xlu1 %1562  ;;  %v1545_v31 = vpop.permute.xlu0 %1544 }
 0x179   :  { %vm1566_vm15 = vcmp.ne.s32.totalorder %v1563_v33, 0  ;;  %vm1547_vm0 = vcmp.ne.s32.totalorder %v1545_v31, 0 }
 0x17a   :  { %v1568_v26 = vsel %vm1566_vm15, 1, %v6548_v4  ;;  %v1549_v35 = vsel %vm1547_vm0, 1, %v6548_v4 }
 0x17b   :  { %1571 = vperm.xlu1 %6236, %v1568_v26   ;;  %1554 = vperm.xlu0 %6235, %v1549_v35  }
 0x17c   :  { %v1583_v39 = vpop.permute.xlu1 %1582  ;;  %v1565_v42 = vpop.permute.xlu0 %1564 }
 0x17d   :  { %vm1586_vm1 = vcmp.ne.s32.totalorder %v1583_v39, 0  ;;  %vm1567_vm2 = vcmp.ne.s32.totalorder %v1565_v42, 0 }
 0x17e   :  { %v1588_v43 = vsel %vm1586_vm1, 1, %v6548_v4  ;;  %v1569_v44 = vsel %vm1567_vm2, 1, %v6548_v4 }
 0x17f   :  { %1591 = vperm.xlu1 %6236, %v1588_v43   ;;  %1574 = vperm.xlu0 %6235, %v1569_v44  }
 0x180   :  { %v1585_v46 = vpop.permute.xlu0 %1584  ;;  %v1292_v37 = vpop.permute.xlu1 %1291 }
 0x181   :  { %vm1587_vm5 = vcmp.ne.s32.totalorder %v1585_v46, 0  ;;  %vm1296_vm7 = vcmp.eq.s32.totalorder %v1292_v37, 1 }
 0x182   :  { %v1589_v48 = vsel %vm1587_vm5, 1, %v6548_v4  ;;  %v1298_v53 = vsel %vm1296_vm7, %v6939_v55, -3e+38  ;;  %vm685_vm7 = vcmp.eq.s32.totalorder %v7063_v19, 1 }
 0x183   :  { %1610 = vperm.xlu1 %6236, %v1607_v47   ;;  %1594 = vperm.xlu0 %6235, %v1589_v48   ;;  %v1300_v57 = vmax.f32 %v1298_v53, -3e+38 }
 0x184   :  { %v1295_v52 = vpop.permute.xlu0 %1294 }
 0x185   :  { %vm1297_vm8 = vcmp.eq.s32.totalorder %v1295_v52, 1 }
 0x186   :  { %v1299_v58 = vsel %vm1297_vm8, %v6939_v55, -3e+38 }
 0x187   :  { %1613 = vperm.xlu0 %6235, %v1608_v49   ;;  %v1301_v11 = vmax.f32 %v1299_v58, -3e+38 }
 0x1c6   :  { %v1312_v54 = vpop.permute.xlu1 %1311 }
 0x1c7   :  { %vm1316_vm9 = vcmp.eq.s32.totalorder %v1312_v54, 1 }
 0x1c8   :  { %v1318_v60 = vsel %vm1316_vm9, %v6951_v61, -3e+38 }
 0x1c9   :  { %v1320_v2 = vmax.f32 %v1300_v57, %v1318_v60 }
 0x1ca   :  { %v1332_v6 = vpop.permute.xlu1 %1331  ;;  %v1315_v7 = vpop.permute.xlu0 %1314 }
 0x1cb   :  { %vm1336_vm10 = vcmp.eq.s32.totalorder %v1332_v6, 1  ;;  %vm1317_vm11 = vcmp.eq.s32.totalorder %v1315_v7, 1  ;;  %v6274_v6 = vld [vmem:[%s8452_s5] sm:$0xff]  }
 0x1cc   :  { %v1338_v14 = vsel %vm1336_vm10, %v6961_v3, -3e+38  ;;  %v1319_v15 = vsel %vm1317_vm11, %v6951_v61, -3e+38  ;;  %vm5586_vm10 = vmpackc.low %vm685_vm7, %vm684_vm6 }
 0x1cd   :  { %v1340_v38 = vmax.f32 %v1320_v2, %v1338_v14  ;;  %v1321_v21 = vmax.f32 %v1301_v11, %v1319_v15 }
 0x1ce   :  { %v1352_v28 = vpop.permute.xlu1 %1351  ;;  %v1335_v30 = vpop.permute.xlu0 %1334 }
 0x1cf   :  { %vm1356_vm13 = vcmp.eq.s32.totalorder %v1352_v28, 1  ;;  %vm1337_vm14 = vcmp.eq.s32.totalorder %v1335_v30, 1 }
 0x1d0   :  { %v1358_v55 = vsel %vm1356_vm13, %v6970_v9, -3e+38  ;;  %v1339_v32 = vsel %vm1337_vm14, %v6961_v3, -3e+38 }
 0x1d1   :  { %v1360_v33 = vmax.f32 %v1340_v38, %v1358_v55  ;;  %v1341_v31 = vmax.f32 %v1321_v21, %v1339_v32  ;;  %v6275_v21 = vld [vmem:[%s8452_s5 + $0x8] sm:$0xff]  }
 0x1d2   :  { %v1372_v26 = vpop.permute.xlu1 %1371  ;;  %v1355_v35 = vpop.permute.xlu0 %1354 }
 0x1d3   :  { %vm1376_vm15 = vcmp.eq.s32.totalorder %v1372_v26, 1  ;;  %vm1357_vm0 = vcmp.eq.s32.totalorder %v1355_v35, 1 }
 0x1d4   :  { %v1378_v36 = vsel %vm1376_vm15, %v6979_v16, -3e+38  ;;  %v1359_v61 = vsel %vm1357_vm0, %v6970_v9, -3e+38 }
 0x1d5   :  { %v1380_v39 = vmax.f32 %v1360_v33, %v1378_v36  ;;  %v1361_v42 = vmax.f32 %v1341_v31, %v1359_v61  ;;  %v6276_v31 = vld [vmem:[%s8452_s5 + $0x10] sm:$0xff]  }
 0x1d6   :  { %v1392_v43 = vpop.permute.xlu1 %1391  ;;  %v1375_v44 = vpop.permute.xlu0 %1374 }
 0x1d7   :  { %vm1396_vm1 = vcmp.eq.s32.totalorder %v1392_v43, 1  ;;  %vm1377_vm2 = vcmp.eq.s32.totalorder %v1375_v44, 1 }
 0x1d8   :  { %v1398_v27 = vsel %vm1396_vm1, %v6988_v22, -3e+38  ;;  %v1379_v3 = vsel %vm1377_vm2, %v6979_v16, -3e+38 }
 0x1d9   :  { %v1400_v46 = vmax.f32 %v1380_v39, %v1398_v27  ;;  %v1381_v47 = vmax.f32 %v1361_v42, %v1379_v3  ;;  %v6277_v27 = vld [vmem:[%s8452_s5 + $0x18] sm:$0xff]  }
 0x1da   :  { %v1412_v48 = vpop.permute.xlu1 %1411  ;;  %v1395_v49 = vpop.permute.xlu0 %1394 }
 0x1db   :  { %vm1416_vm3 = vcmp.eq.s32.totalorder %v1412_v48, 1  ;;  %vm1397_vm5 = vcmp.eq.s32.totalorder %v1395_v49, 1 }
 0x1dc   :  { %v1418_v52 = vsel %vm1416_vm3, %v6997_v25, -3e+38  ;;  %v1399_v9 = vsel %vm1397_vm5, %v6988_v22, -3e+38 }
 0x1dd   :  { %v1420_v54 = vmax.f32 %v1400_v46, %v1418_v52  ;;  %v1401_v57 = vmax.f32 %v1381_v47, %v1399_v9 }
 0x1de   :  { %v1432_v16 = vpop.permute.xlu1 %1431  ;;  %v1415_v60 = vpop.permute.xlu0 %1414 }
 0x1df   :  { %vm1436_vm8 = vcmp.eq.s32.totalorder %v1432_v16, 1  ;;  %vm1417_vm9 = vcmp.eq.s32.totalorder %v1415_v60, 1 }
 0x1e0   :  { %v5938_v37 = vpop.f32.mrb[4].mxu0  ;;  %v1438_v22 = vsel %vm1436_vm8, %v7003_v40, -3e+38  ;;  %v1419_v12 = vsel %vm1417_vm9, %v6997_v25, -3e+38 }
 0x1e1   :  { %v255_v53 = vpop.f32.mrb[5].mxu0  ;;  %v1440_v19 = vmax.f32 %v1420_v54, %v1438_v22  ;;  %v1421_v14 = vmax.f32 %v1401_v57, %v1419_v12  ;;  %v6280_v22 = vld [vmem:[%s8452_s5 + $0x30] sm:$0xff]  }
 0x1e2   :  { %v5939_v58 = vpop.f32.mrb[6].mxu0  ;;  %v1452_v15 = vpop.permute.xlu1 %1451 }
 0x1e3   :  { %v690_v2 = vpack.c.bf16 %v5939_v58, %v5938_v37  ;;  %v258_v7 = vpop.f32.mrb[7].mxu0  ;;  %v1435_v38 = vpop.permute.xlu0 %1434  ;;  %vm1456_vm11 = vcmp.eq.s32.totalorder %v1452_v15, 1  ;;  %v6278_v37 = vld [vmem:[%s8452_s5 + $0x20] sm:$0xff]   ;;  %v6279_v58 = vld [vmem:[%s8452_s5 + $0x28] sm:$0xff]  }
 0x1e4   :  { %v692_v11 = vpack.c.bf16 %v258_v7, %v255_v53  ;;  %vm1437_vm13 = vcmp.eq.s32.totalorder %v1435_v38, 1  ;;  %v1458_v8 = vsel %vm1456_vm11, %v7010_v24, -3e+38  ;;  %v6281_v38 = vld [vmem:[%s8452_s5 + $0x38] sm:$0xff]  }
 0x1e5   :  { %928 = vmatprep.mubr.bf16.mxu1 %v690_v2  ;;  %v1439_v18 = vsel %vm1437_vm13, %v7003_v40, -3e+38  ;;  %v1460_v28 = vmax.f32 %v1440_v19, %v1458_v8 }
 0x1e6   :  { %5588 = vmatmul.mubr.msk.bf16.vlgmr.msra.gmra.mrb[0].mxu1 %vm5586_vm10, %v5587_v20  ;;  %5961 = vmatmul.mubr.bf16.vlgmr.msra.gmra.mrb[12].mxu0 %v692_v11  ;;  %v1441_v30 = vmax.f32 %v1421_v14, %v1439_v18  ;;  %v1472_v32 = vpop.permute.xlu1 %1471 }
 0x1e7   :  { %5965 = vmatpush3.bf16.msra.mxu1 %v6274_v6  ;;  %5980 = vmatprep.mubr.msk.bf16.mxu1 %vm6551_vm4, %v6547_v1  ;;  %v1455_v33 = vpop.permute.xlu0 %1454  ;;  %vm1476_vm14 = vcmp.eq.s32.totalorder %v1472_v32, 1 }
 0x1e8   :  { %5966 = vmatprep.subr.bf16.mxu1 %v6547_v1  ;;  %v7198_v25 = vpop.f32.mrb[8].mxu0  ;;  %vm1457_vm15 = vcmp.eq.s32.totalorder %v1455_v33, 1  ;;  %v1478_v35 = vsel %vm1476_vm14, %v7016_v63, -3e+38  ;;  %v6283_v33 = vld [vmem:[%s8454_s7 + $0xc0] sm:$0xff]  }
 0x1e9   :  { %v7202_v20 = vpop.f32.mrb[9].mxu0  ;;  %v1459_v36 = vsel %vm1457_vm15, %v7010_v24, -3e+38  ;;  %v1480_v39 = vmax.f32 %v1460_v28, %v1478_v35 }
 0x1ea   :  { %v7204_v55 = vpop.f32.mrb[10].mxu0  ;;  %v1461_v42 = vmax.f32 %v1441_v30, %v1459_v36  ;;  %v1492_v43 = vpop.permute.xlu1 %1491 }
 0x1eb   :  { %5967 = vmatpush3.bf16.msra.mxu1 %v6275_v21  ;;  %v1621_v26 = vpack.c.bf16 %v7204_v55, %v7198_v25  ;;  %v7212_v40 = vpop.f32.mrb[11].mxu0  ;;  %v1475_v44 = vpop.permute.xlu0 %1474  ;;  %vm1496_vm0 = vcmp.eq.s32.totalorder %v1492_v43, 1  ;;  %v6282_v21 = vld [vmem:[%s8454_s7 + $0x100] sm:$0xff]   ;;  %v6285_v43 = vld [vmem:[%s8454_s7 + $0xc8] sm:$0xff]   ;;  %v6288_v25 = vld [vmem:[%s8454_s7 + $0x118] sm:$0xff]  }
 0x1ec   :  { %5968 = vmatprep.subr.bf16.mxu1 %v6547_v1  ;;  %v1623_v61 = vpack.c.bf16 %v7212_v40, %v7202_v20  ;;  %vm1477_vm1 = vcmp.eq.s32.totalorder %v1475_v44, 1  ;;  %v1498_v3 = vsel %vm1496_vm0, %v7022_v13, -3e+38  ;;  %v6289_v55 = vld [vmem:[%s8454_s7 + $0xd8] sm:$0xff]   ;;  %v6331_v20 = vld [vmem:[%s8456_s9 + $0x80] sm:$0xff]   ;;  %v6332_v40 = vld [vmem:[%s8456_s9 + $0xc8] sm:$0xff]  }
 0x1ed   :  { %v1479_v24 = vsel %vm1477_vm1, %v7016_v63, -3e+38  ;;  %v1500_v46 = vmax.f32 %v1480_v39, %v1498_v3  ;;  %v6287_v3 = vld [vmem:[%s8454_s7 + $0xd0] sm:$0xff]  }
 0x1ee   :  { %v1481_v47 = vmax.f32 %v1461_v42, %v1479_v24  ;;  %v1512_v48 = vpop.permute.xlu1 %1511 }
 0x1ef   :  { %5969 = vmatpush3.bf16.msra.mxu1 %v6276_v31  ;;  %v1495_v49 = vpop.permute.xlu0 %1494  ;;  %vm1516_vm2 = vcmp.eq.s32.totalorder %v1512_v48, 1  ;;  %v6284_v31 = vld [vmem:[%s8454_s7 + $0x108] sm:$0xff]   ;;  %v6294_v48 = vld [vmem:[%s8454_s7 + $0x130] sm:$0xff]  }
 0x1f0   :  { %5970 = vmatprep.subr.bf16.mxu1 %v6547_v1  ;;  %vm1497_vm3 = vcmp.eq.s32.totalorder %v1495_v49, 1  ;;  %v1518_v52 = vsel %vm1516_vm2, %v7028_v23, -3e+38  ;;  %v6295_v49 = vld [vmem:[%s8454_s7 + $0xf0] sm:$0xff]   ;;  %vm2458_vm2 = vcmask 7168  }
 0x1f1   :  { %v1499_v9 = vsel %vm1497_vm3, %v7022_v13, -3e+38  ;;  %v1520_v53 = vmax.f32 %v1500_v46, %v1518_v52  ;;  %v6292_v46 = vld [vmem:[%s8454_s7 + $0x128] sm:$0xff]  }
 0x1f2   :  { %v1501_v54 = vmax.f32 %v1481_v47, %v1499_v9  ;;  %v1532_v63 = vpop.permute.xlu1 %1531  ;;  %v6293_v47 = vld [vmem:[%s8454_s7 + $0xe8] sm:$0xff]   ;;  %v6297_v9 = vld [vmem:[%s8454_s7 + $0xf8] sm:$0xff]  }
 0x1f3   :  { %5971 = vmatpush3.bf16.msra.mxu1 %v6277_v27  ;;  %v1515_v57 = vpop.permute.xlu0 %1514  ;;  %vm1536_vm5 = vcmp.eq.s32.totalorder %v1532_v63, 1  ;;  %v6299_v63 = vld [vmem:[%s8452_s5 + $0x48] sm:$0xff]  }
 0x1f4   :  { %5972 = vmatprep.subr.bf16.mxu1 %v6547_v1  ;;  %vm1517_vm6 = vcmp.eq.s32.totalorder %v1515_v57, 1  ;;  %v1538_v16 = vsel %vm1536_vm5, %v7034_v34, -3e+38  ;;  %v6300_v57 = vld [vmem:[%s8452_s5 + $0x50] sm:$0xff]  }
 0x1f5   :  { %v1519_v60 = vsel %vm1517_vm6, %v7028_v23, -3e+38  ;;  %v1540_v2 = vmax.f32 %v1520_v53, %v1538_v16  ;;  %v6302_v16 = vld [vmem:[%s8452_s5 + $0x60] sm:$0xff]  }
 0x1f6   :  { %v1521_v6 = vmax.f32 %v1501_v54, %v1519_v60  ;;  %v1552_v13 = vpop.permute.xlu1 %1551  ;;  %v6298_v54 = vld [vmem:[%s8452_s5 + $0x40] sm:$0xff]   ;;  %v6303_v60 = vld [vmem:[%s8452_s5 + $0x68] sm:$0xff]  }
 0x1f7   :  { %5973 = vmatpush3.bf16.msra.mxu1 %v6278_v37  ;;  %v1535_v7 = vpop.permute.xlu0 %1534  ;;  %vm1556_vm7 = vcmp.eq.s32.totalorder %v1552_v13, 1  ;;  %v6296_v37 = vld [vmem:[%s8454_s7 + $0x138] sm:$0xff]   ;;  %v6306_v13 = vld [vmem:[%s8456_s9 + $0x40] sm:$0xff]  }
 0x1f8   :  { %5974 = vmatprep.subr.bf16.mxu1 %v6547_v1  ;;  %vm1537_vm8 = vcmp.eq.s32.totalorder %v1535_v7, 1  ;;  %v1558_v12 = vsel %vm1556_vm7, %v7040_v45, -3e+38  ;;  %v6307_v7 = vld [vmem:[%s8456_s9] sm:$0xff]   ;;  %5652 = vmatprep.subr.bf16.mxu0 %v6306_v13 }
 0x1f9   :  { %v1539_v11 = vsel %vm1537_vm8, %v7034_v34, -3e+38  ;;  %v1560_v19 = vmax.f32 %v1540_v2, %v1558_v12  ;;  %v6304_v2 = vld [vmem:[%s8452_s5 + $0x70] sm:$0xff]   ;;  %5653 = vmatpush3.bf16.msra.mxu0 %v6307_v7  ;;  %v6309_v12 = vld [vmem:[%s8456_s9 + $0x8] sm:$0xff]  }
 0x1fa   :  { %v1541_v14 = vmax.f32 %v1521_v6, %v1539_v11  ;;  %v1572_v23 = vpop.permute.xlu1 %1571  ;;  %v6305_v6 = vld [vmem:[%s8452_s5 + $0x78] sm:$0xff]   ;;  %v6310_v11 = vld [vmem:[%s8456_s9 + $0x50] sm:$0xff]  }
 0x1fb   :  { %5975 = vmatpush3.bf16.msra.mxu1 %v6279_v58  ;;  %v1555_v15 = vpop.permute.xlu0 %1554  ;;  %vm1576_vm9 = vcmp.eq.s32.totalorder %v1572_v23, 1  ;;  %v6301_v58 = vld [vmem:[%s8452_s5 + $0x58] sm:$0xff]  }
 0x1fc   :  { %5976 = vmatprep.subr.bf16.mxu1 %v6547_v1  ;;  %vm1557_vm10 = vcmp.eq.s32.totalorder %v1555_v15, 1  ;;  %v1578_v8 = vsel %vm1576_vm9, %v7046_v51, -3e+38  ;;  %v6313_v23 = vld [vmem:[%s8456_s9 + $0x18] sm:$0xff]   ;;  %v6315_v15 = vld [vmem:[%s8456_s9 + $0x20] sm:$0xff]  }
 0x1fd   :  { %v1559_v34 = vsel %vm1557_vm10, %v7040_v45, -3e+38  ;;  %v1580_v18 = vmax.f32 %v1560_v19, %v1578_v8  ;;  %v6311_v19 = vld [vmem:[%s8456_s9 + $0x10] sm:$0xff]  }
 0x1fe   :  { %v1561_v28 = vmax.f32 %v1541_v14, %v1559_v34  ;;  %v1592_v30 = vpop.permute.xlu1 %1591  ;;  %v6312_v14 = vld [vmem:[%s8456_s9 + $0x58] sm:$0xff]   ;;  %v6318_v8 = vld [vmem:[%s8456_s9 + $0x70] sm:$0xff]  }
 0x1ff   :  { %5977 = vmatpush3.bf16.msra.mxu1 %v6280_v22  ;;  %v1575_v32 = vpop.permute.xlu0 %1574  ;;  %vm1596_vm11 = vcmp.eq.s32.totalorder %v1592_v30, 1  ;;  %v6308_v22 = vld [vmem:[%s8456_s9 + $0x48] sm:$0xff]   ;;  %v6319_v34 = vld [vmem:[%s8456_s9 + $0x30] sm:$0xff]  }
 0x200   :  { %5978 = vmatprep.subr.bf16.mxu1 %v6547_v1  ;;  %vm1577_vm13 = vcmp.eq.s32.totalorder %v1575_v32, 1  ;;  %v1598_v35 = vsel %vm1596_vm11, %v7052_v0, -3e+38  ;;  %5654 = vmatprep.subr.bf16.mxu0 %v6308_v22 }
 0x201   :  { %v1579_v45 = vsel %vm1577_vm13, %v7046_v51, -3e+38  ;;  %v1600_v36 = vmax.f32 %v1580_v18, %v1598_v35  ;;  %v6286_v51 = vld [vmem:[%s8454_s7 + $0x110] sm:$0xff]   ;;  %5655 = vmatpush3.bf16.msra.mxu0 %v6309_v12  ;;  %v6320_v18 = vld [vmem:[%s8456_s9 + $0x78] sm:$0xff]  }
 0x202   :  { %v1581_v39 = vmax.f32 %v1561_v28, %v1579_v45  ;;  %v1611_v53 = vpop.permute.xlu1 %1610  ;;  %5656 = vmatprep.subr.bf16.mxu0 %v6310_v11  ;;  %v6321_v28 = vld [vmem:[%s8456_s9 + $0x38] sm:$0xff]  }
 0x203   :  { %5979 = vmatpush3.bf16.msra.mxu1 %v6281_v38  ;;  %v1595_v42 = vpop.permute.xlu0 %1594  ;;  %vm1615_vm0 = vcmp.eq.s32.totalorder %v1611_v53, 1  ;;  %v6316_v38 = vld [vmem:[%s8456_s9 + $0x68] sm:$0xff]  }
 0x204   :  { %5674 = vmatprep.subr.bf16.mxu1 %v6282_v21  ;;  %vm1597_vm14 = vcmp.eq.s32.totalorder %v1595_v42, 1  ;;  %v6317_v21 = vld [vmem:[%s8456_s9 + $0x28] sm:$0xff]  }
 0x205   :  { %v1599_v44 = vsel %vm1597_vm14, %v7052_v0, -3e+38  ;;  %v6290_v0 = vld [vmem:[%s8454_s7 + $0x120] sm:$0xff]   ;;  %5657 = vmatpush3.bf16.msra.mxu0 %v6311_v19  ;;  %v6329_v19 = vld [vmem:[%s8454_s7 + $0x178] sm:$0xff]  }
 0x206   :  { %5981 = vmatmul.mubr.bf16.vlgmr.msra.gmra.mrb[4].mxu1 %v6899_v41  ;;  %v1601_v27 = vmax.f32 %v1581_v39, %v1599_v44  ;;  %5658 = vmatprep.subr.bf16.mxu0 %v6312_v14 }
 0x207   :  { %5675 = vmatpush3.bf16.msra.mxu1 %v6283_v33  ;;  %1861 = vmatprep.mubr.bf16.mxu1 %v1621_v26  ;;  %v6291_v26 = vld [vmem:[%s8454_s7 + $0xe0] sm:$0xff]   ;;  %v1614_v52 = vpop.permute.xlu0 %1613 }
 0x208   :  { %5676 = vmatprep.subr.bf16.mxu1 %v6284_v31  ;;  %v5590_v24 = vpack.c.bf16 %v1601_v27, %v1600_v36  ;;  %vm1616_vm15 = vcmp.eq.s32.totalorder %v1614_v52, 1  ;;  %v5018_v33 = vld [vmem:[%s8455_s8] ss:$0 sm:$0xff] }
 0x209   :  { %vm5589_vm1 = vmpackc.low %vm1616_vm15, %vm1615_vm0  ;;  %5659 = vmatpush3.bf16.msra.mxu0 %v6313_v23  ;;  %v5162_v23 = vld [vmem:[%s8453_s6 + $0x1] ss:$0 sm:$0xff] }
 0x20b   :  { %5677 = vmatpush3.bf16.msra.mxu1 %v6285_v43 }
 0x20c   :  { %5678 = vmatprep.subr.bf16.mxu1 %v6286_v51 }
 0x20f   :  { %5679 = vmatpush3.bf16.msra.mxu1 %v6287_v3 }
 0x210   :  { %5680 = vmatprep.subr.bf16.mxu1 %v6288_v25 }
 0x213   :  { %5681 = vmatpush3.bf16.msra.mxu1 %v6289_v55 }
 0x214   :  { %5682 = vmatprep.subr.bf16.mxu1 %v6290_v0 }
 0x217   :  { %5683 = vmatpush3.bf16.msra.mxu1 %v6291_v26  ;;  %v5043_v26 = vld [vmem:[%s8453_s6] ss:$0 sm:$0xff] }
 0x218   :  { %5684 = vmatprep.subr.bf16.mxu1 %v6292_v46 }
 0x21b   :  { %5685 = vmatpush3.bf16.msra.mxu1 %v6293_v47 }
 0x21c   :  { %5686 = vmatprep.subr.bf16.mxu1 %v6294_v48 }
 0x21f   :  { %5687 = vmatpush3.bf16.msra.mxu1 %v6295_v49 }
 0x220   :  { %5688 = vmatprep.subr.bf16.mxu1 %v6296_v37 }
 0x223   :  { %5689 = vmatpush3.bf16.msra.mxu1 %v6297_v9 }
 0x224   :  { %6004 = vmatprep.subr.bf16.mxu1 %v6547_v1 }
 0x226   :  { %5591 = vmatmul.mubr.msk.bf16.vlgmr.msra.gmra.mrb[8].mxu1 %vm5589_vm1, %v5590_v24 }
 0x227   :  { %6005 = vmatpush3.bf16.msra.mxu1 %v6298_v54  ;;  %6020 = vmatprep.mubr.msk.bf16.mxu1 %vm6551_vm4, %v6547_v1 }
 0x228   :  { %6006 = vmatprep.subr.bf16.mxu1 %v6547_v1 }
 0x22b   :  { %6007 = vmatpush3.bf16.msra.mxu1 %v6299_v63  ;;  %v6322_v63 = vld [vmem:[%s8454_s7 + $0x140] sm:$0xff]  }
 0x22c   :  { %6008 = vmatprep.subr.bf16.mxu1 %v6547_v1 }
 0x22f   :  { %6009 = vmatpush3.bf16.msra.mxu1 %v6300_v57  ;;  %v6323_v57 = vld [vmem:[%s8454_s7 + $0x148] sm:$0xff]  }
 0x230   :  { %6010 = vmatprep.subr.bf16.mxu1 %v6547_v1 }
 0x233   :  { %6011 = vmatpush3.bf16.msra.mxu1 %v6301_v58  ;;  %v6324_v58 = vld [vmem:[%s8454_s7 + $0x150] sm:$0xff]  }
 0x234   :  { %6012 = vmatprep.subr.bf16.mxu1 %v6547_v1 }
 0x237   :  { %6013 = vmatpush3.bf16.msra.mxu1 %v6302_v16  ;;  %v6325_v16 = vld [vmem:[%s8454_s7 + $0x158] sm:$0xff]  }
 0x238   :  { %6014 = vmatprep.subr.bf16.mxu1 %v6547_v1 }
 0x23b   :  { %6015 = vmatpush3.bf16.msra.mxu1 %v6303_v60  ;;  %v6326_v60 = vld [vmem:[%s8454_s7 + $0x160] sm:$0xff]  }
 0x23c   :  { %6016 = vmatprep.subr.bf16.mxu1 %v6547_v1 }
 0x23f   :  { %6017 = vmatpush3.bf16.msra.mxu1 %v6304_v2  ;;  %v6327_v2 = vld [vmem:[%s8454_s7 + $0x168] sm:$0xff]  }
 0x240   :  { %6018 = vmatprep.subr.bf16.mxu1 %v6547_v1 }
 0x243   :  { %6019 = vmatpush3.bf16.msra.mxu1 %v6305_v6  ;;  %v6328_v6 = vld [vmem:[%s8454_s7 + $0x170] sm:$0xff]  }
 0x246   :  { %6021 = vmatmul.mubr.bf16.vlgmr.msra.gmra.mrb[12].mxu1 %v6899_v41  ;;  %v6314_v41 = vld [vmem:[%s8456_s9 + $0x60] sm:$0xff]  }
 0x247   :  { %5660 = vmatprep.subr.bf16.mxu0 %v6314_v41 }
 0x248   :  { %5661 = vmatpush3.bf16.msra.mxu0 %v6315_v15 }
 0x249   :  { %5662 = vmatprep.subr.bf16.mxu0 %v6316_v38 }
 0x24c   :  { %5663 = vmatpush3.bf16.msra.mxu0 %v6317_v21 }
 0x24d   :  { %5664 = vmatprep.subr.bf16.mxu0 %v6318_v8 }
 0x250   :  { %5665 = vmatpush3.bf16.msra.mxu0 %v6319_v34 }
 0x251   :  { %5666 = vmatprep.subr.bf16.mxu0 %v6320_v18 }
 0x254   :  { %5667 = vmatpush3.bf16.msra.mxu0 %v6321_v28 }
 0x255   :  { %5984 = vmatprep.subr.bf16.mxu0 %v6547_v1 }
 0x2b9   :  { %v5628_v30 = vpop.f32.mrb[0].mxu1  ;;  %v971_v32 = vpop.f32.mrb[12].mxu0 }
 0x2ba   :  { %v5629_v31 = vpop.f32.mrb[1].mxu1  ;;  %v5962_v45 = vpop.f32.mrb[13].mxu0 }
 0x2bb   :  { %v5630_v35 = vadd.f32 %v5629_v31, %v5628_v30  ;;  %v5631_v36 = vpop.f32.mrb[2].mxu1  ;;  %v974_v39 = vpop.f32.mrb[14].mxu0  ;;  %v6335_v31 = vld [vmem:[%s8456_s9 + $0x90] sm:$0xff]   ;;  %v6337_v45 = vld [vmem:[%s8456_s9 + $0x98] sm:$0xff]  }
 0x2bc   :  { %v5632_v42 = vpop.f32.mrb[3].mxu1  ;;  %v5963_v44 = vpop.f32.mrb[15].mxu0 }
 0x2bd   :  { %v931_v43 = vadd.f32 %v5630_v35, %v5018_v33  ;;  %v5633_v51 = vadd.f32 %v5632_v42, %v5631_v36  ;;  %v6336_v35 = vld [vmem:[%s8456_s9 + $0xd8] sm:$0xff]   ;;  %v6338_v36 = vld [vmem:[%s8456_s9 + $0xe0] sm:$0xff]   ;;  %v6340_v42 = vld [vmem:[%s8456_s9 + $0xe8] sm:$0xff]  }
 0x2be   :  { %v6343_v44 = vld [vmem:[%s8456_s9 + $0xb0] sm:$0xff]  }
 0x2bf   :  { %v972_v27 = vadd.f32 %v971_v32, %v931_v43  ;;  %v934_v3 = vadd.f32 %v5633_v51, %v5018_v33  ;;  %v6330_v32 = vld [vmem:[%s8456_s9 + $0xc0] sm:$0xff]   ;;  %v6334_v33 = vld [vmem:[%s8456_s9 + $0xd0] sm:$0xff]   ;;  %v6341_v43 = vld [vmem:[%s8456_s9 + $0xa8] sm:$0xff]  }
 0x2c0   :  { %v6342_v51 = vld [vmem:[%s8456_s9 + $0xf0] sm:$0xff]  }
 0x2c1   :  { %v975_v24 = vadd.f32 %v974_v39, %v934_v3  ;;  %v1090_v25 = vmax.f32 %v972_v27, 0.0  ;;  %v6339_v39 = vld [vmem:[%s8456_s9 + $0xa0] sm:$0xff]   ;;  %v6344_v27 = vld [vmem:[%s8456_s9 + $0xf8] sm:$0xff]  }
 0x2c2   :  { %v6345_v3 = vld [vmem:[%s8456_s9 + $0xb8] sm:$0xff]  }
 0x2c3   :  { %v1091_v55 = vmax.f32 %v975_v24, 0.0  ;;  %v6346_v24 = vld [vmem:[%s8458_s11] sm:$0xff]  }
 0x2c4   :  { %6024 = vmatprep.subr.bf16.mxu1 %v6346_v24 }
 0x2c5   :  { %v1092_v0 = vpack.c.bf16 %v1091_v55, %v1090_v25  ;;  %v6347_v25 = vld [vmem:[%s8458_s11 + $0x8] sm:$0xff]   ;;  %6025 = vmatpush3.bf16.msra.mxu1 %v6346_v24  ;;  %v6348_v55 = vld [vmem:[%s8458_s11 + $0x10] sm:$0xff]  }
 0x2c6   :  { %6026 = vmatprep.subr.bf16.mxu1 %v6347_v25 }
 0x2c9   :  { %6027 = vmatpush3.bf16.msra.mxu1 %v6347_v25 }
 0x2ca   :  { %6028 = vmatprep.subr.bf16.mxu1 %v6348_v55 }
 0x2cd   :  { %6029 = vmatpush3.bf16.msra.mxu1 %v6348_v55 }
 0x2d9   :  { %v1083_v46 = vpop.f32.mrb[4].mxu1 }
 0x2da   :  { %v1084_v47 = vadd.f32 %v5043_v26, %v1083_v46  ;;  %v5982_v48 = vpop.f32.mrb[5].mxu1 }
 0x2db   :  { %v1086_v49 = vpop.f32.mrb[6].mxu1 }
 0x2dc   :  { %v1087_v37 = vadd.f32 %v5043_v26, %v1086_v49  ;;  %v5983_v52 = vpop.f32.mrb[7].mxu1  ;;  %v1094_v9 = vmax.f32 %v1084_v47, 0.0  ;;  %v6350_v26 = vld [vmem:[%s8458_s11 + $0x20] sm:$0xff]  }
 0x2dd   :  { %v5052_v47 = vld [vmem:[%s8457_s10] ss:$0 sm:$0xff] }
 0x2de   :  { %v1095_v53 = vmax.f32 %v1087_v37, 0.0 }
 0x2e0   :  { %v1096_v54 = vpack.c.bf16 %v1095_v53, %v1094_v9 }
 0x2e2   :  { %1267 = vmatprep.mubr.bf16.mxu0 %v1096_v54 }
 0x2e3   :  { %1268 = vmatmul.mubr.bf16.vlgmr.msra.gmra.mrb[16].mxu0 %v1092_v0  ;;  %v6349_v0 = vld [vmem:[%s8458_s11 + $0x18] sm:$0xff]  }
 0x2e4   :  { %5985 = vmatpush3.bf16.msra.mxu0 %v6322_v63  ;;  %6000 = vmatprep.mubr.msk.bf16.mxu0 %vm6551_vm4, %v6547_v1 }
 0x2e5   :  { %5986 = vmatprep.subr.bf16.mxu0 %v6547_v1  ;;  %6030 = vmatprep.subr.bf16.mxu1 %v6349_v0 }
 0x2e6   :  { %6031 = vmatpush3.bf16.msra.mxu1 %v6349_v0 }
 0x2e7   :  { %6032 = vmatprep.subr.bf16.mxu1 %v6350_v26 }
 0x2e8   :  { %5987 = vmatpush3.bf16.msra.mxu0 %v6323_v57 }
 0x2e9   :  { %5988 = vmatprep.subr.bf16.mxu0 %v6547_v1 }
 0x2ea   :  { %6033 = vmatpush3.bf16.msra.mxu1 %v6350_v26 }
 0x2ec   :  { %5989 = vmatpush3.bf16.msra.mxu0 %v6324_v58 }
 0x2ed   :  { %5990 = vmatprep.subr.bf16.mxu0 %v6547_v1 }
 0x2f0   :  { %5991 = vmatpush3.bf16.msra.mxu0 %v6325_v16  ;;  %v5120_v16 = vld [vmem:[%s8455_s8 + $0x1] ss:$0 sm:$0xff] }
 0x2f1   :  { %5992 = vmatprep.subr.bf16.mxu0 %v6547_v1 }
 0x2f4   :  { %5993 = vmatpush3.bf16.msra.mxu0 %v6326_v60 }
 0x2f5   :  { %5994 = vmatprep.subr.bf16.mxu0 %v6547_v1 }
 0x2f8   :  { %5995 = vmatpush3.bf16.msra.mxu0 %v6327_v2 }
 0x2f9   :  { %v5690_v13 = vpop.f32.mrb[8].mxu1  ;;  %5996 = vmatprep.subr.bf16.mxu0 %v6547_v1 }
 0x2fa   :  { %v5691_v7 = vpop.f32.mrb[9].mxu1 }
 0x2fb   :  { %v7422_v22 = vadd.f32 %v5691_v7, %v5690_v13  ;;  %v5693_v12 = vpop.f32.mrb[10].mxu1 }
 0x2fc   :  { %5997 = vmatpush3.bf16.msra.mxu0 %v6328_v6  ;;  %v5694_v11 = vpop.f32.mrb[11].mxu1 }
 0x2fd   :  { %v7427_v14 = vadd.f32 %v5694_v11, %v5693_v12  ;;  %5998 = vmatprep.subr.bf16.mxu0 %v6547_v1  ;;  %v1864_v60 = vadd.f32 %v7422_v22, %v5120_v16  ;;  %v6352_v22 = vld [vmem:[%s8458_s11 + $0x30] sm:$0xff]  }
 0x2ff   :  { %v1867_v7 = vadd.f32 %v7427_v14, %v5120_v16  ;;  %v6353_v14 = vld [vmem:[%s8458_s11 + $0x38] sm:$0xff]  }
 0x300   :  { %5999 = vmatpush3.bf16.msra.mxu0 %v6329_v19 }
 0x301   :  { %5714 = vmatprep.subr.bf16.mxu0 %v6330_v32 }
 0x303   :  { %6001 = vmatmul.mubr.bf16.vlgmr.msra.gmra.mrb[20].mxu0 %v1623_v61  ;;  %v6333_v61 = vld [vmem:[%s8456_s9 + $0x88] sm:$0xff]  }
 0x304   :  { %5715 = vmatpush3.bf16.msra.mxu0 %v6331_v20 }
 0x305   :  { %5716 = vmatprep.subr.bf16.mxu0 %v6332_v40 }
 0x308   :  { %5717 = vmatpush3.bf16.msra.mxu0 %v6333_v61 }
 0x309   :  { %5718 = vmatprep.subr.bf16.mxu0 %v6334_v33 }
 0x30c   :  { %5719 = vmatpush3.bf16.msra.mxu0 %v6335_v31 }
 0x30d   :  { %5720 = vmatprep.subr.bf16.mxu0 %v6336_v35 }
 0x310   :  { %5721 = vmatpush3.bf16.msra.mxu0 %v6337_v45 }
 0x311   :  { %5722 = vmatprep.subr.bf16.mxu0 %v6338_v36 }
 0x314   :  { %5723 = vmatpush3.bf16.msra.mxu0 %v6339_v39  ;;  %v6357_v39 = vld [vmem:[%s8460_s13 + $0x18] sm:$0xff]  }
 0x315   :  { %5724 = vmatprep.subr.bf16.mxu0 %v6340_v42  ;;  %v6358_v42 = vld [vmem:[%s8460_s13 + $0x20] sm:$0xff]  }
 0x318   :  { %5725 = vmatpush3.bf16.msra.mxu0 %v6341_v43  ;;  %v6359_v43 = vld [vmem:[%s8460_s13 + $0x28] sm:$0xff]  }
 0x319   :  { %v2018_v41 = vpop.f32.mrb[12].mxu1  ;;  %5726 = vmatprep.subr.bf16.mxu0 %v6342_v51  ;;  %v6360_v51 = vld [vmem:[%s8460_s13 + $0x30] sm:$0xff]  }
 0x31a   :  { %v2019_v15 = vadd.f32 %v5162_v23, %v2018_v41  ;;  %v6022_v38 = vpop.f32.mrb[13].mxu1 }
 0x31b   :  { %v2021_v21 = vpop.f32.mrb[14].mxu1  ;;  %v6351_v38 = vld [vmem:[%s8458_s11 + $0x28] sm:$0xff]  }
 0x31c   :  { %v2022_v8 = vadd.f32 %v5162_v23, %v2021_v21  ;;  %v6023_v34 = vpop.f32.mrb[15].mxu1  ;;  %v2029_v18 = vmax.f32 %v2019_v15, 0.0  ;;  %5727 = vmatpush3.bf16.msra.mxu0 %v6343_v44  ;;  %6034 = vmatprep.subr.bf16.mxu1 %v6351_v38  ;;  %v6354_v21 = vld [vmem:[%s8460_s13] sm:$0xff]   ;;  %v6361_v44 = vld [vmem:[%s8460_s13 + $0x38] sm:$0xff]  }
 0x31d   :  { %5728 = vmatprep.subr.bf16.mxu0 %v6344_v27  ;;  %6035 = vmatpush3.bf16.msra.mxu1 %v6351_v38  ;;  %v6356_v34 = vld [vmem:[%s8460_s13 + $0x10] sm:$0xff]   ;;  %v5221_v27 = vld [vmem:[%s8459_s12] ss:$0 sm:$0xff] }
 0x31e   :  { %v2030_v28 = vmax.f32 %v2022_v8, 0.0  ;;  %6036 = vmatprep.subr.bf16.mxu1 %v6352_v22  ;;  %v6355_v8 = vld [vmem:[%s8460_s13 + $0x8] sm:$0xff]  }
 0x320   :  { %v2031_v30 = vpack.c.bf16 %v2030_v28, %v2029_v18  ;;  %5729 = vmatpush3.bf16.msra.mxu0 %v6345_v3  ;;  %v5204_v28 = vld [vmem:[%s8457_s10 + $0x1] ss:$0 sm:$0xff] }
 0x321   :  { %6037 = vmatpush3.bf16.msra.mxu1 %v6352_v22  ;;  %6044 = vmatprep.subr.bf16.mxu0 %v6354_v21 }
 0x322   :  { %2204 = vmatprep.mubr.bf16.mxu0 %v2031_v30  ;;  %6038 = vmatprep.subr.bf16.mxu1 %v6353_v14 }
 0x325   :  { %6039 = vmatpush3.bf16.msra.mxu1 %v6353_v14 }
 0x3b6   :  { %v5668_v46 = vpop.f32.mrb[16].mxu0 }
 0x3b7   :  { %v5669_v48 = vpop.f32.mrb[17].mxu0 }
 0x3b8   :  { %v5670_v49 = vadd.f32 %v5669_v48, %v5668_v46  ;;  %v5671_v37 = vpop.f32.mrb[18].mxu0 }
 0x3b9   :  { %v5672_v52 = vpop.f32.mrb[19].mxu0 }
 0x3ba   :  { %v1270_v9 = vadd.f32 %v5670_v49, %v5052_v47  ;;  %v5673_v53 = vadd.f32 %v5672_v52, %v5671_v37 }
 0x3bc   :  { %v1273_v54 = vadd.f32 %v5673_v53, %v5052_v47  ;;  %v1276_v63 = vmax.f32 %v1270_v9, 0.0 }
 0x3be   :  { %v1277_v57 = vmax.f32 %v1273_v54, 0.0 }
 0x3c0   :  { %v7502_v58 = vpack.c.bf16 %v1277_v57, %v1276_v63 }
 0x3c2   :  { %6040 = vmatprep.mubr.bf16.mxu1 %v7502_v58 }
 0x3d6   :  { %v1904_v2 = vpop.f32.mrb[20].mxu0 }
 0x3d7   :  { %v1905_v6 = vadd.f32 %v1904_v2, %v1864_v60  ;;  %v6002_v13 = vpop.f32.mrb[21].mxu0 }
 0x3d8   :  { %v1907_v12 = vpop.f32.mrb[22].mxu0 }
 0x3d9   :  { %v1908_v11 = vadd.f32 %v1907_v12, %v1867_v7  ;;  %v6003_v19 = vpop.f32.mrb[23].mxu0  ;;  %v2025_v23 = vmax.f32 %v1905_v6, 0.0 }
 0x3db   :  { %v2026_v41 = vmax.f32 %v1908_v11, 0.0 }
 0x3dd   :  { %v2027_v15 = vpack.c.bf16 %v2026_v41, %v2025_v23 }
 0x3df   :  { %2205 = vmatmul.mubr.bf16.vlgmr.msra.gmra.mrb[24].mxu0 %v2027_v15 }
 0x3e0   :  { %6045 = vmatpush3.bf16.msra.mxu0 %v6354_v21 }
 0x3e1   :  { %6046 = vmatprep.subr.bf16.mxu0 %v6355_v8 }
 0x3e4   :  { %6047 = vmatpush3.bf16.msra.mxu0 %v6355_v8 }
 0x3e5   :  { %6048 = vmatprep.subr.bf16.mxu0 %v6356_v34 }
 0x3e8   :  { %6049 = vmatpush3.bf16.msra.mxu0 %v6356_v34 }
 0x3e9   :  { %6050 = vmatprep.subr.bf16.mxu0 %v6357_v39 }
 0x3ec   :  { %6051 = vmatpush3.bf16.msra.mxu0 %v6357_v39  ;;  %v5239_v39 = vld [vmem:[%s8450_s3 + $0x24] sm:$0xf] }
 0x3ed   :  { %6052 = vmatprep.subr.bf16.mxu0 %v6358_v42  ;;  %vm2621_vm3 = vcmp.gt.bf16.partialorder %v5239_v39, 0 }
 0x3f0   :  { %6053 = vmatpush3.bf16.msra.mxu0 %v6358_v42  ;;  %v5238_v42 = vld [vmem:[%s8450_s3 + $0x20] sm:$0xf] }
 0x3f1   :  { %6054 = vmatprep.subr.bf16.mxu0 %v6359_v43  ;;  %vm2620_vm5 = vcmp.gt.bf16.partialorder %v5238_v42, 0 }
 0x3f4   :  { %6055 = vmatpush3.bf16.msra.mxu0 %v6359_v43  ;;  %v2623_v43 = vsel %vm2621_vm3, 65537, %v6548_v4 }
 0x3f5   :  { %6056 = vmatprep.subr.bf16.mxu0 %v6360_v51 }
 0x3f8   :  { %6057 = vmatpush3.bf16.msra.mxu0 %v6360_v51  ;;  %v2622_v51 = vsel %vm2620_vm5, 65537, %v6548_v4 }
 0x3f9   :  { %6058 = vmatprep.subr.bf16.mxu0 %v6361_v44 }
 0x3fc   :  { %6059 = vmatpush3.bf16.msra.mxu0 %v6361_v44  ;;  %v2625_v44 = vunpack.c.l.b16 %v2623_v43 }
 0x3fd   :  { %6074 = vmatprep.subr.bf16.mxu0 %v6547_v1 }
 0x3fe   :  { %vm2627_vm6 = vcmp.ne.s32.totalorder %v2625_v44, 0 }
 0x4b2   :  { %v5730_v18 = vpop.f32.mrb[24].mxu0 }
 0x4b3   :  { %v5731_v30 = vpop.f32.mrb[25].mxu0 }
 0x4b4   :  { %v5732_v32 = vadd.f32 %v5731_v30, %v5730_v18  ;;  %v5733_v20 = vpop.f32.mrb[26].mxu0 }
 0x4b5   :  { %v5734_v40 = vpop.f32.mrb[27].mxu0 }
 0x4b6   :  { %v2207_v61 = vadd.f32 %v5732_v32, %v5204_v28  ;;  %v5735_v33 = vadd.f32 %v5734_v40, %v5733_v20 }
 0x4b8   :  { %v2210_v31 = vadd.f32 %v5735_v33, %v5204_v28  ;;  %v2213_v35 = vmax.f32 %v2207_v61, 0.0 }
 0x4ba   :  { %v2214_v45 = vmax.f32 %v2210_v31, 0.0 }
 0x4bc   :  { %v7531_v36 = vpack.c.bf16 %v2214_v45, %v2213_v35 }
 0x4be   :  { %6041 = vmatmul.mubr.bf16.vlgmr.msra.gmra.mrb[16].mxu1 %v7531_v36 }
 0x591   :  { %v6042_v3 = vpop.f32.mrb[16].mxu1 }
 0x592   :  { %v2333_v24 = vadd.f32 %v6042_v3, %v5221_v27  ;;  %v2324_v25 = vpop.f32.mrb[17].mxu1 }
 0x593   :  { %v2325_v55 = vadd.f32 %v5221_v27, %v2324_v25  ;;  %v6043_v0 = vpop.f32.mrb[18].mxu1 }
 0x594   :  { %6486 = vtanh.f32 %v2333_v24  ;;  %v2336_v26 = vadd.f32 %v6043_v0, %v5221_v27  ;;  %v2327_v46 = vpop.f32.mrb[19].mxu1 }
 0x595   :  { %6488 = vtanh.f32 %v2325_v55  ;;  %v2328_v47 = vadd.f32 %v5221_v27, %v2327_v46  ;;  %v2624_v27 = vunpack.c.l.b16 %v2622_v51  ;;  %v2629_v55 = vsel %vm2627_vm6, 1, %v6548_v4 }
 0x596   :  { %6490 = vtanh.f32 %v2336_v26  ;;  %v5246_v26 = vcombine.low %v5238_v42, %v5239_v39  ;;  %v2500_v46 = vunpack.c.l.bf16 %v7531_v36 }
 0x597   :  { %6492 = vtanh.f32 %v2328_v47  ;;  %vm2626_vm7 = vcmp.ne.s32.totalorder %v2624_v27, 0  ;;  %v2501_v47 = vunpack.c.h.bf16 %v7531_v36 }
 0x598   :  { %v2628_v0 = vsel %vm2626_vm7, 1, %v6548_v4  ;;  %6066 = vmatprep.mubr.msk.bf16.mxu1 %vm208_vm12, %v5246_v26 }
 0x59e   :  { %v6487_v48 = vpop.eup %6486 }
 0x59f   :  { %v6489_v49 = vpop.eup %6488 }
 0x5a0   :  { %v6491_v37 = vpop.eup %6490 }
 0x5a1   :  { %v6493_v52 = vpop.eup %6492  ;;  %v2344_v9 = vpack.c.bf16 %v6491_v37, %v6487_v48  ;;  %v2490_v48 = vunpack.c.l.bf16 %v7502_v58 }
 0x5a2   :  { %v2343_v53 = vpack.c.bf16 %v6493_v52, %v6489_v49  ;;  %v2491_v49 = vunpack.c.h.bf16 %v7502_v58 }
 0x5a4   :  { %6060 = vmatprep.mubr.bf16.mxu0 %v2343_v53 }
 0x5a5   :  { %6061 = vmatmul.mubr.bf16.vlgmr.msra.gmra.mrb[28].mxu0 %v2344_v9 }
 0x5a6   :  { %6090 = vmatprep.mubr.msk.bf16.mxu0 %vm6551_vm4, %v6547_v1 }
 0x678   :  { %v6062_v54 = vpop.f32.mrb[28].mxu0 }
 0x679   :  { %v2443_v63 = vpop.f32.mrb[29].mxu0  ;;  %v2469_v16 = vsel %vm2458_vm2, %v6062_v54, 0.0 }
 0x67a   :  { %v6063_v57 = vpop.f32.mrb[30].mxu0  ;;  %v2459_v6 = vsel %vm2458_vm2, %v2443_v63, 0.0 }
 0x67b   :  { %v2470_v60 = vsel %vm2458_vm2, %v6063_v57, 0.0  ;;  %v2446_v2 = vpop.f32.mrb[31].mxu0 }
 0x67c   :  { %v2471_v13 = vadd.f32 %v2470_v60, %v2469_v16  ;;  %v2460_v7 = vsel %vm2458_vm2, %v2446_v2, 0.0 }
 0x67d   :  { %v2461_v12 = vadd.f32 %v2460_v7, %v2459_v6 }
 0x67e   :  { %v2472_v11 = vrot.slane %v2471_v13, 4 }
 0x67f   :  { %v2462_v19 = vrot.slane %v2461_v12, 4 }
 0x680   :  { %v2473_v23 = vadd.f32 %v2472_v11, %v2471_v13 }
 0x681   :  { %v2463_v41 = vadd.f32 %v2462_v19, %v2461_v12  ;;  %v6363_v19 = vld [vmem:[%s8450_s3 + $0x28] sm:$0xff]  }
 0x682   :  { %v2474_v15 = vrot.slane %v2473_v23, 2 }
 0x683   :  { %v2464_v38 = vrot.slane %v2463_v41, 2 }
 0x684   :  { %v2475_v22 = vadd.f32 %v2474_v15, %v2473_v23 }
 0x685   :  { %v2465_v14 = vadd.f32 %v2464_v38, %v2463_v41 }
 0x686   :  { %v2476_v21 = vrot.slane %v2475_v22, 1 }
 0x687   :  { %v2466_v8 = vrot.slane %v2465_v14, 1 }
 0x688   :  { %v2477_v34 = vadd.f32 %v2476_v21, %v2475_v22 }
 0x689   :  { %v2467_v18 = vadd.f32 %v2466_v8, %v2465_v14 }
 0x68a   :  { %v2478_v28 = vmul.f32 0.0625, %v2477_v34 }
 0x68b   :  { %v2468_v30 = vmul.f32 0.0625, %v2467_v18 }
 0x68d   :  { %v2479_v32 = vmax.f32 %v2468_v30, %v2478_v28 }
 0x68f   :  { %v2480_v20 = vsub.f32 %v2468_v30, %v2479_v32  ;;  %v2483_v40 = vsub.f32 %v2478_v28, %v2479_v32 }
 0x691   :  { %v2481_v61 = vmul.f32 1.442695, %v2480_v20  ;;  %v2484_v33 = vmul.f32 1.442695, %v2483_v40 }
 0x693   :  { %6494 = vpow2.f32 %v2481_v61 }
 0x694   :  { %6496 = vpow2.f32 %v2484_v33 }
 0x69d   :  { %v6495_v31 = vpop.eup %6494 }
 0x69e   :  { %v6497_v35 = vpop.eup %6496 }
 0x69f   :  { %v2486_v45 = vadd.f32 %v6497_v35, %v6495_v31 }
 0x6a1   :  { %6498 = vrcp.f32 %v2486_v45 }
 0x6ab   :  { %v6499_v3 = vpop.eup %6498 }
 0x6ac   :  { %v2499_v24 = vmul.f32 %v6499_v3, %v6497_v35  ;;  %v2488_v25 = vmul.f32 %v6499_v3, %v6495_v31 }
 0x6ae   :  { %2504 = vperm.xlu0 %6235, %v2499_v24   ;;  %2494 = vperm.xlu1 %6236, %v2488_v25  }
 0x6b2   :  { %2648 = vrot.lane.b32.xlu0 %v2629_v55, %s8518_s21  ;;  %2646 = vrot.lane.b32.xlu1 %v2628_v0, %s8518_s21 }
 0x6b6   :  { %2672 = vrot.lane.b32.xlu0 %v2629_v55, %s8519_s19  ;;  %2670 = vrot.lane.b32.xlu1 %v2628_v0, %s8519_s19 }
 0x6ba   :  { %2696 = vrot.lane.b32.xlu0 %v2629_v55, %s8520_s20  ;;  %2694 = vrot.lane.b32.xlu1 %v2628_v0, %s8520_s20 }
 0x6be   :  { %2720 = vrot.lane.b32.xlu0 %v2629_v55, %s8521_s28  ;;  %2718 = vrot.lane.b32.xlu1 %v2628_v0, %s8521_s28 }
 0x6c2   :  { %2744 = vrot.lane.b32.xlu0 %v2629_v55, %s8522_s27  ;;  %2742 = vrot.lane.b32.xlu1 %v2628_v0, %s8522_s27 }
 0x6c6   :  { %2768 = vrot.lane.b32.xlu0 %v2629_v55, %s8523_s0  ;;  %2766 = vrot.lane.b32.xlu1 %v2628_v0, %s8523_s0 }
 0x6ca   :  { %2792 = vrot.lane.b32.xlu0 %v2629_v55, %s8524_s2  ;;  %2790 = vrot.lane.b32.xlu1 %v2628_v0, %s8524_s2 }
 0x6ce   :  { %2816 = vrot.lane.b32.xlu0 %v2629_v55, %s8525_s29  ;;  %2814 = vrot.lane.b32.xlu1 %v2628_v0, %s8525_s29 }
 0x6d2   :  { %2840 = vrot.lane.b32.xlu0 %v2629_v55, %s8512_s30  ;;  %2838 = vrot.lane.b32.xlu1 %v2628_v0, %s8512_s30 }
 0x6d6   :  { %2864 = vrot.lane.b32.xlu0 %v2629_v55, %s8513_s18  ;;  %2862 = vrot.lane.b32.xlu1 %v2628_v0, %s8513_s18 }
 0x6da   :  { %2888 = vrot.lane.b32.xlu0 %v2629_v55, %s8514_s1  ;;  %2886 = vrot.lane.b32.xlu1 %v2628_v0, %s8514_s1 }
 0x6de   :  { %2912 = vrot.lane.b32.xlu0 %v2629_v55, %s8515_s23  ;;  %2910 = vrot.lane.b32.xlu1 %v2628_v0, %s8515_s23 }
 0x6e2   :  { %2936 = vrot.lane.b32.xlu0 %v2629_v55, %s8516_s24  ;;  %2934 = vrot.lane.b32.xlu1 %v2628_v0, %s8516_s24 }
 0x6e6   :  { %2960 = vrot.lane.b32.xlu0 %v2629_v55, %s8517_s25  ;;  %2958 = vrot.lane.b32.xlu1 %v2628_v0, %s8517_s25 }
 0x6ea   :  { %2984 = vrot.lane.b32.xlu0 %v2629_v55, %s8526_s22  ;;  %2982 = vrot.lane.b32.xlu1 %v2628_v0, %s8526_s22 }
 0x6ee   :  { %2634 = vperm.xlu0 %6235, %v2629_v55   ;;  %2631 = vperm.xlu1 %6236, %v2628_v0  }
 0x72d   :  { %v2505_v37 = vpop.permute.xlu0 %2504  ;;  %v2495_v52 = vpop.permute.xlu1 %2494 }
 0x72e   :  { %v2507_v9 = vmul.f32 %v2505_v37, %v2500_v46  ;;  %v2508_v53 = vmul.f32 %v2505_v37, %v2501_v47  ;;  %v2497_v54 = vmul.f32 %v2495_v52, %v2490_v48  ;;  %v2498_v63 = vmul.f32 %v2495_v52, %v2491_v49  ;;  %v5243_v37 = vld [vmem:[%s8450_s3 + $0x34] sm:$0xf]  ;;  %v5242_v52 = vld [vmem:[%s8450_s3 + $0x30] sm:$0xf] }
 0x730   :  { %v2509_v57 = vadd.f32 %v2507_v9, %v2497_v54  ;;  %v2510_v16 = vadd.f32 %v2508_v53, %v2498_v63  ;;  %v5248_v9 = vcombine.low %v5242_v52, %v5243_v37 }
 0x731   :  { %v2649_v60 = vpop.permute.xlu0 %2648  ;;  %v2647_v2 = vpop.permute.xlu1 %2646 }
 0x732   :  { %v7604_v6 = vmax.f32 %v2509_v57, 0.0  ;;  %v7606_v13 = vmax.f32 %v2510_v16, 0.0  ;;  %vm2651_vm8 = vcmp.ne.s32.totalorder %v2649_v60, 0  ;;  %vm2650_vm9 = vcmp.ne.s32.totalorder %v2647_v2, 0  ;;  %v6365_v16 = vld [vmem:[%s8450_s3 + $0x38] sm:$0xff]  }
 0x733   :  { %v2653_v36 = vsel %vm2651_vm8, 1, %v6548_v4  ;;  %v2652_v58 = vsel %vm2650_vm9, 1, %v6548_v4 }
 0x734   :  { %2658 = vperm.xlu0 %6235, %v2653_v36   ;;  %2655 = vperm.xlu1 %6236, %v2652_v58   ;;  %v7612_v7 = vpack.c.bf16 %v7606_v13, %v7604_v6 }
 0x735   :  { %v2673_v12 = vpop.permute.xlu0 %2672  ;;  %v2671_v11 = vpop.permute.xlu1 %2670 }
 0x736   :  { %vm2675_vm10 = vcmp.ne.s32.totalorder %v2673_v12, 0  ;;  %vm2674_vm11 = vcmp.ne.s32.totalorder %v2671_v11, 0  ;;  %6064 = vmatprep.subr.bf16.mxu1 %v7612_v7 }
 0x737   :  { %v2677_v23 = vsel %vm2675_vm10, 1, %v6548_v4  ;;  %v2676_v41 = vsel %vm2674_vm11, 1, %v6548_v4  ;;  %6065 = vmatpush3.bf16.msra.mxu1 %v7612_v7 }
 0x738   :  { %2682 = vperm.xlu0 %6235, %v2677_v23   ;;  %2679 = vperm.xlu1 %6236, %v2676_v41   ;;  %v5255_v41 = vld [vmem:[%s8451_s4 + $0x28] sm:$0xff] }
 0x739   :  { %v2697_v15 = vpop.permute.xlu0 %2696  ;;  %v2695_v38 = vpop.permute.xlu1 %2694 }
 0x73a   :  { %vm2699_vm13 = vcmp.ne.s32.totalorder %v2697_v15, 0  ;;  %vm2698_vm14 = vcmp.ne.s32.totalorder %v2695_v38, 0  ;;  %6067 = vmatmul.mubr.msk.bf16.vlgmr.msra.gmra.mrb[20].mxu1 %vm208_vm12, %v6363_v19  ;;  %v5254_v15 = vld [vmem:[%s8451_s4 + $0x20] sm:$0xff] }
 0x73b   :  { %v2701_v22 = vsel %vm2699_vm13, 1, %v6548_v4  ;;  %v2700_v14 = vsel %vm2698_vm14, 1, %v6548_v4  ;;  %6070 = vmatprep.mubr.msk.bf16.mxu1 %vm208_vm12, %v5248_v9  ;;  %v6387_v9 = vld [vmem:[%s8454_s7 + $0x1f8] sm:$0xff]  }
 0x73c   :  { %2706 = vperm.xlu0 %6235, %v2701_v22   ;;  %2703 = vperm.xlu1 %6236, %v2700_v14  }
 0x73d   :  { %v2721_v21 = vpop.permute.xlu0 %2720  ;;  %v2719_v8 = vpop.permute.xlu1 %2718 }
 0x73e   :  { %vm2723_vm15 = vcmp.ne.s32.totalorder %v2721_v21, 0  ;;  %vm2722_vm0 = vcmp.ne.s32.totalorder %v2719_v8, 0 }
 0x73f   :  { %v2725_v34 = vsel %vm2723_vm15, 1, %v6548_v4  ;;  %v2724_v18 = vsel %vm2722_vm0, 1, %v6548_v4 }
 0x740   :  { %2730 = vperm.xlu0 %6235, %v2725_v34   ;;  %2727 = vperm.xlu1 %6236, %v2724_v18  }
 0x741   :  { %v2745_v28 = vpop.permute.xlu0 %2744  ;;  %v2743_v30 = vpop.permute.xlu1 %2742 }
 0x742   :  { %vm2747_vm1 = vcmp.ne.s32.totalorder %v2745_v28, 0  ;;  %vm2746_vm3 = vcmp.ne.s32.totalorder %v2743_v30, 0  ;;  %6071 = vmatmul.mubr.msk.bf16.gmra.mrb[24].mxu1 %vm208_vm12, %v6365_v16  ;;  %vm3010_vm12 = vcmp.gt.f32.partialorder %v5255_v41, 0.0 }
 0x743   :  { %v2749_v32 = vsel %vm2747_vm1, 1, %v6548_v4  ;;  %v2748_v20 = vsel %vm2746_vm3, 1, %v6548_v4 }
 0x744   :  { %2754 = vperm.xlu0 %6235, %v2749_v32   ;;  %2751 = vperm.xlu1 %6236, %v2748_v20   ;;  %v3012_v20 = vsel %vm3010_vm12, 1, %v6548_v4 }
 0x745   :  { %v2769_v40 = vpop.permute.xlu0 %2768  ;;  %v2767_v61 = vpop.permute.xlu1 %2766 }
 0x746   :  { %vm2771_vm5 = vcmp.ne.s32.totalorder %v2769_v40, 0  ;;  %vm2770_vm6 = vcmp.ne.s32.totalorder %v2767_v61, 0 }
 0x747   :  { %v2773_v33 = vsel %vm2771_vm5, 1, %v6548_v4  ;;  %v2772_v31 = vsel %vm2770_vm6, 1, %v6548_v4 }
 0x748   :  { %2778 = vperm.xlu0 %6235, %v2773_v33   ;;  %2775 = vperm.xlu1 %6236, %v2772_v31   ;;  %v6366_v31 = vld [vmem:[%s8454_s7 + $0x1c0] sm:$0xff]  }
 0x749   :  { %v2793_v35 = vpop.permute.xlu0 %2792  ;;  %v2791_v45 = vpop.permute.xlu1 %2790  ;;  %5761 = vmatprep.subr.bf16.mxu1 %v6366_v31 }
 0x74a   :  { %vm2795_vm7 = vcmp.ne.s32.totalorder %v2793_v35, 0  ;;  %vm2794_vm8 = vcmp.ne.s32.totalorder %v2791_v45, 0  ;;  %v6367_v35 = vld [vmem:[%s8454_s7 + $0x180] sm:$0xff]  }
 0x74b   :  { %v2797_v39 = vsel %vm2795_vm7, 1, %v6548_v4  ;;  %v2796_v42 = vsel %vm2794_vm8, 1, %v6548_v4  ;;  %vm3622_vm8 = vcmp.gt.bf16.partialorder %v5243_v37, 0  ;;  %v6368_v45 = vld [vmem:[%s8454_s7 + $0x200] sm:$0xff]   ;;  %5762 = vmatpush3.bf16.msra.mxu1 %v6367_v35  ;;  %v6385_v37 = vld [vmem:[%s8454_s7 + $0x1b0] sm:$0xff]  }
 0x74c   :  { %2802 = vperm.xlu0 %6235, %v2797_v39   ;;  %2799 = vperm.xlu1 %6236, %v2796_v42   ;;  %v3624_v14 = vsel %vm3622_vm8, 65537, %v6548_v4  ;;  %v6369_v39 = vld [vmem:[%s8454_s7 + $0x1c8] sm:$0xff]  }
 0x74d   :  { %v2817_v43 = vpop.permute.xlu0 %2816  ;;  %v2815_v51 = vpop.permute.xlu1 %2814  ;;  %v3626_v18 = vunpack.c.l.b16 %v3624_v14  ;;  %6075 = vmatpush3.bf16.msra.mxu0 %v6368_v45  ;;  %5763 = vmatprep.subr.bf16.mxu1 %v6369_v39  ;;  %v6370_v42 = vld [vmem:[%s8454_s7 + $0x188] sm:$0xff]   ;;  %v7853_v45 = vrot.slane %v7604_v6, %v6942_v56 }
 0x74e   :  { %vm2819_vm9 = vcmp.ne.s32.totalorder %v2817_v43, 0  ;;  %vm2818_vm10 = vcmp.ne.s32.totalorder %v2815_v51, 0  ;;  %6076 = vmatprep.subr.bf16.mxu0 %v6547_v1  ;;  %v6371_v43 = vld [vmem:[%s8454_s7 + $0x208] sm:$0xff]   ;;  %v6372_v51 = vld [vmem:[%s8454_s7 + $0x1d0] sm:$0xff]  }
 0x74f   :  { %v2821_v44 = vsel %vm2819_vm9, 1, %v6548_v4  ;;  %v2820_v27 = vsel %vm2818_vm10, 1, %v6548_v4  ;;  %vm3621_vm9 = vcmp.gt.bf16.partialorder %v5242_v52, 0  ;;  %5764 = vmatpush3.bf16.msra.mxu1 %v6370_v42  ;;  %v6386_v52 = vld [vmem:[%s8454_s7 + $0x230] sm:$0xff]  }
 0x750   :  { %2826 = vperm.xlu0 %6235, %v2821_v44   ;;  %2823 = vperm.xlu1 %6236, %v2820_v27   ;;  %v3623_v21 = vsel %vm3621_vm9, 65537, %v6548_v4  ;;  %v6373_v44 = vld [vmem:[%s8454_s7 + $0x190] sm:$0xff]  }
 0x751   :  { %v2841_v3 = vpop.permute.xlu0 %2840  ;;  %v2839_v24 = vpop.permute.xlu1 %2838  ;;  %v3625_v28 = vunpack.c.l.b16 %v3623_v21  ;;  %6077 = vmatpush3.bf16.msra.mxu0 %v6371_v43  ;;  %5765 = vmatprep.subr.bf16.mxu1 %v6372_v51  ;;  %v6374_v27 = vld [vmem:[%s8454_s7 + $0x210] sm:$0xff]  }
 0x752   :  { %vm2843_vm11 = vcmp.ne.s32.totalorder %v2841_v3, 0  ;;  %vm2842_vm13 = vcmp.ne.s32.totalorder %v2839_v24, 0  ;;  %6078 = vmatprep.subr.bf16.mxu0 %v6547_v1  ;;  %v6375_v3 = vld [vmem:[%s8454_s7 + $0x1d8] sm:$0xff]  }
 0x753   :  { %v2845_v25 = vsel %vm2843_vm11, 1, %v6548_v4  ;;  %v2844_v55 = vsel %vm2842_vm13, 1, %v6548_v4  ;;  %vm3009_vm13 = vcmp.gt.f32.partialorder %v5254_v15, 0.0  ;;  %5766 = vmatpush3.bf16.msra.mxu1 %v6373_v44  ;;  %v6376_v24 = vld [vmem:[%s8454_s7 + $0x198] sm:$0xff]   ;;  %v7863_v44 = vrot.slane %v7604_v6, %v6945_v59 }
 0x754   :  { %2850 = vperm.xlu0 %6235, %v2845_v25   ;;  %2847 = vperm.xlu1 %6236, %v2844_v55   ;;  %v3011_v40 = vsel %vm3009_vm13, 1, %v6548_v4  ;;  %v6377_v25 = vld [vmem:[%s8454_s7 + $0x218] sm:$0xff]   ;;  %v6378_v55 = vld [vmem:[%s8454_s7 + $0x1e0] sm:$0xff]  }
 0x755   :  { %v2865_v0 = vpop.permute.xlu0 %2864  ;;  %v2863_v26 = vpop.permute.xlu1 %2862  ;;  %6079 = vmatpush3.bf16.msra.mxu0 %v6374_v27  ;;  %5767 = vmatprep.subr.bf16.mxu1 %v6375_v3 }
 0x756   :  { %vm2867_vm14 = vcmp.ne.s32.totalorder %v2865_v0, 0  ;;  %vm2866_vm15 = vcmp.ne.s32.totalorder %v2863_v26, 0  ;;  %6080 = vmatprep.subr.bf16.mxu0 %v6547_v1  ;;  %v6379_v0 = vld [vmem:[%s8454_s7 + $0x1a0] sm:$0xff]  }
 0x757   :  { %v2869_v46 = vsel %vm2867_vm14, 1, %v6548_v4  ;;  %v2868_v47 = vsel %vm2866_vm15, 1, %v6548_v4  ;;  %5768 = vmatpush3.bf16.msra.mxu1 %v6376_v24  ;;  %v6380_v26 = vld [vmem:[%s8454_s7 + $0x220] sm:$0xff]  }
 0x758   :  { %2874 = vperm.xlu0 %6235, %v2869_v46   ;;  %2871 = vperm.xlu1 %6236, %v2868_v47   ;;  %v6381_v46 = vld [vmem:[%s8454_s7 + $0x1e8] sm:$0xff]  }
 0x759   :  { %v2889_v48 = vpop.permute.xlu0 %2888  ;;  %v2887_v49 = vpop.permute.xlu1 %2886  ;;  %6081 = vmatpush3.bf16.msra.mxu0 %v6377_v25  ;;  %5769 = vmatprep.subr.bf16.mxu1 %v6378_v55  ;;  %v6382_v47 = vld [vmem:[%s8454_s7 + $0x1a8] sm:$0xff]   ;;  %v7869_v55 = vrot.slane %v7604_v6, %v6954_v62 }
 0x75a   :  { %vm2891_vm0 = vcmp.ne.s32.totalorder %v2889_v48, 0  ;;  %vm2890_vm1 = vcmp.ne.s32.totalorder %v2887_v49, 0  ;;  %6082 = vmatprep.subr.bf16.mxu0 %v6547_v1  ;;  %v6383_v48 = vld [vmem:[%s8454_s7 + $0x228] sm:$0xff]   ;;  %v6384_v49 = vld [vmem:[%s8454_s7 + $0x1f0] sm:$0xff]  }
 0x75b   :  { %v2893_v53 = vsel %vm2891_vm0, 1, %v6548_v4  ;;  %v2892_v54 = vsel %vm2890_vm1, 1, %v6548_v4  ;;  %vm3628_vm0 = vcmp.ne.s32.totalorder %v3626_v18, 0  ;;  %vm3627_vm1 = vcmp.ne.s32.totalorder %v3625_v28, 0  ;;  %5770 = vmatpush3.bf16.msra.mxu1 %v6379_v0 }
 0x75c   :  { %2898 = vperm.xlu0 %6235, %v2893_v53   ;;  %2895 = vperm.xlu1 %6236, %v2892_v54   ;;  %v7670_v61 = vsel %vm3628_vm0, 1, %v6548_v4  ;;  %v7673_v33 = vsel %vm3627_vm1, 1, %v6548_v4  ;;  %v6388_v53 = vld [vmem:[%s8454_s7 + $0x1b8] sm:$0xff]  }
 0x75d   :  { %v2913_v63 = vpop.permute.xlu0 %2912  ;;  %v2911_v57 = vpop.permute.xlu1 %2910  ;;  %6083 = vmatpush3.bf16.msra.mxu0 %v6380_v26  ;;  %5771 = vmatprep.subr.bf16.mxu1 %v6381_v46  ;;  %v6389_v54 = vld [vmem:[%s8454_s7 + $0x238] sm:$0xff]  }
 0x75e   :  { %vm2915_vm3 = vcmp.ne.s32.totalorder %v2913_v63, 0  ;;  %vm2914_vm5 = vcmp.ne.s32.totalorder %v2911_v57, 0  ;;  %6084 = vmatprep.subr.bf16.mxu0 %v6547_v1 }
 0x75f   :  { %v2917_v60 = vsel %vm2915_vm3, 1, %v6548_v4  ;;  %v2916_v2 = vsel %vm2914_vm5, 1, %v6548_v4  ;;  %5772 = vmatpush3.bf16.msra.mxu1 %v6382_v47 }
 0x760   :  { %2922 = vperm.xlu0 %6235, %v2917_v60   ;;  %2919 = vperm.xlu1 %6236, %v2916_v2  }
 0x761   :  { %v2937_v36 = vpop.permute.xlu0 %2936  ;;  %v2935_v58 = vpop.permute.xlu1 %2934  ;;  %6085 = vmatpush3.bf16.msra.mxu0 %v6383_v48  ;;  %5773 = vmatprep.subr.bf16.mxu1 %v6384_v49 }
 0x762   :  { %vm2939_vm6 = vcmp.ne.s32.totalorder %v2937_v36, 0  ;;  %vm2938_vm7 = vcmp.ne.s32.totalorder %v2935_v58, 0  ;;  %6086 = vmatprep.subr.bf16.mxu0 %v6547_v1 }
 0x763   :  { %v2941_v12 = vsel %vm2939_vm6, 1, %v6548_v4  ;;  %v2940_v11 = vsel %vm2938_vm7, 1, %v6548_v4  ;;  %5774 = vmatpush3.bf16.msra.mxu1 %v6385_v37  ;;  %v7879_v37 = vrot.slane %v7604_v6, %v6964_v5 }
 0x764   :  { %2946 = vperm.xlu0 %6235, %v2941_v12   ;;  %2943 = vperm.xlu1 %6236, %v2940_v11  }
 0x765   :  { %v2961_v19 = vpop.permute.xlu0 %2960  ;;  %v2959_v23 = vpop.permute.xlu1 %2958  ;;  %6087 = vmatpush3.bf16.msra.mxu0 %v6386_v52  ;;  %5775 = vmatprep.subr.bf16.mxu1 %v6387_v9 }
 0x766   :  { %vm2963_vm10 = vcmp.ne.s32.totalorder %v2961_v19, 0  ;;  %vm2962_vm11 = vcmp.ne.s32.totalorder %v2959_v23, 0  ;;  %6088 = vmatprep.subr.bf16.mxu0 %v6547_v1 }
 0x767   :  { %v2965_v38 = vsel %vm2963_vm10, 1, %v6548_v4  ;;  %v2964_v22 = vsel %vm2962_vm11, 1, %v6548_v4  ;;  %5776 = vmatpush3.bf16.msra.mxu1 %v6388_v53 }
 0x768   :  { %2970 = vperm.xlu0 %6235, %v2965_v38   ;;  %2967 = vperm.xlu1 %6236, %v2964_v22  }
 0x769   :  { %v2985_v8 = vpop.permute.xlu0 %2984  ;;  %v2983_v34 = vpop.permute.xlu1 %2982  ;;  %6089 = vmatpush3.bf16.msra.mxu0 %v6389_v54  ;;  %6094 = vmatprep.subr.bf16.mxu1 %v6547_v1 }
 0x76a   :  { %vm2987_vm14 = vcmp.ne.s32.totalorder %v2985_v8, 0  ;;  %vm2986_vm15 = vcmp.ne.s32.totalorder %v2983_v34, 0 }
 0x76b   :  { %v2989_v30 = vsel %vm2987_vm14, 1, %v6548_v4  ;;  %v2988_v32 = vsel %vm2986_vm15, 1, %v6548_v4 }
 0x76c   :  { %2994 = vperm.xlu0 %6235, %v2989_v30   ;;  %2991 = vperm.xlu1 %6236, %v2988_v32  }
 0x76d   :  { %v2635_v63 = vpop.permute.xlu0 %2634  ;;  %v2632_v57 = vpop.permute.xlu1 %2631 }
 0x76e   :  { %vm2637_vm3 = vcmp.eq.s32.totalorder %v2635_v63, 1  ;;  %vm2636_vm5 = vcmp.eq.s32.totalorder %v2632_v57, 1  ;;  %v7885_v63 = vrot.slane %v7604_v6, %v6973_v10 }
 0x770   :  { %3017 = vperm.xlu0 %6235, %v3012_v20   ;;  %3014 = vperm.xlu1 %6236, %v3011_v40  }
 0x774   :  { %3645 = vrot.lane.b32.xlu0 %v7670_v61, %s8518_s21  ;;  %3643 = vrot.lane.b32.xlu1 %v7673_v33, %s8518_s21 }
 0x778   :  { %3665 = vrot.lane.b32.xlu0 %v7670_v61, %s8519_s19  ;;  %3663 = vrot.lane.b32.xlu1 %v7673_v33, %s8519_s19  ;;  %s8528_s19 = sld [smem:[#allocation9_spill]] }
 0x77c   :  { %3685 = vrot.lane.b32.xlu0 %v7670_v61, %s8520_s20  ;;  %3683 = vrot.lane.b32.xlu1 %v7673_v33, %s8520_s20 }
 0x780   :  { %3705 = vrot.lane.b32.xlu0 %v7670_v61, %s8521_s28  ;;  %3703 = vrot.lane.b32.xlu1 %v7673_v33, %s8521_s28 }
 0x784   :  { %3725 = vrot.lane.b32.xlu0 %v7670_v61, %s8522_s27  ;;  %3723 = vrot.lane.b32.xlu1 %v7673_v33, %s8522_s27 }
 0x788   :  { %3745 = vrot.lane.b32.xlu0 %v7670_v61, %s8523_s0  ;;  %3743 = vrot.lane.b32.xlu1 %v7673_v33, %s8523_s0 }
 0x78c   :  { %3765 = vrot.lane.b32.xlu0 %v7670_v61, %s8524_s2  ;;  %3763 = vrot.lane.b32.xlu1 %v7673_v33, %s8524_s2 }
 0x790   :  { %3785 = vrot.lane.b32.xlu0 %v7670_v61, %s8525_s29  ;;  %3783 = vrot.lane.b32.xlu1 %v7673_v33, %s8525_s29 }
 0x794   :  { %3805 = vrot.lane.b32.xlu0 %v7670_v61, %s8512_s30  ;;  %3803 = vrot.lane.b32.xlu1 %v7673_v33, %s8512_s30  ;;  %s8527_s30 = sld [smem:[#allocation10_spill]] }
 0x798   :  { %3825 = vrot.lane.b32.xlu0 %v7670_v61, %s8513_s18  ;;  %3823 = vrot.lane.b32.xlu1 %v7673_v33, %s8513_s18 }
 0x79c   :  { %3845 = vrot.lane.b32.xlu0 %v7670_v61, %s8514_s1  ;;  %3843 = vrot.lane.b32.xlu1 %v7673_v33, %s8514_s1 }
 0x7a0   :  { %3865 = vrot.lane.b32.xlu0 %v7670_v61, %s8515_s23  ;;  %3863 = vrot.lane.b32.xlu1 %v7673_v33, %s8515_s23 }
 0x7a4   :  { %3885 = vrot.lane.b32.xlu0 %v7670_v61, %s8516_s24  ;;  %3883 = vrot.lane.b32.xlu1 %v7673_v33, %s8516_s24 }
 0x7a8   :  { %3905 = vrot.lane.b32.xlu0 %v7670_v61, %s8517_s25  ;;  %3903 = vrot.lane.b32.xlu1 %v7673_v33, %s8517_s25 }
 0x7ac   :  { %3925 = vrot.lane.b32.xlu0 %v7670_v61, %s8526_s22  ;;  %3923 = vrot.lane.b32.xlu1 %v7673_v33, %s8526_s22 }
 0x7b0   :  { %3635 = vperm.xlu0 %6235, %v7670_v61   ;;  %3632 = vperm.xlu1 %6236, %v7673_v33   ;;  %v7847_v33 = vrot.slane %v7604_v6, %v6924_v50 }
 0x7b2   :  { %v2643_v31 = vsel %vm2637_vm3, %v7847_v33, -3e+38  ;;  %v2642_v35 = vsel %vm2636_vm5, %v7847_v33, -3e+38 }
 0x7b3   :  { %v2659_v16 = vpop.permute.xlu0 %2658  ;;  %v2656_v60 = vpop.permute.xlu1 %2655  ;;  %v2645_v27 = vmax.f32 %v2643_v31, -3e+38  ;;  %v2644_v3 = vmax.f32 %v2642_v35, -3e+38 }
 0x7b4   :  { %vm2661_vm6 = vcmp.eq.s32.totalorder %v2659_v16, 1  ;;  %vm2660_vm7 = vcmp.eq.s32.totalorder %v2656_v60, 1 }
 0x7b5   :  { %v2667_v43 = vsel %vm2661_vm6, %v7853_v45, -3e+38  ;;  %v2666_v51 = vsel %vm2660_vm7, %v7853_v45, -3e+38 }
 0x7b6   :  { %v2669_v0 = vmax.f32 %v2645_v27, %v2667_v43  ;;  %v2668_v26 = vmax.f32 %v2644_v3, %v2666_v51 }
 0x7b7   :  { %v2683_v2 = vpop.permute.xlu0 %2682  ;;  %v2680_v36 = vpop.permute.xlu1 %2679 }
 0x7b8   :  { %vm2685_vm8 = vcmp.eq.s32.totalorder %v2683_v2, 1  ;;  %vm2684_vm9 = vcmp.eq.s32.totalorder %v2680_v36, 1 }
 0x7b9   :  { %v2691_v24 = vsel %vm2685_vm8, %v7863_v44, -3e+38  ;;  %v2690_v25 = vsel %vm2684_vm9, %v7863_v44, -3e+38 }
 0x7ba   :  { %v2693_v52 = vmax.f32 %v2669_v0, %v2691_v24  ;;  %v2692_v9 = vmax.f32 %v2668_v26, %v2690_v25 }
 0x7bb   :  { %v2707_v58 = vpop.permute.xlu0 %2706  ;;  %v2704_v12 = vpop.permute.xlu1 %2703 }
 0x7bc   :  { %vm2709_vm10 = vcmp.eq.s32.totalorder %v2707_v58, 1  ;;  %vm2708_vm11 = vcmp.eq.s32.totalorder %v2704_v12, 1  ;;  %v7897_v12 = vrot.slane %v7604_v6, %v6982_v17 }
 0x7bd   :  { %v2715_v48 = vsel %vm2709_vm10, %v7869_v55, -3e+38  ;;  %v2714_v49 = vsel %vm2708_vm11, %v7869_v55, -3e+38 }
 0x7be   :  { %v2717_v57 = vmax.f32 %v2693_v52, %v2715_v48  ;;  %v2716_v16 = vmax.f32 %v2692_v9, %v2714_v49 }
 0x7bf   :  { %v2731_v11 = vpop.permute.xlu0 %2730  ;;  %v2728_v19 = vpop.permute.xlu1 %2727 }
 0x7c0   :  { %vm2733_vm12 = vcmp.eq.s32.totalorder %v2731_v11, 1  ;;  %vm2732_vm13 = vcmp.eq.s32.totalorder %v2728_v19, 1 }
 0x7c1   :  { %v2739_v53 = vsel %vm2733_vm12, %v7879_v37, -3e+38  ;;  %v2738_v54 = vsel %vm2732_vm13, %v7879_v37, -3e+38 }
 0x7c2   :  { %v2741_v11 = vmax.f32 %v2717_v57, %v2739_v53  ;;  %v2740_v19 = vmax.f32 %v2716_v16, %v2738_v54  ;;  %v7937_v57 = vrot.slane %v7606_v13, %v6945_v59 }
 0x7c3   :  { %v2755_v23 = vpop.permute.xlu0 %2754  ;;  %v2752_v41 = vpop.permute.xlu1 %2751 }
 0x7c4   :  { %vm2757_vm14 = vcmp.eq.s32.totalorder %v2755_v23, 1  ;;  %vm2756_vm15 = vcmp.eq.s32.totalorder %v2752_v41, 1 }
 0x7c5   :  { %v2763_v36 = vsel %vm2757_vm14, %v7885_v63, -3e+38  ;;  %v2762_v58 = vsel %vm2756_vm15, %v7885_v63, -3e+38 }
 0x7c6   :  { %v2764_v31 = vmax.f32 %v2740_v19, %v2762_v58 }
 0x7c7   :  { %v7817_v15 = vpop.permute.xlu0 %2778  ;;  %v7819_v38 = vpop.permute.xlu1 %2775 }
 0x7c8   :  { %vm2781_vm0 = vcmp.eq.s32.totalorder %v7817_v15, 1  ;;  %vm2780_vm1 = vcmp.eq.s32.totalorder %v7819_v38, 1  ;;  %v7905_v15 = vrot.slane %v7604_v6, %v6991_v29  ;;  %v2765_v38 = vmax.f32 %v2741_v11, %v2763_v36 }
 0x7c9   :  { %v2787_v23 = vsel %vm2781_vm0, %v7897_v12, -3e+38  ;;  %v2786_v41 = vsel %vm2780_vm1, %v7897_v12, -3e+38  ;;  %v7917_v6 = vrot.slane %v7606_v13, %v6924_v50  ;;  %v7927_v50 = vrot.slane %v7606_v13, %v6942_v56 }
 0x7ca   :  { %v2789_v27 = vmax.f32 %v2765_v38, %v2787_v23  ;;  %v7947_v23 = vrot.slane %v7606_v13, %v6954_v62 }
 0x7cb   :  { %v7821_v22 = vpop.permute.xlu0 %2802  ;;  %v7823_v14 = vpop.permute.xlu1 %2799 }
 0x7cc   :  { %vm2805_vm3 = vcmp.eq.s32.totalorder %v7821_v22, 1  ;;  %vm2804_vm5 = vcmp.eq.s32.totalorder %v7823_v14, 1  ;;  %v2788_v14 = vmax.f32 %v2764_v31, %v2786_v41 }
 0x7cd   :  { %v2811_v51 = vsel %vm2805_vm3, %v7905_v15, -3e+38  ;;  %v2810_v22 = vsel %vm2804_vm5, %v7905_v15, -3e+38 }
 0x7ce   :  { %v2813_v3 = vmax.f32 %v2789_v27, %v2811_v51  ;;  %v2812_v24 = vmax.f32 %v2788_v14, %v2810_v22  ;;  %v7957_v27 = vrot.slane %v7606_v13, %v6964_v5  ;;  %v7961_v14 = vrot.slane %v7606_v13, %v6973_v10 }
 0x7cf   :  { %v7825_v21 = vpop.permute.xlu0 %2826  ;;  %v7827_v8 = vpop.permute.xlu1 %2823 }
 0x7d0   :  { %vm2829_vm6 = vcmp.eq.s32.totalorder %v7825_v21, 1  ;;  %vm2828_vm7 = vcmp.eq.s32.totalorder %v7827_v8, 1 }
 0x7d1   :  { %v2835_v26 = vsel %vm2829_vm6, %v7917_v6, -3e+38  ;;  %v2834_v48 = vsel %vm2828_vm7, %v7917_v6, -3e+38 }
 0x7d2   :  { %v2837_v49 = vmax.f32 %v2813_v3, %v2835_v26  ;;  %v2836_v52 = vmax.f32 %v2812_v24, %v2834_v48  ;;  %v7975_v26 = vrot.slane %v7606_v13, %v6982_v17  ;;  %v7979_v48 = vrot.slane %v7606_v13, %v6991_v29 }
 0x7d3   :  { %v7829_v34 = vpop.permute.xlu0 %2850  ;;  %v7831_v18 = vpop.permute.xlu1 %2847 }
 0x7d4   :  { %vm2853_vm10 = vcmp.eq.s32.totalorder %v7829_v34, 1  ;;  %vm2852_vm11 = vcmp.eq.s32.totalorder %v7831_v18, 1 }
 0x7d5   :  { %v2859_v54 = vsel %vm2853_vm10, %v7927_v50, -3e+38  ;;  %v2858_v34 = vsel %vm2852_vm11, %v7927_v50, -3e+38 }
 0x7d6   :  { %v2861_v16 = vmax.f32 %v2837_v49, %v2859_v54  ;;  %v2860_v36 = vmax.f32 %v2836_v52, %v2858_v34 }
 0x7d7   :  { %v7833_v28 = vpop.permute.xlu0 %2874  ;;  %v7835_v30 = vpop.permute.xlu1 %2871 }
 0x7d8   :  { %vm2877_vm14 = vcmp.eq.s32.totalorder %v7833_v28, 1  ;;  %vm2876_vm15 = vcmp.eq.s32.totalorder %v7835_v30, 1 }
 0x7d9   :  { %v2883_v19 = vsel %vm2877_vm14, %v7937_v57, -3e+38  ;;  %v2882_v28 = vsel %vm2876_vm15, %v7937_v57, -3e+38 }
 0x7da   :  { %v2885_v41 = vmax.f32 %v2861_v16, %v2883_v19  ;;  %v2884_v38 = vmax.f32 %v2860_v36, %v2882_v28 }
 0x7db   :  { %v7837_v32 = vpop.permute.xlu0 %2898  ;;  %v7839_v20 = vpop.permute.xlu1 %2895 }
 0x7dc   :  { %vm2901_vm3 = vcmp.eq.s32.totalorder %v7837_v32, 1  ;;  %vm2900_vm5 = vcmp.eq.s32.totalorder %v7839_v20, 1 }
 0x7dd   :  { %v2907_v22 = vsel %vm2901_vm3, %v7947_v23, -3e+38  ;;  %v2906_v32 = vsel %vm2900_vm5, %v7947_v23, -3e+38 }
 0x7de   :  { %v2909_v3 = vmax.f32 %v2885_v41, %v2907_v22  ;;  %v2908_v24 = vmax.f32 %v2884_v38, %v2906_v32 }
 0x7df   :  { %v7841_v40 = vpop.permute.xlu0 %2922  ;;  %v7843_v61 = vpop.permute.xlu1 %2919 }
 0x7e3   :  { %v7855_v39 = vpop.permute.xlu0 %2946  ;;  %v7857_v42 = vpop.permute.xlu1 %2943 }
 0x7e4   :  { %vm2949_vm10 = vcmp.eq.s32.totalorder %v7855_v39, 1  ;;  %vm2948_vm11 = vcmp.eq.s32.totalorder %v7857_v42, 1 }
 0x7e5   :  { %v2955_v39 = vsel %vm2949_vm10, %v7961_v14, -3e+38  ;;  %v2954_v42 = vsel %vm2948_vm11, %v7961_v14, -3e+38 }
 0x7e7   :  { %v7871_v46 = vpop.permute.xlu0 %2970  ;;  %v7873_v47 = vpop.permute.xlu1 %2967 }
 0x7e8   :  { %vm2973_vm14 = vcmp.eq.s32.totalorder %v7871_v46, 1  ;;  %vm2972_vm15 = vcmp.eq.s32.totalorder %v7873_v47, 1 }
 0x7e9   :  { %v2978_v17 = vsel %vm2972_vm15, %v7975_v26, -3e+38 }
 0x7eb   :  { %v7889_v60 = vpop.permute.xlu0 %2994  ;;  %v7891_v2 = vpop.permute.xlu1 %2991 }
 0x7ef   :  { %v7907_v35 = vpop.permute.xlu0 %3017  ;;  %v7909_v43 = vpop.permute.xlu1 %3014 }
 0x7f3   :  { %v3646_v25 = vpop.permute.xlu0 %3645  ;;  %v3644_v0 = vpop.permute.xlu1 %3643 }
 0x7f4   :  { %vm3648_vm8 = vcmp.ne.s32.totalorder %v3646_v25, 0  ;;  %vm3647_vm9 = vcmp.ne.s32.totalorder %v3644_v0, 0 }
 0x7f5   :  { %v3650_v21 = vsel %vm3648_vm8, 1, %v6548_v4  ;;  %v3649_v8 = vsel %vm3647_vm9, 1, %v6548_v4  ;;  %vm2925_vm8 = vcmp.eq.s32.totalorder %v7841_v40, 1  ;;  %vm2924_vm9 = vcmp.eq.s32.totalorder %v7843_v61, 1 }
 0x7f6   :  { %3655 = vperm.xlu0 %6235, %v3650_v21   ;;  %3652 = vperm.xlu1 %6236, %v3649_v8   ;;  %v2931_v25 = vsel %vm2925_vm8, %v7957_v27, -3e+38  ;;  %v2930_v0 = vsel %vm2924_vm9, %v7957_v27, -3e+38  ;;  %vm3020_vm8 = vcmp.eq.s32.totalorder %v7907_v35, 1  ;;  %vm3019_vm9 = vcmp.eq.s32.totalorder %v7909_v43, 1 }
 0x7f7   :  { %v3666_v9 = vpop.permute.xlu0 %3665  ;;  %v3664_v53 = vpop.permute.xlu1 %3663  ;;  %v2933_v21 = vmax.f32 %v2909_v3, %v2931_v25  ;;  %v2932_v8 = vmax.f32 %v2908_v24, %v2930_v0  ;;  %v6392_v25 = vld [vmem:[%s8452_s5 + $0x90] sm:$0xff]  }
 0x7f8   :  { %vm3668_vm12 = vcmp.ne.s32.totalorder %v3666_v9, 0  ;;  %vm3667_vm13 = vcmp.ne.s32.totalorder %v3664_v53, 0  ;;  %v2979_v9 = vsel %vm2973_vm14, %v7975_v26, -3e+38 }
 0x7f9   :  { %v3670_v18 = vsel %vm3668_vm12, 1, %v6548_v4  ;;  %v3669_v56 = vsel %vm3667_vm13, 1, %v6548_v4  ;;  %v2957_v29 = vmax.f32 %v2933_v21, %v2955_v39  ;;  %v2956_v13 = vmax.f32 %v2932_v8, %v2954_v42  ;;  %v6393_v42 = vld [vmem:[%s8452_s5 + $0x98] sm:$0xff]  }
 0x7fa   :  { %3675 = vperm.xlu0 %6235, %v3670_v18   ;;  %3672 = vperm.xlu1 %6236, %v3669_v56  }
 0x7fb   :  { %v3686_v58 = vpop.permute.xlu0 %3685  ;;  %v3684_v11 = vpop.permute.xlu1 %3683  ;;  %v2981_v46 = vmax.f32 %v2957_v29, %v2979_v9  ;;  %v2980_v34 = vmax.f32 %v2956_v13, %v2978_v17  ;;  %v6394_v9 = vld [vmem:[%s8452_s5 + $0xa0] sm:$0xff]  }
 0x7fc   :  { %vm3688_vm0 = vcmp.ne.s32.totalorder %v3686_v58, 0  ;;  %vm3687_vm1 = vcmp.ne.s32.totalorder %v3684_v11, 0 }
 0x7fd   :  { %v3690_v30 = vsel %vm3688_vm0, 1, %v6548_v4  ;;  %v3689_v59 = vsel %vm3687_vm1, 1, %v6548_v4  ;;  %vm2997_vm0 = vcmp.eq.s32.totalorder %v7889_v60, 1  ;;  %vm2996_vm1 = vcmp.eq.s32.totalorder %v7891_v2, 1 }
 0x7fe   :  { %3695 = vperm.xlu0 %6235, %v3690_v30   ;;  %3692 = vperm.xlu1 %6236, %v3689_v59   ;;  %v3003_v2 = vsel %vm2997_vm0, %v7979_v48, -3e+38  ;;  %v3002_v54 = vsel %vm2996_vm1, %v7979_v48, -3e+38 }
 0x7ff   :  { %v3706_v31 = vpop.permute.xlu0 %3705  ;;  %v3704_v51 = vpop.permute.xlu1 %3703  ;;  %v3005_v47 = vmax.f32 %v2981_v46, %v3003_v2  ;;  %v3004_v16 = vmax.f32 %v2980_v34, %v3002_v54 }
 0x800   :  { %vm3708_vm6 = vcmp.ne.s32.totalorder %v3706_v31, 0  ;;  %vm3707_vm7 = vcmp.ne.s32.totalorder %v3704_v51, 0  ;;  %v6390_v31 = vld [vmem:[%s8452_s5 + $0x80] sm:$0xff]  }
 0x801   :  { %v3710_v20 = vsel %vm3708_vm6, 1, %v6548_v4  ;;  %v3709_v62 = vsel %vm3707_vm7, 1, %v6548_v4  ;;  %v5593_v51 = vpack.c.bf16 %v3005_v47, %v3004_v16  ;;  %v5407_v47 = vld [vmem:[%s8451_s4 + $0x38] sm:$0xff] }
 0x802   :  { %3715 = vperm.xlu0 %6235, %v3710_v20   ;;  %3712 = vperm.xlu1 %6236, %v3709_v62   ;;  %v6391_v62 = vld [vmem:[%s8452_s5 + $0x88] sm:$0xff]  }
 0x803   :  { %v3726_v40 = vpop.permute.xlu0 %3725  ;;  %v3724_v61 = vpop.permute.xlu1 %3723 }
 0x804   :  { %vm3728_vm12 = vcmp.ne.s32.totalorder %v3726_v40, 0  ;;  %vm3727_vm13 = vcmp.ne.s32.totalorder %v3724_v61, 0 }
 0x805   :  { %v3730_v5 = vsel %vm3728_vm12, 1, %v6548_v4  ;;  %v3729_v10 = vsel %vm3727_vm13, 1, %v6548_v4  ;;  %vm5592_vm12 = vmpackc.low %vm3020_vm8, %vm3019_vm9 }
 0x806   :  { %3735 = vperm.xlu0 %6235, %v3730_v5   ;;  %3732 = vperm.xlu1 %6236, %v3729_v10  }
 0x807   :  { %v3746_v49 = vpop.permute.xlu0 %3745  ;;  %v3744_v52 = vpop.permute.xlu1 %3743 }
 0x808   :  { %vm3748_vm3 = vcmp.ne.s32.totalorder %v3746_v49, 0  ;;  %vm3747_vm5 = vcmp.ne.s32.totalorder %v3744_v52, 0 }
 0x809   :  { %v3750_v53 = vsel %vm3748_vm3, 1, %v6548_v4  ;;  %v3749_v60 = vsel %vm3747_vm5, 1, %v6548_v4 }
 0x80a   :  { %3755 = vperm.xlu0 %6235, %v3750_v53   ;;  %3752 = vperm.xlu1 %6236, %v3749_v60   ;;  %v6395_v60 = vld [vmem:[%s8452_s5 + $0xa8] sm:$0xff]  }
 0x80b   :  { %v3766_v18 = vpop.permute.xlu0 %3765  ;;  %v3764_v56 = vpop.permute.xlu1 %3763 }
 0x80c   :  { %vm3768_vm6 = vcmp.ne.s32.totalorder %v3766_v18, 0  ;;  %vm3767_vm7 = vcmp.ne.s32.totalorder %v3764_v56, 0  ;;  %v6396_v18 = vld [vmem:[%s8452_s5 + $0xb0] sm:$0xff]  }
 0x80d   :  { %v3770_v36 = vsel %vm3768_vm6, 1, %v6548_v4  ;;  %v3769_v58 = vsel %vm3767_vm7, 1, %v6548_v4  ;;  %v6068_v11 = vpop.f32.mrb[20].mxu1 }
 0x80e   :  { %3775 = vperm.xlu0 %6235, %v3770_v36   ;;  %v2589_v19 = vpop.f32.mrb[21].mxu1  ;;  %3772 = vperm.xlu1 %6236, %v3769_v58   ;;  %v5406_v36 = vld [vmem:[%s8451_s4 + $0x30] sm:$0xff] }
 0x80f   :  { %v3786_v28 = vpop.permute.xlu0 %3785  ;;  %v6069_v30 = vpop.f32.mrb[22].mxu1 }
 0x810   :  { %vm3788_vm10 = vcmp.ne.s32.totalorder %v3786_v28, 0  ;;  %v3025_v59 = vpack.c.bf16 %v6069_v30, %v6068_v11  ;;  %v3784_v41 = vpop.permute.xlu1 %3783  ;;  %v2592_v38 = vpop.f32.mrb[23].mxu1  ;;  %v6398_v30 = vld [vmem:[%s8454_s7 + $0x280] sm:$0xff]  }
 0x811   :  { %v3790_v22 = vsel %vm3788_vm10, 1, %v6548_v4  ;;  %vm3787_vm11 = vcmp.ne.s32.totalorder %v3784_v41, 0  ;;  %v3027_v32 = vpack.c.bf16 %v2592_v38, %v2589_v19  ;;  %v6397_v19 = vld [vmem:[%s8452_s5 + $0xb8] sm:$0xff]  }
 0x812   :  { %v3789_v35 = vsel %vm3787_vm11, 1, %v6548_v4  ;;  %3795 = vperm.xlu0 %6235, %v3790_v22   ;;  %3265 = vmatprep.mubr.bf16.mxu1 %v3025_v59 }
 0x813   :  { %3792 = vperm.xlu1 %6236, %v3789_v35   ;;  %v3806_v43 = vpop.permute.xlu0 %3805  ;;  %5594 = vmatmul.mubr.msk.bf16.vlgmr.msra.gmra.mrb[28].mxu1 %vm5592_vm12, %v5593_v51  ;;  %vm3947_vm12 = vcmp.gt.f32.partialorder %v5407_v47, 0.0  ;;  %v6400_v51 = vld [vmem:[%s8454_s7 + $0x288] sm:$0xff]   ;;  %v6402_v35 = vld [vmem:[%s8454_s7 + $0x290] sm:$0xff]  }
 0x814   :  { %vm3808_vm13 = vcmp.ne.s32.totalorder %v3806_v43, 0  ;;  %6091 = vmatmul.mubr.bf16.vlgmr.msra.gmra.mrb[32].mxu0 %v3027_v32  ;;  %6095 = vmatpush3.bf16.msra.mxu1 %v6390_v31  ;;  %v3804_v20 = vpop.permute.xlu1 %3803  ;;  %v3949_v41 = vsel %vm3947_vm12, 1, %v6548_v4  ;;  %v6399_v31 = vld [vmem:[%s8454_s7 + $0x240] sm:$0xff]   ;;  %v6401_v32 = vld [vmem:[%s8454_s7 + $0x248] sm:$0xff]  }
 0x815   :  { %v3810_v3 = vsel %vm3808_vm13, 1, %v6548_v4  ;;  %vm3807_vm14 = vcmp.ne.s32.totalorder %v3804_v20, 0  ;;  %6096 = vmatprep.subr.bf16.mxu1 %v6547_v1  ;;  %6110 = vmatprep.mubr.msk.bf16.mxu1 %vm6551_vm4, %v6547_v1  ;;  %v6072_v22 = vpop.f32.mrb[24].mxu1 }
 0x816   :  { %v3809_v24 = vsel %vm3807_vm14, 1, %v6548_v4  ;;  %3815 = vperm.xlu0 %6235, %v3810_v3   ;;  %vm3946_vm14 = vcmp.gt.f32.partialorder %v5406_v36, 0.0  ;;  %v6404_v3 = vld [vmem:[%s8454_s7 + $0x298] sm:$0xff]   ;;  %v6430_v36 = vld [vmem:[%s8456_s9 + $0x160] sm:$0xff]  }
 0x817   :  { %3812 = vperm.xlu1 %6236, %v3809_v24   ;;  %v3826_v40 = vpop.permute.xlu0 %3825  ;;  %v3948_v38 = vsel %vm3946_vm14, 1, %v6548_v4  ;;  %v6405_v24 = vld [vmem:[%s8454_s7 + $0x258] sm:$0xff]  }
 0x818   :  { %vm3828_vm15 = vcmp.ne.s32.totalorder %v3826_v40, 0  ;;  %6097 = vmatpush3.bf16.msra.mxu1 %v6391_v62  ;;  %v3824_v61 = vpop.permute.xlu1 %3823  ;;  %v6403_v62 = vld [vmem:[%s8454_s7 + $0x250] sm:$0xff]   ;;  %v6406_v40 = vld [vmem:[%s8454_s7 + $0x2a0] sm:$0xff]  }
 0x819   :  { %v3830_v0 = vsel %vm3828_vm15, 1, %v6548_v4  ;;  %vm3827_vm0 = vcmp.ne.s32.totalorder %v3824_v61, 0  ;;  %6098 = vmatprep.subr.bf16.mxu1 %v6547_v1  ;;  %v6407_v61 = vld [vmem:[%s8454_s7 + $0x260] sm:$0xff]  }
 0x81a   :  { %v3829_v5 = vsel %vm3827_vm0, 1, %v6548_v4  ;;  %3835 = vperm.xlu0 %6235, %v3830_v0   ;;  %v6409_v0 = vld [vmem:[%s8454_s7 + $0x268] sm:$0xff]  }
 0x81b   :  { %3832 = vperm.xlu1 %6236, %v3829_v5   ;;  %v3846_v10 = vpop.permute.xlu0 %3845  ;;  %v6410_v5 = vld [vmem:[%s8454_s7 + $0x2b0] sm:$0xff]  }
 0x81c   :  { %vm3848_vm1 = vcmp.ne.s32.totalorder %v3846_v10, 0  ;;  %6099 = vmatpush3.bf16.msra.mxu1 %v6392_v25  ;;  %v3844_v39 = vpop.permute.xlu1 %3843  ;;  %v6408_v25 = vld [vmem:[%s8454_s7 + $0x2a8] sm:$0xff]   ;;  %v6411_v10 = vld [vmem:[%s8454_s7 + $0x270] sm:$0xff]  }
 0x81d   :  { %v3850_v21 = vsel %vm3848_vm1, 1, %v6548_v4  ;;  %vm3847_vm3 = vcmp.ne.s32.totalorder %v3844_v39, 0  ;;  %6100 = vmatprep.subr.bf16.mxu1 %v6547_v1  ;;  %v6412_v39 = vld [vmem:[%s8454_s7 + $0x2b8] sm:$0xff]  }
 0x81e   :  { %v3849_v8 = vsel %vm3847_vm3, 1, %v6548_v4  ;;  %3855 = vperm.xlu0 %6235, %v3850_v21  }
 0x81f   :  { %3852 = vperm.xlu1 %6236, %v3849_v8   ;;  %v3866_v49 = vpop.permute.xlu0 %3865 }
 0x820   :  { %vm3868_vm5 = vcmp.ne.s32.totalorder %v3866_v49, 0  ;;  %6101 = vmatpush3.bf16.msra.mxu1 %v6393_v42  ;;  %v3864_v52 = vpop.permute.xlu1 %3863  ;;  %v6413_v42 = vld [vmem:[%s8454_s7 + $0x278] sm:$0xff]  }
 0x821   :  { %v3870_v17 = vsel %vm3868_vm5, 1, %v6548_v4  ;;  %vm3867_vm6 = vcmp.ne.s32.totalorder %v3864_v52, 0  ;;  %6102 = vmatprep.subr.bf16.mxu1 %v6547_v1 }
 0x822   :  { %v3869_v29 = vsel %vm3867_vm6, 1, %v6548_v4  ;;  %3875 = vperm.xlu0 %6235, %v3870_v17   ;;  %v6423_v17 = vld [vmem:[%s8456_s9 + $0x100] sm:$0xff]  }
 0x823   :  { %3872 = vperm.xlu1 %6236, %v3869_v29   ;;  %v3886_v13 = vpop.permute.xlu0 %3885  ;;  %v6424_v29 = vld [vmem:[%s8456_s9 + $0x148] sm:$0xff]  }
 0x824   :  { %vm3888_vm7 = vcmp.ne.s32.totalorder %v3886_v13, 0  ;;  %6103 = vmatpush3.bf16.msra.mxu1 %v6394_v9  ;;  %v3884_v53 = vpop.permute.xlu1 %3883  ;;  %v6422_v9 = vld [vmem:[%s8456_s9 + $0x140] sm:$0xff]   ;;  %v6425_v13 = vld [vmem:[%s8456_s9 + $0x108] sm:$0xff]  }
 0x825   :  { %v3890_v2 = vsel %vm3888_vm7, 1, %v6548_v4  ;;  %vm3887_vm8 = vcmp.ne.s32.totalorder %v3884_v53, 0  ;;  %6104 = vmatprep.subr.bf16.mxu1 %v6547_v1  ;;  %5801 = vmatprep.subr.bf16.mxu0 %v6422_v9 }
 0x826   :  { %v3889_v54 = vsel %vm3887_vm8, 1, %v6548_v4  ;;  %3895 = vperm.xlu0 %6235, %v3890_v2   ;;  %5802 = vmatpush3.bf16.msra.mxu0 %v6423_v17  ;;  %v6426_v2 = vld [vmem:[%s8456_s9 + $0x150] sm:$0xff]  }
 0x827   :  { %3892 = vperm.xlu1 %6236, %v3889_v54   ;;  %v3906_v46 = vpop.permute.xlu0 %3905  ;;  %5803 = vmatprep.subr.bf16.mxu0 %v6424_v29  ;;  %v6427_v54 = vld [vmem:[%s8456_s9 + $0x110] sm:$0xff]  }
 0x828   :  { %vm3908_vm9 = vcmp.ne.s32.totalorder %v3906_v46, 0  ;;  %6105 = vmatpush3.bf16.msra.mxu1 %v6395_v60  ;;  %v3904_v34 = vpop.permute.xlu1 %3903 }
 0x829   :  { %v3910_v56 = vsel %vm3908_vm9, 1, %v6548_v4  ;;  %vm3907_vm10 = vcmp.ne.s32.totalorder %v3904_v34, 0  ;;  %6106 = vmatprep.subr.bf16.mxu1 %v6547_v1 }
 0x82a   :  { %v3909_v16 = vsel %vm3907_vm10, 1, %v6548_v4  ;;  %3915 = vperm.xlu0 %6235, %v3910_v56   ;;  %5804 = vmatpush3.bf16.msra.mxu0 %v6425_v13  ;;  %v6429_v56 = vld [vmem:[%s8456_s9 + $0x118] sm:$0xff]  }
 0x82b   :  { %3912 = vperm.xlu1 %6236, %v3909_v16   ;;  %v3926_v58 = vpop.permute.xlu0 %3925  ;;  %5805 = vmatprep.subr.bf16.mxu0 %v6426_v2 }
 0x82c   :  { %vm3928_vm11 = vcmp.ne.s32.totalorder %v3926_v58, 0  ;;  %6107 = vmatpush3.bf16.msra.mxu1 %v6396_v18  ;;  %v3924_v11 = vpop.permute.xlu1 %3923  ;;  %v6428_v18 = vld [vmem:[%s8456_s9 + $0x158] sm:$0xff]   ;;  %v6431_v58 = vld [vmem:[%s8456_s9 + $0x120] sm:$0xff]  }
 0x82d   :  { %v3930_v28 = vsel %vm3928_vm11, 1, %v6548_v4  ;;  %vm3927_vm13 = vcmp.ne.s32.totalorder %v3924_v11, 0  ;;  %6108 = vmatprep.subr.bf16.mxu1 %v6547_v1 }
 0x82e   :  { %v3929_v59 = vsel %vm3927_vm13, 1, %v6548_v4  ;;  %3935 = vperm.xlu0 %6235, %v3930_v28   ;;  %v8067_v4 = vpop.f32.mrb[25].mxu1  ;;  %5806 = vmatpush3.bf16.msra.mxu0 %v6427_v54  ;;  %v6432_v28 = vld [vmem:[%s8456_s9 + $0x168] sm:$0xff]  }
 0x82f   :  { %3932 = vperm.xlu1 %6236, %v3929_v59   ;;  %v6073_v43 = vpop.f32.mrb[26].mxu1  ;;  %v3636_v49 = vpop.permute.xlu0 %3635  ;;  %5807 = vmatprep.subr.bf16.mxu0 %v6428_v18 }
 0x830   :  { %6109 = vmatpush3.bf16.msra.mxu1 %v6397_v19  ;;  %v3962_v20 = vpack.c.bf16 %v6073_v43, %v6072_v22  ;;  %v8106_v21 = vpop.f32.mrb[27].mxu1  ;;  %v3633_v52 = vpop.permute.xlu1 %3632  ;;  %v6435_v22 = vld [vmem:[%s8456_s9 + $0x130] sm:$0xff]   ;;  %vm3638_vm15 = vcmp.eq.s32.totalorder %v3636_v49, 1  ;;  %v6436_v43 = vld [vmem:[%s8456_s9 + $0x178] sm:$0xff]  }
 0x831   :  { %5823 = vmatprep.subr.bf16.mxu1 %v6398_v30  ;;  %v3964_v8 = vpack.c.bf16 %v8106_v21, %v8067_v4  ;;  %v6433_v30 = vld [vmem:[%s8456_s9 + $0x128] sm:$0xff]   ;;  %vm3637_vm0 = vcmp.eq.s32.totalorder %v3633_v52, 1  ;;  %v6450_v21 = vld [vmem:[%s8456_s9 + $0x1d0] sm:$0xff]  }
 0x832   :  { %3954 = vperm.xlu0 %6235, %v3949_v41   ;;  %5808 = vmatpush3.bf16.msra.mxu0 %v6429_v56  ;;  %v6449_v4 = vld [vmem:[%s8456_s9 + $0x188] sm:$0xff]  }
 0x833   :  { %6111 = vmatmul.mubr.bf16.vlgmr.msra.gmra.mrb[32].mxu1 %v7612_v7  ;;  %3951 = vperm.xlu1 %6236, %v3948_v38  }
 0x834   :  { %5824 = vmatpush3.bf16.msra.mxu1 %v6399_v31  ;;  %4202 = vmatprep.mubr.bf16.mxu1 %v3962_v20  ;;  %v6437_v20 = vld [vmem:[%s8456_s9 + $0x138] sm:$0xff]  }
 0x835   :  { %5825 = vmatprep.subr.bf16.mxu1 %v6400_v51  ;;  %5809 = vmatprep.subr.bf16.mxu0 %v6430_v36  ;;  %v6434_v51 = vld [vmem:[%s8456_s9 + $0x170] sm:$0xff]  }
 0x836   :  { %5810 = vmatpush3.bf16.msra.mxu0 %v6431_v58 }
 0x837   :  { %5811 = vmatprep.subr.bf16.mxu0 %v6432_v28 }
 0x838   :  { %5826 = vmatpush3.bf16.msra.mxu1 %v6401_v32 }
 0x839   :  { %5827 = vmatprep.subr.bf16.mxu1 %v6402_v35 }
 0x83a   :  { %5812 = vmatpush3.bf16.msra.mxu0 %v6433_v30 }
 0x83b   :  { %5813 = vmatprep.subr.bf16.mxu0 %v6434_v51 }
 0x83c   :  { %5828 = vmatpush3.bf16.msra.mxu1 %v6403_v62  ;;  %v3640_v62 = vsel %vm3638_vm15, %v7847_v33, -3e+38 }
 0x83d   :  { %5829 = vmatprep.subr.bf16.mxu1 %v6404_v3  ;;  %v3639_v3 = vsel %vm3637_vm0, %v7847_v33, -3e+38 }
 0x83e   :  { %5814 = vmatpush3.bf16.msra.mxu0 %v6435_v22 }
 0x83f   :  { %5815 = vmatprep.subr.bf16.mxu0 %v6436_v43 }
 0x840   :  { %5830 = vmatpush3.bf16.msra.mxu1 %v6405_v24 }
 0x841   :  { %5831 = vmatprep.subr.bf16.mxu1 %v6406_v40 }
 0x842   :  { %5816 = vmatpush3.bf16.msra.mxu0 %v6437_v20 }
 0x843   :  { %6114 = vmatprep.subr.bf16.mxu0 %v6547_v1 }
 0x844   :  { %5832 = vmatpush3.bf16.msra.mxu1 %v6407_v61  ;;  %v3642_v61 = vmax.f32 %v3640_v62, -3e+38 }
 0x845   :  { %5833 = vmatprep.subr.bf16.mxu1 %v6408_v25 }
 0x848   :  { %5834 = vmatpush3.bf16.msra.mxu1 %v6409_v0 }
 0x849   :  { %5835 = vmatprep.subr.bf16.mxu1 %v6410_v5  ;;  %v3641_v5 = vmax.f32 %v3639_v3, -3e+38 }
 0x84c   :  { %5836 = vmatpush3.bf16.msra.mxu1 %v6411_v10 }
 0x84d   :  { %5837 = vmatprep.subr.bf16.mxu1 %v6412_v39 }
 0x850   :  { %5838 = vmatpush3.bf16.msra.mxu1 %v6413_v42 }
 0x851   :  { %6134 = vmatprep.subr.bf16.mxu1 %v6547_v1 }
 0x875   :  { %v3656_v53 = vpop.permute.xlu0 %3655  ;;  %v3653_v60 = vpop.permute.xlu1 %3652 }
 0x876   :  { %vm3658_vm1 = vcmp.eq.s32.totalorder %v3656_v53, 1  ;;  %vm3657_vm3 = vcmp.eq.s32.totalorder %v3653_v60, 1 }
 0x877   :  { %v3660_v24 = vsel %vm3658_vm1, %v7853_v45, -3e+38  ;;  %v3659_v25 = vsel %vm3657_vm3, %v7853_v45, -3e+38 }
 0x878   :  { %v3662_v39 = vmax.f32 %v3642_v61, %v3660_v24  ;;  %v3661_v42 = vmax.f32 %v3641_v5, %v3659_v25 }
 0x879   :  { %v3676_v46 = vpop.permute.xlu0 %3675  ;;  %v3673_v34 = vpop.permute.xlu1 %3672 }
 0x87a   :  { %vm3678_vm5 = vcmp.eq.s32.totalorder %v3676_v46, 1  ;;  %vm3677_vm6 = vcmp.eq.s32.totalorder %v3673_v34, 1 }
 0x87b   :  { %v3680_v10 = vsel %vm3678_vm5, %v7863_v44, -3e+38  ;;  %v3679_v33 = vsel %vm3677_vm6, %v7863_v44, -3e+38 }
 0x87c   :  { %v3682_v9 = vmax.f32 %v3662_v39, %v3680_v10  ;;  %v3681_v29 = vmax.f32 %v3661_v42, %v3679_v33 }
 0x87d   :  { %v3696_v47 = vpop.permute.xlu0 %3695  ;;  %v3693_v16 = vpop.permute.xlu1 %3692 }
 0x87e   :  { %vm3698_vm7 = vcmp.eq.s32.totalorder %v3696_v47, 1  ;;  %vm3697_vm8 = vcmp.eq.s32.totalorder %v3693_v16, 1 }
 0x87f   :  { %v3700_v49 = vsel %vm3698_vm7, %v7869_v55, -3e+38  ;;  %v3699_v17 = vsel %vm3697_vm8, %v7869_v55, -3e+38 }
 0x880   :  { %v3702_v53 = vmax.f32 %v3682_v9, %v3700_v49  ;;  %v3701_v44 = vmax.f32 %v3681_v29, %v3699_v17 }
 0x881   :  { %v3716_v11 = vpop.permute.xlu0 %3715  ;;  %v3713_v19 = vpop.permute.xlu1 %3712 }
 0x882   :  { %vm3718_vm9 = vcmp.eq.s32.totalorder %v3716_v11, 1  ;;  %vm3717_vm10 = vcmp.eq.s32.totalorder %v3713_v19, 1 }
 0x883   :  { %v3720_v13 = vsel %vm3718_vm9, %v7879_v37, -3e+38  ;;  %v3719_v60 = vsel %vm3717_vm10, %v7879_v37, -3e+38 }
 0x884   :  { %v3722_v46 = vmax.f32 %v3702_v53, %v3720_v13  ;;  %v3721_v18 = vmax.f32 %v3701_v44, %v3719_v60 }
 0x885   :  { %v3736_v59 = vpop.permute.xlu0 %3735  ;;  %v3733_v41 = vpop.permute.xlu1 %3732 }
 0x886   :  { %vm3738_vm11 = vcmp.eq.s32.totalorder %v3736_v59, 1  ;;  %vm3737_vm12 = vcmp.eq.s32.totalorder %v3733_v41, 1 }
 0x887   :  { %v3740_v2 = vsel %vm3738_vm11, %v7885_v63, -3e+38  ;;  %v3739_v34 = vsel %vm3737_vm12, %v7885_v63, -3e+38 }
 0x888   :  { %v3742_v47 = vmax.f32 %v3722_v46, %v3740_v2  ;;  %v3741_v37 = vmax.f32 %v3721_v18, %v3739_v34  ;;  %v6417_v18 = vld [vmem:[%s8452_s5 + $0xd8] sm:$0xff]  }
 0x889   :  { %v3756_v38 = vpop.permute.xlu0 %3755  ;;  %v3753_v31 = vpop.permute.xlu1 %3752 }
 0x88a   :  { %vm3758_vm13 = vcmp.eq.s32.totalorder %v3756_v38, 1  ;;  %vm3757_vm14 = vcmp.eq.s32.totalorder %v3753_v31, 1 }
 0x88b   :  { %v3760_v56 = vsel %vm3758_vm13, %v7897_v12, -3e+38  ;;  %v3759_v16 = vsel %vm3757_vm14, %v7897_v12, -3e+38 }
 0x88c   :  { %v3762_v11 = vmax.f32 %v3742_v47, %v3760_v56  ;;  %v3761_v28 = vmax.f32 %v3741_v37, %v3759_v16  ;;  %v6418_v56 = vld [vmem:[%s8452_s5 + $0xe0] sm:$0xff]   ;;  %v6419_v47 = vld [vmem:[%s8452_s5 + $0xe8] sm:$0xff]   ;;  %v6420_v16 = vld [vmem:[%s8452_s5 + $0xf0] sm:$0xff]  }
 0x88d   :  { %v3776_v32 = vpop.permute.xlu0 %3775  ;;  %v3773_v35 = vpop.permute.xlu1 %3772  ;;  %v6421_v37 = vld [vmem:[%s8452_s5 + $0xf8] sm:$0xff]  }
 0x88e   :  { %vm3778_vm15 = vcmp.eq.s32.totalorder %v3776_v32, 1  ;;  %vm3777_vm0 = vcmp.eq.s32.totalorder %v3773_v35, 1 }
 0x88f   :  { %v3780_v36 = vsel %vm3778_vm15, %v7905_v15, -3e+38  ;;  %v3779_v19 = vsel %vm3777_vm0, %v7905_v15, -3e+38 }
 0x890   :  { %v3782_v59 = vmax.f32 %v3762_v11, %v3780_v36  ;;  %v3781_v12 = vmax.f32 %v3761_v28, %v3779_v19  ;;  %v5305_v11 = vld [vmem:[%s8455_s8 + $0x2] ss:$0 sm:$0xff] }
 0x891   :  { %v3796_v40 = vpop.permute.xlu0 %3795 }
 0x892   :  { %v3793_v0 = vpop.permute.xlu1 %3792  ;;  %vm3798_vm1 = vcmp.eq.s32.totalorder %v3796_v40, 1 }
 0x893   :  { %vm3797_vm3 = vcmp.eq.s32.totalorder %v3793_v0, 1  ;;  %v3800_v30 = vsel %vm3798_vm1, %v7917_v6, -3e+38 }
 0x894   :  { %v3799_v41 = vsel %vm3797_vm3, %v7917_v6, -3e+38  ;;  %v3802_v51 = vmax.f32 %v3782_v59, %v3800_v30 }
 0x895   :  { %v3816_v52 = vpop.permute.xlu0 %3815  ;;  %v3801_v32 = vmax.f32 %v3781_v12, %v3799_v41 }
 0x896   :  { %v3813_v45 = vpop.permute.xlu1 %3812  ;;  %vm3818_vm5 = vcmp.eq.s32.totalorder %v3816_v52, 1 }
 0x897   :  { %vm3817_vm6 = vcmp.eq.s32.totalorder %v3813_v45, 1  ;;  %v3820_v38 = vsel %vm3818_vm5, %v7927_v50, -3e+38 }
 0x898   :  { %v3819_v22 = vsel %vm3817_vm6, %v7927_v50, -3e+38  ;;  %v3822_v43 = vmax.f32 %v3802_v51, %v3820_v38 }
 0x899   :  { %v3836_v54 = vpop.permute.xlu0 %3835  ;;  %v3821_v6 = vmax.f32 %v3801_v32, %v3819_v22 }
 0x89a   :  { %v3833_v55 = vpop.permute.xlu1 %3832  ;;  %vm3838_vm7 = vcmp.eq.s32.totalorder %v3836_v54, 1 }
 0x89b   :  { %vm3837_vm8 = vcmp.eq.s32.totalorder %v3833_v55, 1  ;;  %v3840_v35 = vsel %vm3838_vm7, %v7937_v57, -3e+38  ;;  %v6415_v55 = vld [vmem:[%s8452_s5 + $0xc8] sm:$0xff]  }
 0x89c   :  { %v3839_v20 = vsel %vm3837_vm8, %v7937_v57, -3e+38  ;;  %v3842_v24 = vmax.f32 %v3822_v43, %v3840_v35  ;;  %v5347_v43 = vld [vmem:[%s8453_s6 + $0x2] ss:$0 sm:$0xff] }
 0x89d   :  { %v3856_v58 = vpop.permute.xlu0 %3855  ;;  %v3841_v61 = vmax.f32 %v3821_v6, %v3839_v20 }
 0x89e   :  { %v3853_v63 = vpop.permute.xlu1 %3852  ;;  %vm3858_vm9 = vcmp.eq.s32.totalorder %v3856_v58, 1 }
 0x89f   :  { %vm3857_vm10 = vcmp.eq.s32.totalorder %v3853_v63, 1  ;;  %v3860_v62 = vsel %vm3858_vm9, %v7947_v23, -3e+38 }
 0x8a0   :  { %v3859_v40 = vsel %vm3857_vm10, %v7947_v23, -3e+38  ;;  %v3862_v0 = vmax.f32 %v3842_v24, %v3860_v62 }
 0x8a1   :  { %v3876_v31 = vpop.permute.xlu0 %3875  ;;  %v3861_v10 = vmax.f32 %v3841_v61, %v3859_v40 }
 0x8a2   :  { %v3873_v15 = vpop.permute.xlu1 %3872  ;;  %vm3878_vm11 = vcmp.eq.s32.totalorder %v3876_v31, 1 }
 0x8a3   :  { %vm3877_vm12 = vcmp.eq.s32.totalorder %v3873_v15, 1  ;;  %v3880_v25 = vsel %vm3878_vm11, %v7957_v27, -3e+38 }
 0x8a4   :  { %v3879_v5 = vsel %vm3877_vm12, %v7957_v27, -3e+38  ;;  %v3882_v33 = vmax.f32 %v3862_v0, %v3880_v25  ;;  %v6438_v0 = vld [vmem:[%s8454_s7 + $0x2c0] sm:$0xff]  }
 0x8a5   :  { %v3896_v3 = vpop.permute.xlu0 %3895  ;;  %v3881_v52 = vmax.f32 %v3861_v10, %v3879_v5  ;;  %v6439_v5 = vld [vmem:[%s8454_s7 + $0x2c8] sm:$0xff]   ;;  %v6440_v10 = vld [vmem:[%s8454_s7 + $0x2d0] sm:$0xff]  }
 0x8a6   :  { %vm3898_vm13 = vcmp.eq.s32.totalorder %v3896_v3, 1  ;;  %v3893_v50 = vpop.permute.xlu1 %3892 }
 0x8a7   :  { %vm3897_vm14 = vcmp.eq.s32.totalorder %v3893_v50, 1  ;;  %v3900_v57 = vsel %vm3898_vm13, %v7961_v14, -3e+38 }
 0x8a8   :  { %v3899_v42 = vsel %vm3897_vm14, %v7961_v14, -3e+38  ;;  %v3902_v9 = vmax.f32 %v3882_v33, %v3900_v57  ;;  %v6441_v57 = vld [vmem:[%s8454_s7 + $0x2d8] sm:$0xff]   ;;  %v6443_v33 = vld [vmem:[%s8454_s7 + $0x2e8] sm:$0xff]  }
 0x8a9   :  { %v3916_v39 = vpop.permute.xlu0 %3915  ;;  %v3901_v45 = vmax.f32 %v3881_v52, %v3899_v42  ;;  %v6444_v42 = vld [vmem:[%s8454_s7 + $0x2f0] sm:$0xff]   ;;  %v6446_v52 = vld [vmem:[%s8456_s9 + $0x1c0] sm:$0xff]  }
 0x8aa   :  { %vm3918_vm15 = vcmp.eq.s32.totalorder %v3916_v39, 1  ;;  %v3913_v49 = vpop.permute.xlu1 %3912  ;;  %v6442_v39 = vld [vmem:[%s8454_s7 + $0x2e0] sm:$0xff]  }
 0x8ab   :  { %v3920_v23 = vsel %vm3918_vm15, %v7975_v26, -3e+38  ;;  %vm3917_vm0 = vcmp.eq.s32.totalorder %v3913_v49, 1  ;;  %v6445_v49 = vld [vmem:[%s8454_s7 + $0x2f8] sm:$0xff]   ;;  %s6565_s7 = smov [#allocation4]  }
 0x8ac   :  { %v3919_v17 = vsel %vm3917_vm0, %v7975_v26, -3e+38  ;;  %v3922_v13 = vmax.f32 %v3902_v9, %v3920_v23  ;;  %v6414_v26 = vld [vmem:[%s8452_s5 + $0xc0] sm:$0xff]   ;;  %v6448_v9 = vld [vmem:[%s8456_s9 + $0x1c8] sm:$0xff]   ;;  %s4985_s25 = sshll.u32 %s6565_s7, 4  ;;  %s4986_s25 = int_to_ptr.vmem [resolvable:$true] %s4985_s25 }
 0x8ad   :  { %v3936_v29 = vpop.permute.xlu0 %3935  ;;  %v3921_v53 = vmax.f32 %v3901_v45, %v3919_v17  ;;  %v6447_v23 = vld [vmem:[%s8456_s9 + $0x180] sm:$0xff]   ;;  %v6452_v17 = vld [vmem:[%s8456_s9 + $0x1d8] sm:$0xff]   ;;  %p6528_p1 = scmp.lt.s32.totalorder %s4986_s25, %s4986_s25 }
 0x8ae   :  { %vm3938_vm1 = vcmp.eq.s32.totalorder %v3936_v29, 1  ;;  %v3933_v27 = vpop.permute.xlu1 %3932  ;;  %v6453_v45 = vld [vmem:[%s8456_s9 + $0x198] sm:$0xff]   ;;  %v6454_v29 = vld [vmem:[%s8456_s9 + $0x1e0] sm:$0xff]  }
 0x8af   :  { %v3940_v60 = vsel %vm3938_vm1, %v7979_v48, -3e+38  ;;  %vm3937_vm3 = vcmp.eq.s32.totalorder %v3933_v27, 1  ;;  %v6456_v27 = vld [vmem:[%s8456_s9 + $0x1e8] sm:$0xff]  }
 0x8b0   :  { %v3942_v44 = vmax.f32 %v3922_v13, %v3940_v60  ;;  %v3939_v14 = vsel %vm3937_vm3, %v7979_v48, -3e+38  ;;  %v6416_v48 = vld [vmem:[%s8452_s5 + $0xd0] sm:$0xff]   ;;  %v6455_v13 = vld [vmem:[%s8456_s9 + $0x1a0] sm:$0xff]   ;;  %s6523_s5 = scalar_lea.vmem %s4986_s25, 256 }
 0x8b1   :  { %v3941_v2 = vmax.f32 %v3921_v53, %v3939_v14  ;;  %v3955_v54 = vpop.permute.xlu0 %3954  ;;  %v6457_v53 = vld [vmem:[%s8456_s9 + $0x1a8] sm:$0xff]   ;;  %v6458_v60 = vld [vmem:[%s8456_s9 + $0x1f0] sm:$0xff]   ;;  %p6524_p0 = scmp.ne.s32.totalorder %s4986_s25, %s6523_s5  ;;  %p6529_p2 = scmp.lt.s32.totalorder %s6523_s5, %s6523_s5 }
 0x8b2   :  { %vm3957_vm5 = vcmp.eq.s32.totalorder %v3955_v54, 1  ;;  %v3952_v46 = vpop.permute.xlu1 %3951  ;;  %v6460_v54 = vld [vmem:[%s8456_s9 + $0x1f8] sm:$0xff]  }
 0x8b3   :  { %v5596_v34 = vpack.c.bf16 %v3942_v44, %v3941_v2  ;;  %vm3956_vm6 = vcmp.eq.s32.totalorder %v3952_v46, 1  ;;  %v6459_v44 = vld [vmem:[%s8456_s9 + $0x1b0] sm:$0xff]   ;;  %p6530_p3 = por %p6529_p2, %p6528_p1 }
 0x8b4   :  { %vm5595_vm7 = vmpackc.low %vm3957_vm5, %vm3956_vm6 }
 0x8b5   :  { %5597 = vmatmul.mubr.msk.bf16.vlgmr.msra.gmra.mrb[36].mxu1 %vm5595_vm7, %v5596_v34  ;;  %v6461_v34 = vld [vmem:[%s8456_s9 + $0x1b8] sm:$0xff]   ;;  %p6531_p4 = pnand %p6530_p3, %p6524_p0 }
 0x8b6   :  { %6135 = vmatpush3.bf16.msra.mxu1 %v6414_v26  ;;  %6150 = vmatprep.mubr.msk.bf16.mxu1 %vm6551_vm4, %v6547_v1 }
 0x8b7   :  { %6136 = vmatprep.subr.bf16.mxu1 %v6547_v1 }
 0x8ba   :  { %6137 = vmatpush3.bf16.msra.mxu1 %v6415_v55 }
 0x8bb   :  { %6138 = vmatprep.subr.bf16.mxu1 %v6547_v1 }
 0x8be   :  { %6139 = vmatpush3.bf16.msra.mxu1 %v6416_v48 }
 0x8bf   :  { %6140 = vmatprep.subr.bf16.mxu1 %v6547_v1 }
 0x8c2   :  { %6141 = vmatpush3.bf16.msra.mxu1 %v6417_v18  ;;  %v6462_v18 = vld [vmem:[%s8458_s11] sm:$0xff]  }
 0x8c3   :  { %6142 = vmatprep.subr.bf16.mxu1 %v6547_v1 }
 0x8c6   :  { %6143 = vmatpush3.bf16.msra.mxu1 %v6418_v56  ;;  %v6463_v56 = vld [vmem:[%s8458_s11 + $0x8] sm:$0xff]  }
 0x8c7   :  { %6144 = vmatprep.subr.bf16.mxu1 %v6547_v1 }
 0x8ca   :  { %6145 = vmatpush3.bf16.msra.mxu1 %v6419_v47  ;;  %v6464_v47 = vld [vmem:[%s8458_s11 + $0x10] sm:$0xff]  }
 0x8cb   :  { %6146 = vmatprep.subr.bf16.mxu1 %v6547_v1 }
 0x8ce   :  { %6147 = vmatpush3.bf16.msra.mxu1 %v6420_v16  ;;  %v6465_v16 = vld [vmem:[%s8458_s11 + $0x18] sm:$0xff]  }
 0x8cf   :  { %6148 = vmatprep.subr.bf16.mxu1 %v6547_v1 }
 0x8d2   :  { %6149 = vmatpush3.bf16.msra.mxu1 %v6421_v37  ;;  %v6466_v37 = vld [vmem:[%s8458_s11 + $0x20] sm:$0xff]  }
 0x8d3   :  { %6154 = vmatprep.subr.bf16.mxu1 %v6462_v18 }
 0x8d5   :  { %6151 = vmatmul.mubr.bf16.vlgmr.msra.gmra.mrb[40].mxu1 %v7612_v7 }
 0x8d6   :  { %6155 = vmatpush3.bf16.msra.mxu1 %v6462_v18 }
 0x8d7   :  { %6156 = vmatprep.subr.bf16.mxu1 %v6463_v56 }
 0x8da   :  { %6157 = vmatpush3.bf16.msra.mxu1 %v6463_v56 }
 0x8db   :  { %6158 = vmatprep.subr.bf16.mxu1 %v6464_v47 }
 0x8de   :  { %6159 = vmatpush3.bf16.msra.mxu1 %v6464_v47 }
 0x8df   :  { %6160 = vmatprep.subr.bf16.mxu1 %v6465_v16 }
 0x8e2   :  { %6161 = vmatpush3.bf16.msra.mxu1 %v6465_v16 }
 0x8e3   :  { %6162 = vmatprep.subr.bf16.mxu1 %v6466_v37 }
 0x8e6   :  { %v5777_v36 = vpop.f32.mrb[28].mxu1  ;;  %6163 = vmatpush3.bf16.msra.mxu1 %v6466_v37 }
 0x8e7   :  { %v3308_v58 = vpop.f32.mrb[32].mxu0  ;;  %v5778_v19 = vpop.f32.mrb[29].mxu1 }
 0x8e8   :  { %v5779_v63 = vadd.f32 %v5778_v19, %v5777_v36  ;;  %v6092_v28 = vpop.f32.mrb[33].mxu0  ;;  %v5780_v30 = vpop.f32.mrb[30].mxu1  ;;  %v5499_v36 = vld [vmem:[%s8453_s6 + $0x3] ss:$0 sm:$0xff] }
 0x8e9   :  { %v3311_v59 = vpop.f32.mrb[34].mxu0  ;;  %v5781_v41 = vpop.f32.mrb[31].mxu1 }
 0x8ea   :  { %v3268_v12 = vadd.f32 %v5779_v63, %v5305_v11  ;;  %v5782_v38 = vadd.f32 %v5781_v41, %v5780_v30  ;;  %v6093_v31 = vpop.f32.mrb[35].mxu0 }
 0x8eb   :  { %v5389_v31 = vld [vmem:[%s8457_s10 + $0x2] ss:$0 sm:$0xff] }
 0x8ec   :  { %v3309_v51 = vadd.f32 %v3308_v58, %v3268_v12  ;;  %v3271_v22 = vadd.f32 %v5782_v38, %v5305_v11 }
 0x8ee   :  { %v3312_v15 = vadd.f32 %v3311_v59, %v3271_v22  ;;  %v3429_v32 = vmax.f32 %v3309_v51, 0.0 }
 0x8f0   :  { %v3430_v7 = vmax.f32 %v3312_v15, 0.0 }
 0x8f2   :  { %v3431_v35 = vpack.c.bf16 %v3430_v7, %v3429_v32 }
 0x906   :  { %v3422_v20 = vpop.f32.mrb[32].mxu1 }
 0x907   :  { %v3423_v6 = vadd.f32 %v5347_v43, %v3422_v20  ;;  %v6112_v62 = vpop.f32.mrb[33].mxu1 }
 0x908   :  { %v3425_v3 = vpop.f32.mrb[34].mxu1 }
 0x909   :  { %v3426_v24 = vadd.f32 %v5347_v43, %v3425_v3  ;;  %v6113_v40 = vpop.f32.mrb[35].mxu1  ;;  %v3433_v50 = vmax.f32 %v3423_v6, 0.0  ;;  %v5457_v3 = vld [vmem:[%s8455_s8 + $0x3] ss:$0 sm:$0xff] }
 0x90b   :  { %v3434_v61 = vmax.f32 %v3426_v24, 0.0 }
 0x90d   :  { %v3435_v25 = vpack.c.bf16 %v3434_v61, %v3433_v50 }
 0x90f   :  { %3608 = vmatprep.mubr.bf16.mxu0 %v3435_v25 }
 0x910   :  { %3609 = vmatmul.mubr.bf16.vlgmr.msra.gmra.mrb[36].mxu0 %v3431_v35 }
 0x911   :  { %6115 = vmatpush3.bf16.msra.mxu0 %v6438_v0  ;;  %6130 = vmatprep.mubr.msk.bf16.mxu0 %vm6551_vm4, %v6547_v1 }
 0x912   :  { %6116 = vmatprep.subr.bf16.mxu0 %v6547_v1 }
 0x915   :  { %6117 = vmatpush3.bf16.msra.mxu0 %v6439_v5 }
 0x916   :  { %6118 = vmatprep.subr.bf16.mxu0 %v6547_v1 }
 0x919   :  { %6119 = vmatpush3.bf16.msra.mxu0 %v6440_v10 }
 0x91a   :  { %6120 = vmatprep.subr.bf16.mxu0 %v6547_v1 }
 0x91d   :  { %6121 = vmatpush3.bf16.msra.mxu0 %v6441_v57 }
 0x91e   :  { %6122 = vmatprep.subr.bf16.mxu0 %v6547_v1 }
 0x921   :  { %6123 = vmatpush3.bf16.msra.mxu0 %v6442_v39 }
 0x922   :  { %6124 = vmatprep.subr.bf16.mxu0 %v6547_v1 }
 0x925   :  { %6125 = vmatpush3.bf16.msra.mxu0 %v6443_v33 }
 0x926   :  { %6126 = vmatprep.subr.bf16.mxu0 %v6547_v1 }
 0x929   :  { %6127 = vmatpush3.bf16.msra.mxu0 %v6444_v42  ;;  %v6467_v42 = vld [vmem:[%s8458_s11 + $0x28] sm:$0xff]  }
 0x92a   :  { %6128 = vmatprep.subr.bf16.mxu0 %v6547_v1  ;;  %6164 = vmatprep.subr.bf16.mxu1 %v6467_v42 }
 0x92b   :  { %6165 = vmatpush3.bf16.msra.mxu1 %v6467_v42 }
 0x92d   :  { %6129 = vmatpush3.bf16.msra.mxu0 %v6445_v49  ;;  %v6468_v49 = vld [vmem:[%s8458_s11 + $0x30] sm:$0xff]  }
 0x92e   :  { %5863 = vmatprep.subr.bf16.mxu0 %v6446_v52  ;;  %6166 = vmatprep.subr.bf16.mxu1 %v6468_v49  ;;  %v6469_v52 = vld [vmem:[%s8458_s11 + $0x38] sm:$0xff]  }
 0x92f   :  { %6167 = vmatpush3.bf16.msra.mxu1 %v6468_v49 }
 0x930   :  { %6131 = vmatmul.mubr.bf16.vlgmr.msra.gmra.mrb[40].mxu0 %v3964_v8  ;;  %v6451_v8 = vld [vmem:[%s8456_s9 + $0x190] sm:$0xff]   ;;  %6168 = vmatprep.subr.bf16.mxu1 %v6469_v52 }
 0x931   :  { %5864 = vmatpush3.bf16.msra.mxu0 %v6447_v23  ;;  %v6470_v23 = vld [vmem:[%s8527_s30] sm:$0xff]  }
 0x932   :  { %5865 = vmatprep.subr.bf16.mxu0 %v6448_v9  ;;  %v6471_v9 = vld [vmem:[%s8527_s30 + $0x8] sm:$0xff]  }
 0x933   :  { %6169 = vmatpush3.bf16.msra.mxu1 %v6469_v52 }
 0x934   :  { %6194 = vmatprep.subr.bf16.mxu1 %v6547_v1 }
 0x935   :  { %5866 = vmatpush3.bf16.msra.mxu0 %v6449_v4  ;;  %v6472_v4 = vld [vmem:[%s8527_s30 + $0x10] sm:$0xff]  }
 0x936   :  { %5867 = vmatprep.subr.bf16.mxu0 %v6450_v21 }
 0x939   :  { %5868 = vmatpush3.bf16.msra.mxu0 %v6451_v8  ;;  %v5541_v8 = vld [vmem:[%s8457_s10 + $0x3] ss:$0 sm:$0xff] }
 0x93a   :  { %5869 = vmatprep.subr.bf16.mxu0 %v6452_v17 }
 0x93d   :  { %5870 = vmatpush3.bf16.msra.mxu0 %v6453_v45 }
 0x93e   :  { %5871 = vmatprep.subr.bf16.mxu0 %v6454_v29 }
 0x941   :  { %5872 = vmatpush3.bf16.msra.mxu0 %v6455_v13 }
 0x942   :  { %5873 = vmatprep.subr.bf16.mxu0 %v6456_v27 }
 0x945   :  { %5874 = vmatpush3.bf16.msra.mxu0 %v6457_v53 }
 0x946   :  { %5875 = vmatprep.subr.bf16.mxu0 %v6458_v60 }
 0x949   :  { %5876 = vmatpush3.bf16.msra.mxu0 %v6459_v44 }
 0x94a   :  { %5877 = vmatprep.subr.bf16.mxu0 %v6460_v54  ;;  %v6473_v54 = vld [vmem:[%s8527_s30 + $0x18] sm:$0xff]  }
 0x94d   :  { %5878 = vmatpush3.bf16.msra.mxu0 %v6461_v34  ;;  %v6476_v34 = vld [vmem:[%s8527_s30 + $0x30] sm:$0xff]  }
 0x94e   :  { %6174 = vmatprep.subr.bf16.mxu0 %v6470_v23 }
 0x988   :  { %v5839_v14 = vpop.f32.mrb[36].mxu1 }
 0x989   :  { %v5840_v2 = vpop.f32.mrb[37].mxu1 }
 0x98a   :  { %v5841_v46 = vadd.f32 %v5840_v2, %v5839_v14  ;;  %v5842_v26 = vpop.f32.mrb[38].mxu1 }
 0x98b   :  { %v5843_v55 = vpop.f32.mrb[39].mxu1 }
 0x98c   :  { %v5844_v48 = vadd.f32 %v5843_v55, %v5842_v26  ;;  %v4205_v24 = vadd.f32 %v5841_v46, %v5457_v3  ;;  %v6474_v46 = vld [vmem:[%s8527_s30 + $0x20] sm:$0xff]   ;;  %v6475_v26 = vld [vmem:[%s8527_s30 + $0x28] sm:$0xff]   ;;  %v6477_v55 = vld [vmem:[%s8527_s30 + $0x38] sm:$0xff]  }
 0x98e   :  { %v4208_v25 = vadd.f32 %v5844_v48, %v5457_v3  ;;  %v5558_v48 = vld [vmem:[%s8528_s19] ss:$0 sm:$0xff] }
 0x9a8   :  { %v4359_v58 = vpop.f32.mrb[40].mxu1 }
 0x9a9   :  { %v4360_v11 = vadd.f32 %v5499_v36, %v4359_v58  ;;  %v6152_v19 = vpop.f32.mrb[41].mxu1 }
 0x9aa   :  { %v4362_v63 = vpop.f32.mrb[42].mxu1 }
 0x9ab   :  { %v4363_v28 = vadd.f32 %v5499_v36, %v4362_v63  ;;  %v6153_v30 = vpop.f32.mrb[43].mxu1  ;;  %v4370_v59 = vmax.f32 %v4360_v11, 0.0 }
 0x9ad   :  { %v4371_v41 = vmax.f32 %v4363_v28, 0.0 }
 0x9af   :  { %v4372_v12 = vpack.c.bf16 %v4371_v41, %v4370_v59 }
 0x9b1   :  { %4545 = vmatprep.mubr.bf16.mxu0 %v4372_v12  ;;  %v6478_v12 = vld [vmem:[%s8529_s14] sm:$0xff]  }
 0x9e3   :  { %v5817_v38 = vpop.f32.mrb[36].mxu0 }
 0x9e4   :  { %v5818_v51 = vpop.f32.mrb[37].mxu0 }
 0x9e5   :  { %v5819_v22 = vadd.f32 %v5818_v51, %v5817_v38  ;;  %v5820_v15 = vpop.f32.mrb[38].mxu0  ;;  %v6479_v38 = vld [vmem:[%s8529_s14 + $0x8] sm:$0xff]   ;;  %v6481_v51 = vld [vmem:[%s8529_s14 + $0x18] sm:$0xff]  }
 0x9e6   :  { %v5821_v32 = vpop.f32.mrb[39].mxu0 }
 0x9e7   :  { %v3611_v7 = vadd.f32 %v5819_v22, %v5389_v31  ;;  %v5822_v35 = vadd.f32 %v5821_v32, %v5820_v15  ;;  %v6482_v22 = vld [vmem:[%s8529_s14 + $0x20] sm:$0xff]   ;;  %v6483_v15 = vld [vmem:[%s8529_s14 + $0x28] sm:$0xff]   ;;  %v6484_v32 = vld [vmem:[%s8529_s14 + $0x30] sm:$0xff]  }
 0x9e9   :  { %v3614_v43 = vadd.f32 %v5822_v35, %v5389_v31  ;;  %v3617_v20 = vmax.f32 %v3611_v7, 0.0  ;;  %v6480_v31 = vld [vmem:[%s8529_s14 + $0x10] sm:$0xff]  }
 0x9eb   :  { %v3618_v6 = vmax.f32 %v3614_v43, 0.0 }
 0x9ed   :  { %v8336_v62 = vpack.c.bf16 %v3618_v6, %v3617_v20 }
 0x9ef   :  { %6170 = vmatprep.mubr.bf16.mxu1 %v8336_v62 }
 0xa03   :  { %v4245_v40 = vpop.f32.mrb[40].mxu0 }
 0xa04   :  { %v4246_v50 = vadd.f32 %v4245_v40, %v4205_v24  ;;  %v6132_v61 = vpop.f32.mrb[41].mxu0 }
 0xa05   :  { %v4248_v0 = vpop.f32.mrb[42].mxu0 }
 0xa06   :  { %v4249_v5 = vadd.f32 %v4248_v0, %v4208_v25  ;;  %v6133_v10 = vpop.f32.mrb[43].mxu0  ;;  %v4366_v57 = vmax.f32 %v4246_v50, 0.0 }
 0xa08   :  { %v4367_v39 = vmax.f32 %v4249_v5, 0.0 }
 0xa0a   :  { %v4368_v33 = vpack.c.bf16 %v4367_v39, %v4366_v57 }
 0xa0c   :  { %4546 = vmatmul.mubr.bf16.vlgmr.msra.gmra.mrb[44].mxu0 %v4368_v33 }
 0xa0d   :  { %6175 = vmatpush3.bf16.msra.mxu0 %v6470_v23 }
 0xa0e   :  { %6176 = vmatprep.subr.bf16.mxu0 %v6471_v9 }
 0xa11   :  { %6177 = vmatpush3.bf16.msra.mxu0 %v6471_v9 }
 0xa12   :  { %6178 = vmatprep.subr.bf16.mxu0 %v6472_v4 }
 0xa15   :  { %6179 = vmatpush3.bf16.msra.mxu0 %v6472_v4 }
 0xa16   :  { %6180 = vmatprep.subr.bf16.mxu0 %v6473_v54 }
 0xa19   :  { %6181 = vmatpush3.bf16.msra.mxu0 %v6473_v54  ;;  %v6485_v54 = vld [vmem:[%s8529_s14 + $0x38] sm:$0xff]  }
 0xa1a   :  { %6182 = vmatprep.subr.bf16.mxu0 %v6474_v46 }
 0xa1d   :  { %6183 = vmatpush3.bf16.msra.mxu0 %v6474_v46 }
 0xa1e   :  { %6184 = vmatprep.subr.bf16.mxu0 %v6475_v26 }
 0xa21   :  { %6185 = vmatpush3.bf16.msra.mxu0 %v6475_v26 }
 0xa22   :  { %6186 = vmatprep.subr.bf16.mxu0 %v6476_v34 }
 0xa25   :  { %6187 = vmatpush3.bf16.msra.mxu0 %v6476_v34  ;;  %v4830_v34 = vunpack.c.l.bf16 %v8336_v62 }
 0xa26   :  { %6188 = vmatprep.subr.bf16.mxu0 %v6477_v55 }
 0xa29   :  { %6189 = vmatpush3.bf16.msra.mxu0 %v6477_v55  ;;  %v4831_v55 = vunpack.c.h.bf16 %v8336_v62 }
 0xadf   :  { %v5879_v21 = vpop.f32.mrb[44].mxu0 }
 0xae0   :  { %v5880_v17 = vpop.f32.mrb[45].mxu0 }
 0xae1   :  { %v5881_v45 = vadd.f32 %v5880_v17, %v5879_v21  ;;  %v5882_v29 = vpop.f32.mrb[46].mxu0 }
 0xae2   :  { %v5883_v13 = vpop.f32.mrb[47].mxu0 }
 0xae3   :  { %v4548_v27 = vadd.f32 %v5881_v45, %v5541_v8  ;;  %v5884_v53 = vadd.f32 %v5883_v13, %v5882_v29 }
 0xae5   :  { %v4551_v60 = vadd.f32 %v5884_v53, %v5541_v8  ;;  %v4554_v44 = vmax.f32 %v4548_v27, 0.0 }
 0xae7   :  { %v4555_v14 = vmax.f32 %v4551_v60, 0.0 }
 0xae9   :  { %v8364_v2 = vpack.c.bf16 %v4555_v14, %v4554_v44 }
 0xaeb   :  { %6171 = vmatmul.mubr.bf16.vlgmr.msra.gmra.mrb[44].mxu1 %v8364_v2  ;;  %v4840_v46 = vunpack.c.l.bf16 %v8364_v2  ;;  %v4841_v26 = vunpack.c.h.bf16 %v8364_v2 }
 0xaec   :  { %6210 = vmatprep.mubr.msk.bf16.mxu1 %vm6551_vm4, %v6547_v1  ;;  %6195 = vmatpush3.bf16.msra.mxu1 %v6478_v12 }
 0xaed   :  { %6196 = vmatprep.subr.bf16.mxu1 %v6547_v1 }
 0xaf0   :  { %6197 = vmatpush3.bf16.msra.mxu1 %v6479_v38 }
 0xaf1   :  { %6198 = vmatprep.subr.bf16.mxu1 %v6547_v1 }
 0xaf4   :  { %6199 = vmatpush3.bf16.msra.mxu1 %v6480_v31 }
 0xaf5   :  { %6200 = vmatprep.subr.bf16.mxu1 %v6547_v1 }
 0xaf8   :  { %6201 = vmatpush3.bf16.msra.mxu1 %v6481_v51 }
 0xaf9   :  { %6202 = vmatprep.subr.bf16.mxu1 %v6547_v1 }
 0xafc   :  { %6203 = vmatpush3.bf16.msra.mxu1 %v6482_v22 }
 0xafd   :  { %6204 = vmatprep.subr.bf16.mxu1 %v6547_v1 }
 0xb00   :  { %6205 = vmatpush3.bf16.msra.mxu1 %v6483_v15 }
 0xb01   :  { %6206 = vmatprep.subr.bf16.mxu1 %v6547_v1 }
 0xb04   :  { %6207 = vmatpush3.bf16.msra.mxu1 %v6484_v32 }
 0xb05   :  { %6208 = vmatprep.subr.bf16.mxu1 %v6547_v1 }
 0xb08   :  { %6209 = vmatpush3.bf16.msra.mxu1 %v6485_v54 }
 0xbbe   :  { %v6172_v18 = vpop.f32.mrb[44].mxu1 }
 0xbbf   :  { %v4674_v56 = vadd.f32 %v6172_v18, %v5558_v48  ;;  %v4665_v47 = vpop.f32.mrb[45].mxu1 }
 0xbc0   :  { %v4666_v16 = vadd.f32 %v5558_v48, %v4665_v47  ;;  %v6173_v37 = vpop.f32.mrb[46].mxu1 }
 0xbc1   :  { %6500 = vtanh.f32 %v4674_v56  ;;  %v4677_v36 = vadd.f32 %v6173_v37, %v5558_v48  ;;  %v4668_v58 = vpop.f32.mrb[47].mxu1 }
 0xbc2   :  { %6502 = vtanh.f32 %v4666_v16  ;;  %v4669_v11 = vadd.f32 %v5558_v48, %v4668_v58 }
 0xbc3   :  { %6504 = vtanh.f32 %v4677_v36 }
 0xbc4   :  { %6506 = vtanh.f32 %v4669_v11 }
 0xbcb   :  { %v6501_v19 = vpop.eup %6500 }
 0xbcc   :  { %v6503_v63 = vpop.eup %6502 }
 0xbcd   :  { %v6505_v28 = vpop.eup %6504 }
 0xbce   :  { %v6507_v30 = vpop.eup %6506  ;;  %v4685_v59 = vpack.c.bf16 %v6505_v28, %v6501_v19 }
 0xbcf   :  { %v4684_v41 = vpack.c.bf16 %v6507_v30, %v6503_v63 }
 0xbd1   :  { %6190 = vmatprep.mubr.bf16.mxu0 %v4684_v41 }
 0xbd2   :  { %6191 = vmatmul.mubr.bf16.vlgmr.msra.gmra.mrb[48].mxu0 %v4685_v59 }
 0xca5   :  { %v6192_v7 = vpop.f32.mrb[48].mxu0 }
 0xca6   :  { %v4784_v35 = vpop.f32.mrb[49].mxu0  ;;  %v4809_v20 = vsel %vm2458_vm2, %v6192_v7, 0.0 }
 0xca7   :  { %v6193_v43 = vpop.f32.mrb[50].mxu0  ;;  %v4799_v24 = vsel %vm2458_vm2, %v4784_v35, 0.0 }
 0xca8   :  { %v4810_v6 = vsel %vm2458_vm2, %v6193_v43, 0.0  ;;  %v4787_v3 = vpop.f32.mrb[51].mxu0 }
 0xca9   :  { %v4811_v40 = vadd.f32 %v4810_v6, %v4809_v20  ;;  %v4800_v50 = vsel %vm2458_vm2, %v4787_v3, 0.0 }
 0xcaa   :  { %v4801_v61 = vadd.f32 %v4800_v50, %v4799_v24 }
 0xcab   :  { %v4812_v25 = vrot.slane %v4811_v40, 4 }
 0xcac   :  { %v4802_v0 = vrot.slane %v4801_v61, 4 }
 0xcad   :  { %v4813_v5 = vadd.f32 %v4812_v25, %v4811_v40 }
 0xcae   :  { %v4803_v10 = vadd.f32 %v4802_v0, %v4801_v61 }
 0xcaf   :  { %v4814_v57 = vrot.slane %v4813_v5, 2 }
 0xcb0   :  { %v4804_v1 = vrot.slane %v4803_v10, 2 }
 0xcb1   :  { %v4815_v39 = vadd.f32 %v4814_v57, %v4813_v5 }
 0xcb2   :  { %v4805_v33 = vadd.f32 %v4804_v1, %v4803_v10 }
 0xcb3   :  { %v4816_v42 = vrot.slane %v4815_v39, 1 }
 0xcb4   :  { %v4806_v49 = vrot.slane %v4805_v33, 1 }
 0xcb5   :  { %v4817_v52 = vadd.f32 %v4816_v42, %v4815_v39 }
 0xcb6   :  { %v4807_v23 = vadd.f32 %v4806_v49, %v4805_v33 }
 0xcb7   :  { %v4818_v9 = vmul.f32 0.0625, %v4817_v52 }
 0xcb8   :  { %v4808_v4 = vmul.f32 0.0625, %v4807_v23 }
 0xcba   :  { %v4819_v21 = vmax.f32 %v4808_v4, %v4818_v9 }
 0xcbc   :  { %v4820_v8 = vsub.f32 %v4808_v4, %v4819_v21  ;;  %v4823_v17 = vsub.f32 %v4818_v9, %v4819_v21 }
 0xcbe   :  { %v4821_v45 = vmul.f32 1.442695, %v4820_v8  ;;  %v4824_v29 = vmul.f32 1.442695, %v4823_v17 }
 0xcc0   :  { %6508 = vpow2.f32 %v4821_v45 }
 0xcc1   :  { %6510 = vpow2.f32 %v4824_v29 }
 0xcca   :  { %v6509_v13 = vpop.eup %6508 }
 0xccb   :  { %v6511_v27 = vpop.eup %6510 }
 0xccc   :  { %v4826_v53 = vadd.f32 %v6511_v27, %v6509_v13 }
 0xcce   :  { %6512 = vrcp.f32 %v4826_v53 }
 0xcd8   :  { %v6513_v60 = vpop.eup %6512 }
 0xcd9   :  { %v4839_v44 = vmul.f32 %v6513_v60, %v6511_v27  ;;  %v4828_v14 = vmul.f32 %v6513_v60, %v6509_v13 }
 0xcdb   :  { %4844 = vperm.xlu0 %6235, %v4839_v44   ;;  %4834 = vperm.xlu1 %6236, %v4828_v14  }
 0xd5a   :  { %v4845_v48 = vpop.permute.xlu0 %4844  ;;  %v4835_v18 = vpop.permute.xlu1 %4834 }
 0xd5b   :  { %v4847_v56 = vmul.f32 %v4845_v48, %v4840_v46  ;;  %v4848_v47 = vmul.f32 %v4845_v48, %v4841_v26  ;;  %v4837_v16 = vmul.f32 %v4835_v18, %v4830_v34  ;;  %v4838_v37 = vmul.f32 %v4835_v18, %v4831_v55 }
 0xd5d   :  { %v4849_v36 = vadd.f32 %v4847_v56, %v4837_v16  ;;  %v4850_v58 = vadd.f32 %v4848_v47, %v4838_v37 }
 0xd5f   :  { %4851 = vst [vmem:[#allocation4] sm:$0xff] %v4849_v36  ;;  %4852 = vst [vmem:[#allocation4 + $0x8] sm:$0xff] %v4850_v58  ;;  %v4853_v11 = vpack.c.bf16 %v4850_v58, %v4849_v36 }
 0xd61   :  { %6211 = vmatmul.mubr.bf16.vlgmr.msra.gmra.mrb[48].mxu1 %v4853_v11 }
 0xd62   :  { %6534 = shalt.err (!%p6531_p4)
}
 0xd63   :  { %s8530_s22 = sld [smem:[#allocation13_spill]] }
 0xd69   :  { %s6535_s20 = scalar_lea.hbm %s8530_s22, 256 }
 0xd6a   :  { %p6536_p5 = scmp.ne.s32.totalorder %s8530_s22, %s6535_s20  ;;  %p6539_p6 = scmp.lt.u32.totalorder %s6535_s20, %s8530_s22 }
 0xd6c   :  { %p6541_p7 = pnand %p6539_p6, %p6536_p5 }
 0xd6e   :  { %6544 = shalt.err (!%p6541_p7)
}
 0xd6f   :  { %s6566_s13 = smov 128   ;;  %s6567_s0 = smov 8  }
 0xd70   :  { %4991 = dma.vmem_to_hbm [thread:$0]  %s4986_s25, 256, %s8530_s22, [#allocation5], %s6566_s13, %s6566_s13, %s6567_s0  }
 0xd71   :  { %s8531_s15 = sld [smem:[#allocation12_spill]]  ;;  %s8532_s8 = sld [smem:[#allocation14_spill]] }
 0xd77   :  { %v5575_v62 = vld [vmem:[%s8531_s15] ss:$0 sm:$0xff] }
 0xe34   :  { %v4959_v2 = vpop.f32.mrb[48].mxu1 }
 0xe35   :  { %v4960_v19 = vadd.f32 %v5575_v62, %v4959_v2  ;;  %v6212_v63 = vpop.f32.mrb[49].mxu1 }
 0xe36   :  { %v4962_v28 = vpop.f32.mrb[50].mxu1 }
 0xe37   :  { %v5584_v30 = vmul.f32 -1.442695, %v4960_v19  ;;  %v4963_v59 = vadd.f32 %v5575_v62, %v4962_v28  ;;  %v6213_v41 = vpop.f32.mrb[51].mxu1 }
 0xe39   :  { %6514 = vpow2.f32 %v5584_v30  ;;  %v5585_v12 = vmul.f32 -1.442695, %v4963_v59 }
 0xe3b   :  { %6516 = vpow2.f32 %v5585_v12 }
 0xe43   :  { %v6515_v38 = vpop.eup %6514 }
 0xe44   :  { %v4972_v31 = vadd.f32 1.0, %v6515_v38 }
 0xe45   :  { %v6517_v51 = vpop.eup %6516 }
 0xe46   :  { %6518 = vrcp.f32 %v4972_v31  ;;  %v4973_v22 = vadd.f32 1.0, %v6517_v51 }
 0xe48   :  { %6520 = vrcp.f32 %v4973_v22 }
 0xe50   :  { %v6519_v15 = vpop.eup %6518 }
 0xe51   :  { %4978 = vst [vmem:[%s8532_s8] sm:$0xff] %v6519_v15 }
 0xe52   :  { %v6521_v32 = vpop.eup %6520 }
 0xe53   :  { %4979 = vst [vmem:[%s8532_s8 + $0x8] sm:$0xff] %v6521_v32 }
 0xe54   :  { %6545 = dma.done.wait [#allocation5], 256  }
 0xe55   :  { %6546 = vsyncadd [#allocation5], 4294967040 }
 0xe56   :  { %4999 = vsyncpa [#allocation5], 1 }

</bundles_post_ra>
